<compile_context>
chip_gen: v5e
topology: v5e:2x2
jax: 0.10.0
libtpu: 0.0.40
codegen_flags: <defaults>
</compile_context>

<pallas_src>
import functools

import jax
import jax.numpy as jnp
from jax.experimental import pallas as pl
from jax.experimental.pallas import tpu as pltpu


def _sigmoid(z):
    # exp + approx reciprocal both issue on the EUP slot, keeping the VALU free
    # on the serial LSTM critical path.
    return pl.reciprocal(1.0 + jnp.exp(-z), approx=True)


# ---------------------------------------------------------------------------
# Kernel 1: conv1 + BN + ReLU + conv2 + BN + ReLU + maxpool (one batch element)
# ---------------------------------------------------------------------------
def _conv_stack_kernel(lhs1_ref, w1_ref, s1_ref, sh1_ref, w2_ref, s2_ref,
                       sh2_ref, o_ref, y2_ref, *, T, F, C):
    TF = T * F
    Wp = F // 3

    # Conv1 (Cin=1, 3x7 'same') as a single im2col matmul, BN + ReLU fused.
    y1 = jnp.dot(lhs1_ref[...], w1_ref[...], preferred_element_type=jnp.float32)
    y1 = jnp.maximum(y1 * s1_ref[...] + sh1_ref[...], 0.0)             # (TF, C)

    # Conv2 (3x3 'same'): one (TF, C) @ (C, C) MXU matmul per tap.  Taps are
    # shifted slices of a zero-extended copy of y1; frequency-boundary wraps
    # are masked per output row (time boundary is covered by the zero pads).
    zpad = jnp.zeros((F + 1, C), jnp.float32)
    y1e = jnp.concatenate([zpad, y1, zpad], axis=0)                    # (TF+2F+2, C)
    f_iota = jax.lax.broadcasted_iota(jnp.int32, (F, C), 0)

    acc = jnp.zeros((TF, C), jnp.float32)
    for kw in range(3):
        part = jnp.zeros((TF, C), jnp.float32)
        for kh in range(3):
            off = (kh - 1) * F + (kw - 1) + (F + 1)
            tap = y1e[off:off + TF, :]                                 # (TF, C)
            part = part + jnp.dot(tap, w2_ref[kh * 3 + kw],
                                  preferred_element_type=jnp.float32)
        if kw == 0:      # left neighbour invalid at f == 0
            mask = jnp.concatenate([jnp.where(f_iota >= 1, 1.0, 0.0)] * T, axis=0)
            part = part * mask
        elif kw == 2:    # right neighbour invalid at f == F-1
            mask = jnp.concatenate([jnp.where(f_iota <= F - 2, 1.0, 0.0)] * T,
                                   axis=0)
            part = part * mask
        acc = acc + part
    y2 = jnp.maximum(acc * s2_ref[...] + sh2_ref[...], 0.0)            # (TF, C)

    # MaxPool2d((1, 3)) over freq: stride-3 reads + two VPU maxes (no
    # per-window slices / concatenates).
    y2_ref[...] = y2
    p0 = y2_ref[pl.ds(0, T * Wp, stride=3), :]
    p1 = y2_ref[pl.ds(1, T * Wp, stride=3), :]
    p2 = y2_ref[pl.ds(2, T * Wp, stride=3), :]
    o_ref[...] = jnp.maximum(p0, jnp.maximum(p1, p2))                  # (T*Wp, C)


def conv_stack(lhs1, w1_mat, s1, sh1, w2_taps, s2, sh2, *, T, F, C):
    B, TF, K1 = lhs1.shape
    Wp = F // 3
    kernel = functools.partial(_conv_stack_kernel, T=T, F=F, C=C)
    return pl.pallas_call(
        kernel,
        out_shape=jax.ShapeDtypeStruct((B, T * Wp, C), jnp.float32),
        grid=(B,),
        in_specs=[
            pl.BlockSpec((None, TF, K1), lambda b: (b, 0, 0)),
            pl.BlockSpec((K1, C), lambda b: (0, 0)),
            pl.BlockSpec((1, C), lambda b: (0, 0)),
            pl.BlockSpec((1, C), lambda b: (0, 0)),
            pl.BlockSpec((9, C, C), lambda b: (0, 0, 0)),
            pl.BlockSpec((1, C), lambda b: (0, 0)),
            pl.BlockSpec((1, C), lambda b: (0, 0)),
        ],
        out_specs=pl.BlockSpec((None, T * Wp, C), lambda b: (b, 0, 0)),
        scratch_shapes=[pltpu.VMEM((TF, C), jnp.float32)],
        compiler_params=pltpu.CompilerParams(dimension_semantics=("parallel",)),
    )(lhs1, w1_mat, s1.reshape(1, C), sh1.reshape(1, C), w2_taps,
      s2.reshape(1, C), sh2.reshape(1, C))


# ---------------------------------------------------------------------------
# Kernel 2: bidirectional LSTM (PyTorch i,f,g,o gate order) + Linear head.
# Grid axis = {onset, frame} head (parallel -> shards across v7x TensorCores).
# ---------------------------------------------------------------------------
def _bilstm_fc_kernel(seq_ref, wih_ref, whh_ref, b_ref, wfc_ref, bfc_ref,
                      out_ref, xp_ref, *, S, B, Hp):
    G = 4 * Hp

    # Hoisted input projection: every timestep, both directions, all 4 gates in
    # one MXU matmul, with (bih + bhh) folded in.  Stored s-major so the
    # recurrence fetches per-step rows with a dynamic slice.
    xp_ref[...] = jnp.dot(seq_ref[...], wih_ref[...],
                          preferred_element_type=jnp.float32) + b_ref[...]

    def run_direction(d, reverse):
        def step(s, carry):
            h, c = carry
            t = (S - 1 - s) if reverse else s
            xrow = xp_ref[pl.ds(t * B, B), :]                 # (B, 2G)
            gates = xrow[:, d * G:(d + 1) * G] + jnp.dot(
                h, whh_ref[d], preferred_element_type=jnp.float32)
            i_g = _sigmoid(gates[:, 0:Hp])
            f_g = _sigmoid(gates[:, Hp:2 * Hp])
            g_g = jnp.tanh(gates[:, 2 * Hp:3 * Hp])
            o_g = _sigmoid(gates[:, 3 * Hp:4 * Hp])
            c = f_g * c + i_g * g_g
            h = o_g * jnp.tanh(c)
            # FC head folded into the recurrence: this direction's half of the
            # block-padded (2*Hp, Hp) weight, written straight into the output.
            fc = jnp.dot(h, wfc_ref[pl.ds(d * Hp, Hp), :],
                         preferred_element_type=jnp.float32)  # (B, Hp)
            if reverse:
                out_ref[t] = out_ref[t] + fc
            else:
                out_ref[t] = fc + bfc_ref[...]
            return (h, c)

        zero = jnp.zeros((B, Hp), jnp.float32)
        jax.lax.fori_loop(0, S, step, (zero, zero), unroll=True)

    run_direction(0, reverse=False)   # forward pass writes output (+ FC bias)
    run_direction(1, reverse=True)    # backward pass accumulates into it


def bilstm_fc(seq_flat, wih_all, whh_all, b_all, wfc_all, bfc_all, *, S, B, Hp):
    D = seq_flat.shape[-1]
    G = 4 * Hp
    kernel = functools.partial(_bilstm_fc_kernel, S=S, B=B, Hp=Hp)
    return pl.pallas_call(
        kernel,
        out_shape=jax.ShapeDtypeStruct((2, S, B, Hp), jnp.float32),
        grid=(2,),
        in_specs=[
            pl.BlockSpec((S * B, D), lambda h: (0, 0)),
            pl.BlockSpec((None, D, 2 * G), lambda h: (h, 0, 0)),
            pl.BlockSpec((None, 2, Hp, G), lambda h: (h, 0, 0, 0)),
            pl.BlockSpec((None, 1, 2 * G), lambda h: (h, 0, 0)),
            pl.BlockSpec((None, 2 * Hp, Hp), lambda h: (h, 0, 0)),
            pl.BlockSpec((None, 1, Hp), lambda h: (h, 0, 0)),
        ],
        out_specs=pl.BlockSpec((None, S, B, Hp), lambda h: (h, 0, 0, 0)),
        scratch_shapes=[pltpu.VMEM((S * B, 2 * G), jnp.float32)],
        compiler_params=pltpu.CompilerParams(dimension_semantics=("parallel",)),
    )(seq_flat, wih_all, whh_all, b_all, wfc_all, bfc_all)


# ---------------------------------------------------------------------------
# Parameters (deterministic synthetic init) and forward-pass glue
# ---------------------------------------------------------------------------
def init_params(key, T):
    D = 48 * T
    H = 88
    keys = iter(jax.random.split(key, 64))

    def nrm(shape, s=0.1):
        return s * jax.random.normal(next(keys), shape, jnp.float32)

    def lstm_dir():
        return dict(wih=nrm((4 * H, D), 0.05), whh=nrm((4 * H, H), 0.05),
                    bih=nrm((4 * H,)), bhh=nrm((4 * H,)))

    return dict(
        w1=nrm((48, 1, 3, 7)), b1=nrm((48,)),
        bn1_gamma=1.0 + nrm((48,)), bn1_beta=nrm((48,)),
        bn1_mean=nrm((48,)), bn1_var=1.0 + jnp.abs(nrm((48,))),
        w2=nrm((48, 48, 3, 3), 0.05), b2=nrm((48,)),
        bn2_gamma=1.0 + nrm((48,)), bn2_beta=nrm((48,)),
        bn2_mean=nrm((48,)), bn2_var=1.0 + jnp.abs(nrm((48,))),
        onset_lstm={"fwd": lstm_dir(), "rev": lstm_dir()},
        frame_lstm={"fwd": lstm_dir(), "rev": lstm_dir()},
        onset_fc_w=nrm((88, 176), 0.05), onset_fc_b=nrm((88,)),
        frame_fc_w=nrm((88, 176), 0.05), frame_fc_b=nrm((88,)),
    )


def onsets_and_frames_forward(x, p):
    B, T, F = x.shape
    C = 48
    H = 88
    Hp = 128
    Wp = F // 3
    S = Wp
    D = C * T
    eps = 1e-5

    # Fold BatchNorm (inference, running stats) + conv bias into scale/shift.
    s1 = p["bn1_gamma"] * jax.lax.rsqrt(p["bn1_var"] + eps)
    sh1 = (p["b1"] - p["bn1_mean"]) * s1 + p["bn1_beta"]
    s2 = p["bn2_gamma"] * jax.lax.rsqrt(p["bn2_var"] + eps)
    sh2 = (p["b2"] - p["bn2_mean"]) * s2 + p["bn2_beta"]

    # Conv weights (Cout, Cin, KH, KW) -> matmul-friendly layouts.
    w1_mat = jnp.transpose(p["w1"], (2, 3, 1, 0)).reshape(3 * 7, C)     # (21, C)
    w2_taps = jnp.transpose(p["w2"], (2, 3, 1, 0)).reshape(9, C, C)     # (tap, Cin, Cout)

    # im2col for conv1 (Cin == 1): (B, T*F, 21), column order kh*7 + kw.
    xpad = jnp.pad(x, ((0, 0), (1, 1), (3, 3)))
    cols = [xpad[:, kh:kh + T, kw:kw + F] for kh in range(3) for kw in range(7)]
    lhs1 = jnp.stack(cols, axis=-1).reshape(B, T * F, 21)

    y = conv_stack(lhs1, w1_mat, s1, sh1, w2_taps, s2, sh2, T=T, F=F, C=C)

    # PyTorch: (B,C,T,W) -> permute(0,3,1,2) -> (B,W,C,T) -> reshape(B,W,C*T).
    # Here:    (B, T*Wp, C) -> (Wp, B, C, T) -> (S*B, C*T); C*T = 384 is
    # lane-dense (3 * 128) for the LSTM input projection.
    seq = jnp.transpose(y.reshape(B, T, Wp, C), (2, 0, 3, 1)).reshape(S * B, D)

    # LSTM weights: concat gates (i,f,g,o) and directions along N, pad 88->128.
    def prep_dir(d):
        wih = jnp.pad(d["wih"].reshape(4, H, D), ((0, 0), (0, Hp - H), (0, 0)))
        wih = jnp.transpose(wih, (2, 0, 1)).reshape(D, 4 * Hp)          # (D, 512)
        whh = jnp.pad(d["whh"].reshape(4, H, H),
                      ((0, 0), (0, Hp - H), (0, Hp - H)))
        whh = jnp.transpose(whh, (2, 0, 1)).reshape(Hp, 4 * Hp)         # (128, 512)
        b = jnp.pad((d["bih"] + d["bhh"]).reshape(4, H), ((0, 0), (0, Hp - H)))
        return wih, whh, b.reshape(1, 4 * Hp)

    def prep_head(lstm_p, fc_w, fc_b):
        wf, hf, bf = prep_dir(lstm_p["fwd"])
        wr, hr, br = prep_dir(lstm_p["rev"])
        wt = fc_w.T                                                     # (176, 88)
        wfc = jnp.zeros((2 * Hp, Hp), jnp.float32)
        wfc = wfc.at[0:H, 0:H].set(wt[0:H])                             # forward half
        wfc = wfc.at[Hp:Hp + H, 0:H].set(wt[H:2 * H])                   # backward half
        bfc = jnp.zeros((1, Hp), jnp.float32).at[0, 0:H].set(fc_b)
        return (jnp.concatenate([wf, wr], axis=1),                      # (D, 1024)
                jnp.stack([hf, hr]),                                    # (2, 128, 512)
                jnp.concatenate([bf, br], axis=1),                      # (1, 1024)
                wfc, bfc)

    onset = prep_head(p["onset_lstm"], p["onset_fc_w"], p["onset_fc_b"])
    frame = prep_head(p["frame_lstm"], p["frame_fc_w"], p["frame_fc_b"])
    packed = [jnp.stack(list(pair)) for pair in zip(onset, frame)]

    out = bilstm_fc(seq, *packed, S=S, B=B, Hp=Hp)                      # (2, S, B, 128)
    preds = jnp.transpose(out, (0, 2, 1, 3))[..., :H]                   # (2, B, S, 88)
    return preds[0], preds[1]


if __name__ == "__main__":
    key = jax.random.PRNGKey(0)
    kx, kp = jax.random.split(key)
    B, T, F = 2, 8, 12           # batch=2, time=8, freq=12 -> LSTM seq len 4, input 384
    x = jax.random.normal(kx, (B, T, F), jnp.float32)
    params = init_params(kp, T)

    fwd = jax.jit(onsets_and_frames_forward)
    onset_pred, frame_pred = fwd(x, params)
    onset_pred = jax.block_until_ready(onset_pred)
    frame_pred = jax.block_until_ready(frame_pred)

    assert onset_pred.shape == (B, F // 3, 88), onset_pred.shape
    assert frame_pred.shape == (B, F // 3, 88), frame_pred.shape
    assert bool(jnp.all(jnp.isfinite(onset_pred)))
    assert bool(jnp.all(jnp.isfinite(frame_pred)))
    print("KERNEL_OK")
</pallas_src>

<mosaic_0001>
module attributes {stable_mosaic.version = 11 : i64} {
  func.func @_conv_stack_kernel(%arg0: i32, %arg1: memref<1x96x21xf32, #tpu.memory_space<vmem>>, %arg2: memref<21x48xf32, #tpu.memory_space<vmem>>, %arg3: memref<1x48xf32, #tpu.memory_space<vmem>>, %arg4: memref<1x48xf32, #tpu.memory_space<vmem>>, %arg5: memref<9x48x48xf32, #tpu.memory_space<vmem>>, %arg6: memref<1x48xf32, #tpu.memory_space<vmem>>, %arg7: memref<1x48xf32, #tpu.memory_space<vmem>>, %arg8: memref<1x32x48xf32, #tpu.memory_space<vmem>>, %arg9: memref<96x48xf32, #tpu.memory_space<vmem>>) attributes {dimension_semantics = [#tpu.dimension_semantics<parallel>], iteration_bounds = array<i64: 2>, scalar_prefetch = 0 : i64, scratch_operands = 1 : i64, tpu.core_type = #tpu.core_type<tc>, window_params = [{transform_indices = @transform_0, window_bounds = array<i64: 1, 96, 21>}, {pipeline_mode = #tpu.pipeline_mode<synchronous>, transform_indices = @transform_1, window_bounds = array<i64: 21, 48>}, {pipeline_mode = #tpu.pipeline_mode<synchronous>, transform_indices = @transform_2, window_bounds = array<i64: 1, 48>}, {pipeline_mode = #tpu.pipeline_mode<synchronous>, transform_indices = @transform_3, window_bounds = array<i64: 1, 48>}, {pipeline_mode = #tpu.pipeline_mode<synchronous>, transform_indices = @transform_4, window_bounds = array<i64: 9, 48, 48>}, {pipeline_mode = #tpu.pipeline_mode<synchronous>, transform_indices = @transform_5, window_bounds = array<i64: 1, 48>}, {pipeline_mode = #tpu.pipeline_mode<synchronous>, transform_indices = @transform_6, window_bounds = array<i64: 1, 48>}, {transform_indices = @transform_7, window_bounds = array<i64: 1, 32, 48>}]} {
    %c0 = arith.constant 0 : index
    %c0_0 = arith.constant 0 : index
    %c0_1 = arith.constant 0 : index
    %0 = vector.load %arg1[%c0, %c0_0, %c0_1] : memref<1x96x21xf32, #tpu.memory_space<vmem>>, vector<1x96x21xf32>
    %1 = vector.shape_cast %0 : vector<1x96x21xf32> to vector<96x21xf32>
    %c0_2 = arith.constant 0 : index
    %c0_3 = arith.constant 0 : index
    %2 = vector.load %arg2[%c0_2, %c0_3] : memref<21x48xf32, #tpu.memory_space<vmem>>, vector<21x48xf32>
    %cst = arith.constant dense<0.000000e+00> : vector<96x48xf32>
    %3 = tpu.matmul %1, %2, %cst {dimension_numbers = #tpu.dot_dimension_numbers<[1], [0], [0], [1], [0, 0, 1, 1], [], []>} : vector<96x21xf32>, vector<21x48xf32>, vector<96x48xf32> -> vector<96x48xf32>
    %c0_4 = arith.constant 0 : index
    %c0_5 = arith.constant 0 : index
    %4 = vector.load %arg3[%c0_4, %c0_5] : memref<1x48xf32, #tpu.memory_space<vmem>>, vector<1x48xf32>
    %5 = vector.broadcast %4 : vector<1x48xf32> to vector<96x48xf32>
    %6 = arith.mulf %3, %5 : vector<96x48xf32>
    %c0_6 = arith.constant 0 : index
    %c0_7 = arith.constant 0 : index
    %7 = vector.load %arg4[%c0_6, %c0_7] : memref<1x48xf32, #tpu.memory_space<vmem>>, vector<1x48xf32>
    %8 = vector.broadcast %7 : vector<1x48xf32> to vector<96x48xf32>
    %9 = arith.addf %6, %8 : vector<96x48xf32>
    %cst_8 = arith.constant 0.000000e+00 : f32
    %10 = vector.broadcast %cst_8 : f32 to vector<96x48xf32>
    %11 = arith.maximumf %9, %10 : vector<96x48xf32>
    %cst_9 = arith.constant 0.000000e+00 : f32
    %12 = vector.broadcast %cst_9 : f32 to vector<13x48xf32>
    %13 = tpu.concatenate %12, %11, %12 in 0 : vector<13x48xf32>, vector<96x48xf32>, vector<13x48xf32> -> vector<122x48xf32>
    %14 = tpu.iota {dimensions = array<i32: 0>} : vector<12x48xi32>
    %cst_10 = arith.constant 0.000000e+00 : f32
    %15 = vector.broadcast %cst_10 : f32 to vector<96x48xf32>
    %cst_11 = arith.constant 0.000000e+00 : f32
    %16 = vector.broadcast %cst_11 : f32 to vector<96x48xf32>
    %17 = vector.extract_strided_slice %13 {offsets = [0, 0], sizes = [96, 48], strides = [1, 1]} : vector<122x48xf32> to vector<96x48xf32>
    %c0_12 = arith.constant 0 : index
    %c0_13 = arith.constant 0 : index
    %c0_14 = arith.constant 0 : index
    %18 = vector.load %arg5[%c0_12, %c0_13, %c0_14] : memref<9x48x48xf32, #tpu.memory_space<vmem>>, vector<1x48x48xf32>
    %19 = vector.shape_cast %18 : vector<1x48x48xf32> to vector<48x48xf32>
    %cst_15 = arith.constant dense<0.000000e+00> : vector<96x48xf32>
    %20 = tpu.matmul %17, %19, %cst_15 {dimension_numbers = #tpu.dot_dimension_numbers<[1], [0], [0], [1], [0, 0, 1, 1], [], []>} : vector<96x48xf32>, vector<48x48xf32>, vector<96x48xf32> -> vector<96x48xf32>
    %21 = arith.addf %16, %20 : vector<96x48xf32>
    %22 = vector.extract_strided_slice %13 {offsets = [12, 0], sizes = [96, 48], strides = [1, 1]} : vector<122x48xf32> to vector<96x48xf32>
    %c3 = arith.constant 3 : index
    %c0_16 = arith.constant 0 : index
    %c0_17 = arith.constant 0 : index
    %23 = vector.load %arg5[%c3, %c0_16, %c0_17] : memref<9x48x48xf32, #tpu.memory_space<vmem>>, vector<1x48x48xf32>
    %24 = vector.shape_cast %23 : vector<1x48x48xf32> to vector<48x48xf32>
    %cst_18 = arith.constant dense<0.000000e+00> : vector<96x48xf32>
    %25 = tpu.matmul %22, %24, %cst_18 {dimension_numbers = #tpu.dot_dimension_numbers<[1], [0], [0], [1], [0, 0, 1, 1], [], []>} : vector<96x48xf32>, vector<48x48xf32>, vector<96x48xf32> -> vector<96x48xf32>
    %26 = arith.addf %21, %25 : vector<96x48xf32>
    %27 = vector.extract_strided_slice %13 {offsets = [24, 0], sizes = [96, 48], strides = [1, 1]} : vector<122x48xf32> to vector<96x48xf32>
    %c6 = arith.constant 6 : index
    %c0_19 = arith.constant 0 : index
    %c0_20 = arith.constant 0 : index
    %28 = vector.load %arg5[%c6, %c0_19, %c0_20] : memref<9x48x48xf32, #tpu.memory_space<vmem>>, vector<1x48x48xf32>
    %29 = vector.shape_cast %28 : vector<1x48x48xf32> to vector<48x48xf32>
    %cst_21 = arith.constant dense<0.000000e+00> : vector<96x48xf32>
    %30 = tpu.matmul %27, %29, %cst_21 {dimension_numbers = #tpu.dot_dimension_numbers<[1], [0], [0], [1], [0, 0, 1, 1], [], []>} : vector<96x48xf32>, vector<48x48xf32>, vector<96x48xf32> -> vector<96x48xf32>
    %31 = arith.addf %26, %30 : vector<96x48xf32>
    %c1_i32 = arith.constant 1 : i32
    %32 = vector.broadcast %c1_i32 : i32 to vector<12x48xi32>
    %33 = arith.cmpi sge, %14, %32 : vector<12x48xi32>
    %cst_22 = arith.constant 1.000000e+00 : f32
    %cst_23 = arith.constant 0.000000e+00 : f32
    %34 = vector.broadcast %cst_22 : f32 to vector<12x48xf32>
    %35 = vector.broadcast %cst_23 : f32 to vector<12x48xf32>
    %36 = arith.select %33, %34, %35 : vector<12x48xi1>, vector<12x48xf32>
    %37 = tpu.concatenate %36, %36, %36, %36, %36, %36, %36, %36 in 0 : vector<12x48xf32>, vector<12x48xf32>, vector<12x48xf32>, vector<12x48xf32>, vector<12x48xf32>, vector<12x48xf32>, vector<12x48xf32>, vector<12x48xf32> -> vector<96x48xf32>
    %38 = arith.mulf %31, %37 : vector<96x48xf32>
    %39 = arith.addf %15, %38 : vector<96x48xf32>
    %cst_24 = arith.constant 0.000000e+00 : f32
    %40 = vector.broadcast %cst_24 : f32 to vector<96x48xf32>
    %41 = vector.extract_strided_slice %13 {offsets = [1, 0], sizes = [96, 48], strides = [1, 1]} : vector<122x48xf32> to vector<96x48xf32>
    %c1 = arith.constant 1 : index
    %c0_25 = arith.constant 0 : index
    %c0_26 = arith.constant 0 : index
    %42 = vector.load %arg5[%c1, %c0_25, %c0_26] : memref<9x48x48xf32, #tpu.memory_space<vmem>>, vector<1x48x48xf32>
    %43 = vector.shape_cast %42 : vector<1x48x48xf32> to vector<48x48xf32>
    %cst_27 = arith.constant dense<0.000000e+00> : vector<96x48xf32>
    %44 = tpu.matmul %41, %43, %cst_27 {dimension_numbers = #tpu.dot_dimension_numbers<[1], [0], [0], [1], [0, 0, 1, 1], [], []>} : vector<96x48xf32>, vector<48x48xf32>, vector<96x48xf32> -> vector<96x48xf32>
    %45 = arith.addf %40, %44 : vector<96x48xf32>
    %46 = vector.extract_strided_slice %13 {offsets = [13, 0], sizes = [96, 48], strides = [1, 1]} : vector<122x48xf32> to vector<96x48xf32>
    %c4 = arith.constant 4 : index
    %c0_28 = arith.constant 0 : index
    %c0_29 = arith.constant 0 : index
    %47 = vector.load %arg5[%c4, %c0_28, %c0_29] : memref<9x48x48xf32, #tpu.memory_space<vmem>>, vector<1x48x48xf32>
    %48 = vector.shape_cast %47 : vector<1x48x48xf32> to vector<48x48xf32>
    %cst_30 = arith.constant dense<0.000000e+00> : vector<96x48xf32>
    %49 = tpu.matmul %46, %48, %cst_30 {dimension_numbers = #tpu.dot_dimension_numbers<[1], [0], [0], [1], [0, 0, 1, 1], [], []>} : vector<96x48xf32>, vector<48x48xf32>, vector<96x48xf32> -> vector<96x48xf32>
    %50 = arith.addf %45, %49 : vector<96x48xf32>
    %51 = vector.extract_strided_slice %13 {offsets = [25, 0], sizes = [96, 48], strides = [1, 1]} : vector<122x48xf32> to vector<96x48xf32>
    %c7 = arith.constant 7 : index
    %c0_31 = arith.constant 0 : index
    %c0_32 = arith.constant 0 : index
    %52 = vector.load %arg5[%c7, %c0_31, %c0_32] : memref<9x48x48xf32, #tpu.memory_space<vmem>>, vector<1x48x48xf32>
    %53 = vector.shape_cast %52 : vector<1x48x48xf32> to vector<48x48xf32>
    %cst_33 = arith.constant dense<0.000000e+00> : vector<96x48xf32>
    %54 = tpu.matmul %51, %53, %cst_33 {dimension_numbers = #tpu.dot_dimension_numbers<[1], [0], [0], [1], [0, 0, 1, 1], [], []>} : vector<96x48xf32>, vector<48x48xf32>, vector<96x48xf32> -> vector<96x48xf32>
    %55 = arith.addf %50, %54 : vector<96x48xf32>
    %56 = arith.addf %39, %55 : vector<96x48xf32>
    %cst_34 = arith.constant 0.000000e+00 : f32
    %57 = vector.broadcast %cst_34 : f32 to vector<96x48xf32>
    %58 = vector.extract_strided_slice %13 {offsets = [2, 0], sizes = [96, 48], strides = [1, 1]} : vector<122x48xf32> to vector<96x48xf32>
    %c2 = arith.constant 2 : index
    %c0_35 = arith.constant 0 : index
    %c0_36 = arith.constant 0 : index
    %59 = vector.load %arg5[%c2, %c0_35, %c0_36] : memref<9x48x48xf32, #tpu.memory_space<vmem>>, vector<1x48x48xf32>
    %60 = vector.shape_cast %59 : vector<1x48x48xf32> to vector<48x48xf32>
    %cst_37 = arith.constant dense<0.000000e+00> : vector<96x48xf32>
    %61 = tpu.matmul %58, %60, %cst_37 {dimension_numbers = #tpu.dot_dimension_numbers<[1], [0], [0], [1], [0, 0, 1, 1], [], []>} : vector<96x48xf32>, vector<48x48xf32>, vector<96x48xf32> -> vector<96x48xf32>
    %62 = arith.addf %57, %61 : vector<96x48xf32>
    %63 = vector.extract_strided_slice %13 {offsets = [14, 0], sizes = [96, 48], strides = [1, 1]} : vector<122x48xf32> to vector<96x48xf32>
    %c5 = arith.constant 5 : index
    %c0_38 = arith.constant 0 : index
    %c0_39 = arith.constant 0 : index
    %64 = vector.load %arg5[%c5, %c0_38, %c0_39] : memref<9x48x48xf32, #tpu.memory_space<vmem>>, vector<1x48x48xf32>
    %65 = vector.shape_cast %64 : vector<1x48x48xf32> to vector<48x48xf32>
    %cst_40 = arith.constant dense<0.000000e+00> : vector<96x48xf32>
    %66 = tpu.matmul %63, %65, %cst_40 {dimension_numbers = #tpu.dot_dimension_numbers<[1], [0], [0], [1], [0, 0, 1, 1], [], []>} : vector<96x48xf32>, vector<48x48xf32>, vector<96x48xf32> -> vector<96x48xf32>
    %67 = arith.addf %62, %66 : vector<96x48xf32>
    %68 = vector.extract_strided_slice %13 {offsets = [26, 0], sizes = [96, 48], strides = [1, 1]} : vector<122x48xf32> to vector<96x48xf32>
    %c8 = arith.constant 8 : index
    %c0_41 = arith.constant 0 : index
    %c0_42 = arith.constant 0 : index
    %69 = vector.load %arg5[%c8, %c0_41, %c0_42] : memref<9x48x48xf32, #tpu.memory_space<vmem>>, vector<1x48x48xf32>
    %70 = vector.shape_cast %69 : vector<1x48x48xf32> to vector<48x48xf32>
    %cst_43 = arith.constant dense<0.000000e+00> : vector<96x48xf32>
    %71 = tpu.matmul %68, %70, %cst_43 {dimension_numbers = #tpu.dot_dimension_numbers<[1], [0], [0], [1], [0, 0, 1, 1], [], []>} : vector<96x48xf32>, vector<48x48xf32>, vector<96x48xf32> -> vector<96x48xf32>
    %72 = arith.addf %67, %71 : vector<96x48xf32>
    %c10_i32 = arith.constant 10 : i32
    %73 = vector.broadcast %c10_i32 : i32 to vector<12x48xi32>
    %74 = arith.cmpi sle, %14, %73 : vector<12x48xi32>
    %cst_44 = arith.constant 1.000000e+00 : f32
    %cst_45 = arith.constant 0.000000e+00 : f32
    %75 = vector.broadcast %cst_44 : f32 to vector<12x48xf32>
    %76 = vector.broadcast %cst_45 : f32 to vector<12x48xf32>
    %77 = arith.select %74, %75, %76 : vector<12x48xi1>, vector<12x48xf32>
    %78 = tpu.concatenate %77, %77, %77, %77, %77, %77, %77, %77 in 0 : vector<12x48xf32>, vector<12x48xf32>, vector<12x48xf32>, vector<12x48xf32>, vector<12x48xf32>, vector<12x48xf32>, vector<12x48xf32>, vector<12x48xf32> -> vector<96x48xf32>
    %79 = arith.mulf %72, %78 : vector<96x48xf32>
    %80 = arith.addf %56, %79 : vector<96x48xf32>
    %c0_46 = arith.constant 0 : index
    %c0_47 = arith.constant 0 : index
    %81 = vector.load %arg6[%c0_46, %c0_47] : memref<1x48xf32, #tpu.memory_space<vmem>>, vector<1x48xf32>
    %82 = vector.broadcast %81 : vector<1x48xf32> to vector<96x48xf32>
    %83 = arith.mulf %80, %82 : vector<96x48xf32>
    %c0_48 = arith.constant 0 : index
    %c0_49 = arith.constant 0 : index
    %84 = vector.load %arg7[%c0_48, %c0_49] : memref<1x48xf32, #tpu.memory_space<vmem>>, vector<1x48xf32>
    %85 = vector.broadcast %84 : vector<1x48xf32> to vector<96x48xf32>
    %86 = arith.addf %83, %85 : vector<96x48xf32>
    %cst_50 = arith.constant 0.000000e+00 : f32
    %87 = vector.broadcast %cst_50 : f32 to vector<96x48xf32>
    %88 = arith.maximumf %86, %87 : vector<96x48xf32>
    %c0_51 = arith.constant 0 : index
    %c0_52 = arith.constant 0 : index
    %89 = vector.load %arg9[%c0_51, %c0_52] : memref<96x48xf32, #tpu.memory_space<vmem>>, vector<96x48xf32>
    tpu.vector_store %arg9[%c0_51, %c0_52], %88 {strides = array<i32>} : memref<96x48xf32, #tpu.memory_space<vmem>>, vector<96x48xf32>,
    %c0_53 = arith.constant 0 : index
    %c0_54 = arith.constant 0 : index
    %90 = tpu.strided_load %arg9[%c0_53, %c0_54] {strides = array<i32: 3, 1>} : memref<96x48xf32, #tpu.memory_space<vmem>>, vector<32x48xf32>
    %c1_55 = arith.constant 1 : index
    %c0_56 = arith.constant 0 : index
    %91 = tpu.strided_load %arg9[%c1_55, %c0_56] {strides = array<i32: 3, 1>} : memref<96x48xf32, #tpu.memory_space<vmem>>, vector<32x48xf32>
    %c2_57 = arith.constant 2 : index
    %c0_58 = arith.constant 0 : index
    %92 = tpu.strided_load %arg9[%c2_57, %c0_58] {strides = array<i32: 3, 1>} : memref<96x48xf32, #tpu.memory_space<vmem>>, vector<32x48xf32>
    %93 = arith.maximumf %91, %92 : vector<32x48xf32>
    %94 = arith.maximumf %90, %93 : vector<32x48xf32>
    %c0_59 = arith.constant 0 : index
    %c0_60 = arith.constant 0 : index
    %c0_61 = arith.constant 0 : index
    %95 = vector.load %arg8[%c0_59, %c0_60, %c0_61] : memref<1x32x48xf32, #tpu.memory_space<vmem>>, vector<1x32x48xf32>
    %96 = vector.shape_cast %95 : vector<1x32x48xf32> to vector<32x48xf32>
    %97 = vector.shape_cast %94 : vector<32x48xf32> to vector<1x32x48xf32>
    tpu.vector_store %arg8[%c0_59, %c0_60, %c0_61], %97 {strides = array<i32>} : memref<1x32x48xf32, #tpu.memory_space<vmem>>, vector<1x32x48xf32>,
    return
  }
  func.func @transform_0(%arg0: i32) -> (i32, i32, i32) {
    %c0_i32 = arith.constant 0 : i32
    %c0_i32_0 = arith.constant 0 : i32
    %c0_i32_1 = arith.constant 0 : i32
    return %arg0, %c0_i32, %c0_i32_0 : i32, i32, i32
  }
  func.func @transform_1(%arg0: i32) -> (i32, i32) {
    %c0_i32 = arith.constant 0 : i32
    %c0_i32_0 = arith.constant 0 : i32
    %c0_i32_1 = arith.constant 0 : i32
    return %c0_i32, %c0_i32_0 : i32, i32
  }
  func.func @transform_2(%arg0: i32) -> (i32, i32) {
    %c0_i32 = arith.constant 0 : i32
    %c0_i32_0 = arith.constant 0 : i32
    %c0_i32_1 = arith.constant 0 : i32
    return %c0_i32, %c0_i32_0 : i32, i32
  }
  func.func @transform_3(%arg0: i32) -> (i32, i32) {
    %c0_i32 = arith.constant 0 : i32
    %c0_i32_0 = arith.constant 0 : i32
    %c0_i32_1 = arith.constant 0 : i32
    return %c0_i32, %c0_i32_0 : i32, i32
  }
  func.func @transform_4(%arg0: i32) -> (i32, i32, i32) {
    %c0_i32 = arith.constant 0 : i32
    %c0_i32_0 = arith.constant 0 : i32
    %c0_i32_1 = arith.constant 0 : i32
    %c0_i32_2 = arith.constant 0 : i32
    return %c0_i32, %c0_i32_0, %c0_i32_1 : i32, i32, i32
  }
  func.func @transform_5(%arg0: i32) -> (i32, i32) {
    %c0_i32 = arith.constant 0 : i32
    %c0_i32_0 = arith.constant 0 : i32
    %c0_i32_1 = arith.constant 0 : i32
    return %c0_i32, %c0_i32_0 : i32, i32
  }
  func.func @transform_6(%arg0: i32) -> (i32, i32) {
    %c0_i32 = arith.constant 0 : i32
    %c0_i32_0 = arith.constant 0 : i32
    %c0_i32_1 = arith.constant 0 : i32
    return %c0_i32, %c0_i32_0 : i32, i32
  }
  func.func @transform_7(%arg0: i32) -> (i32, i32, i32) {
    %c0_i32 = arith.constant 0 : i32
    %c0_i32_0 = arith.constant 0 : i32
    %c0_i32_1 = arith.constant 0 : i32
    return %arg0, %c0_i32, %c0_i32_0 : i32, i32, i32
  }
}

module attributes {stable_mosaic.version = 11 : i64} {
  func.func @_bilstm_fc_kernel(%arg0: i32, %arg1: memref<8x384xf32, #tpu.memory_space<vmem>>, %arg2: memref<1x384x1024xf32, #tpu.memory_space<vmem>>, %arg3: memref<1x2x128x512xf32, #tpu.memory_space<vmem>>, %arg4: memref<1x1x1024xf32, #tpu.memory_space<vmem>>, %arg5: memref<1x256x128xf32, #tpu.memory_space<vmem>>, %arg6: memref<1x1x128xf32, #tpu.memory_space<vmem>>, %arg7: memref<1x4x2x128xf32, #tpu.memory_space<vmem>>, %arg8: memref<8x1024xf32, #tpu.memory_space<vmem>>) attributes {dimension_semantics = [#tpu.dimension_semantics<parallel>], iteration_bounds = array<i64: 2>, scalar_prefetch = 0 : i64, scratch_operands = 1 : i64, tpu.core_type = #tpu.core_type<tc>, window_params = [{pipeline_mode = #tpu.pipeline_mode<synchronous>, transform_indices = @transform_0, window_bounds = array<i64: 8, 384>}, {transform_indices = @transform_1, window_bounds = array<i64: 1, 384, 1024>}, {transform_indices = @transform_2, window_bounds = array<i64: 1, 2, 128, 512>}, {transform_indices = @transform_3, window_bounds = array<i64: 1, 1, 1024>}, {transform_indices = @transform_4, window_bounds = array<i64: 1, 256, 128>}, {transform_indices = @transform_5, window_bounds = array<i64: 1, 1, 128>}, {transform_indices = @transform_6, window_bounds = array<i64: 1, 4, 2, 128>}]} {
    %c0 = arith.constant 0 : index
    %c0_0 = arith.constant 0 : index
    %0 = vector.load %arg1[%c0, %c0_0] : memref<8x384xf32, #tpu.memory_space<vmem>>, vector<8x384xf32>
    %c0_1 = arith.constant 0 : index
    %c0_2 = arith.constant 0 : index
    %c0_3 = arith.constant 0 : index
    %1 = vector.load %arg2[%c0_1, %c0_2, %c0_3] : memref<1x384x1024xf32, #tpu.memory_space<vmem>>, vector<1x384x1024xf32>
    %2 = vector.shape_cast %1 : vector<1x384x1024xf32> to vector<384x1024xf32>
    %cst = arith.constant dense<0.000000e+00> : vector<8x1024xf32>
    %3 = tpu.matmul %0, %2, %cst {dimension_numbers = #tpu.dot_dimension_numbers<[1], [0], [0], [1], [0, 0, 1, 1], [], []>} : vector<8x384xf32>, vector<384x1024xf32>, vector<8x1024xf32> -> vector<8x1024xf32>
    %c0_4 = arith.constant 0 : index
    %c0_5 = arith.constant 0 : index
    %c0_6 = arith.constant 0 : index
    %4 = vector.load %arg4[%c0_4, %c0_5, %c0_6] : memref<1x1x1024xf32, #tpu.memory_space<vmem>>, vector<1x1x1024xf32>
    %5 = vector.shape_cast %4 : vector<1x1x1024xf32> to vector<1x1024xf32>
    %6 = vector.broadcast %5 : vector<1x1024xf32> to vector<8x1024xf32>
    %7 = arith.addf %3, %6 : vector<8x1024xf32>
    %c0_7 = arith.constant 0 : index
    %c0_8 = arith.constant 0 : index
    %8 = vector.load %arg8[%c0_7, %c0_8] : memref<8x1024xf32, #tpu.memory_space<vmem>>, vector<8x1024xf32>
    tpu.vector_store %arg8[%c0_7, %c0_8], %7 {strides = array<i32>} : memref<8x1024xf32, #tpu.memory_space<vmem>>, vector<8x1024xf32>,
    %cst_9 = arith.constant 0.000000e+00 : f32
    %9 = vector.broadcast %cst_9 : f32 to vector<2x128xf32>
    %c0_i32 = arith.constant 0 : i32
    %c2_i32 = arith.constant 2 : i32
    %10 = arith.muli %c0_i32, %c2_i32 : i32
    %11 = arith.index_cast %10 : i32 to index
    %c0_10 = arith.constant 0 : index
    %12 = vector.load %arg8[%11, %c0_10] : memref<8x1024xf32, #tpu.memory_space<vmem>>, vector<2x1024xf32>
    %13 = vector.extract_strided_slice %12 {offsets = [0, 0], sizes = [2, 512], strides = [1, 1]} : vector<2x1024xf32> to vector<2x512xf32>
    %c0_11 = arith.constant 0 : index
    %c0_12 = arith.constant 0 : index
    %c0_13 = arith.constant 0 : index
    %c0_14 = arith.constant 0 : index
    %14 = vector.load %arg3[%c0_11, %c0_12, %c0_13, %c0_14] : memref<1x2x128x512xf32, #tpu.memory_space<vmem>>, vector<1x1x128x512xf32>
    %15 = vector.shape_cast %14 : vector<1x1x128x512xf32> to vector<128x512xf32>
    %cst_15 = arith.constant dense<0.000000e+00> : vector<2x512xf32>
    %16 = tpu.matmul %9, %15, %cst_15 {dimension_numbers = #tpu.dot_dimension_numbers<[1], [0], [0], [1], [0, 0, 1, 1], [], []>} : vector<2x128xf32>, vector<128x512xf32>, vector<2x512xf32> -> vector<2x512xf32>
    %17 = arith.addf %13, %16 : vector<2x512xf32>
    %18 = vector.extract_strided_slice %17 {offsets = [0, 0], sizes = [2, 128], strides = [1, 1]} : vector<2x512xf32> to vector<2x128xf32>
    %cst_16 = arith.constant 0.000000e+00 : f32
    %19 = vector.broadcast %cst_16 : f32 to vector<2x128xf32>
    %20 = arith.subf %19, %18 : vector<2x128xf32>
    %21 = math.exp %20 : vector<2x128xf32>
    %cst_17 = arith.constant 1.000000e+00 : f32
    %22 = vector.broadcast %cst_17 : f32 to vector<2x128xf32>
    %23 = arith.addf %22, %21 : vector<2x128xf32>
    %24 = tpu.reciprocal %23 {approx = true} : vector<2x128xf32> -> vector<2x128xf32>
    %25 = vector.extract_strided_slice %17 {offsets = [0, 128], sizes = [2, 128], strides = [1, 1]} : vector<2x512xf32> to vector<2x128xf32>
    %cst_18 = arith.constant 0.000000e+00 : f32
    %26 = vector.broadcast %cst_18 : f32 to vector<2x128xf32>
    %27 = arith.subf %26, %25 : vector<2x128xf32>
    %28 = math.exp %27 : vector<2x128xf32>
    %cst_19 = arith.constant 1.000000e+00 : f32
    %29 = vector.broadcast %cst_19 : f32 to vector<2x128xf32>
    %30 = arith.addf %29, %28 : vector<2x128xf32>
    %31 = tpu.reciprocal %30 {approx = true} : vector<2x128xf32> -> vector<2x128xf32>
    %32 = vector.extract_strided_slice %17 {offsets = [0, 256], sizes = [2, 128], strides = [1, 1]} : vector<2x512xf32> to vector<2x128xf32>
    %33 = math.tanh %32 : vector<2x128xf32>
    %34 = vector.extract_strided_slice %17 {offsets = [0, 384], sizes = [2, 128], strides = [1, 1]} : vector<2x512xf32> to vector<2x128xf32>
    %cst_20 = arith.constant 0.000000e+00 : f32
    %35 = vector.broadcast %cst_20 : f32 to vector<2x128xf32>
    %36 = arith.subf %35, %34 : vector<2x128xf32>
    %37 = math.exp %36 : vector<2x128xf32>
    %cst_21 = arith.constant 1.000000e+00 : f32
    %38 = vector.broadcast %cst_21 : f32 to vector<2x128xf32>
    %39 = arith.addf %38, %37 : vector<2x128xf32>
    %40 = tpu.reciprocal %39 {approx = true} : vector<2x128xf32> -> vector<2x128xf32>
    %41 = arith.mulf %31, %9 : vector<2x128xf32>
    %42 = arith.mulf %24, %33 : vector<2x128xf32>
    %43 = arith.addf %41, %42 : vector<2x128xf32>
    %44 = math.tanh %43 : vector<2x128xf32>
    %45 = arith.mulf %40, %44 : vector<2x128xf32>
    %c0_22 = arith.constant 0 : index
    %c0_23 = arith.constant 0 : index
    %c0_24 = arith.constant 0 : index
    %46 = vector.load %arg5[%c0_22, %c0_23, %c0_24] : memref<1x256x128xf32, #tpu.memory_space<vmem>>, vector<1x128x128xf32>
    %47 = vector.shape_cast %46 : vector<1x128x128xf32> to vector<128x128xf32>
    %cst_25 = arith.constant dense<0.000000e+00> : vector<2x128xf32>
    %48 = tpu.matmul %45, %47, %cst_25 {dimension_numbers = #tpu.dot_dimension_numbers<[1], [0], [0], [1], [0, 0, 1, 1], [], []>} : vector<2x128xf32>, vector<128x128xf32>, vector<2x128xf32> -> vector<2x128xf32>
    %c0_26 = arith.constant 0 : index
    %c0_27 = arith.constant 0 : index
    %c0_28 = arith.constant 0 : index
    %49 = vector.load %arg6[%c0_26, %c0_27, %c0_28] : memref<1x1x128xf32, #tpu.memory_space<vmem>>, vector<1x1x128xf32>
    %50 = vector.shape_cast %49 : vector<1x1x128xf32> to vector<1x128xf32>
    %51 = vector.broadcast %50 : vector<1x128xf32> to vector<2x128xf32>
    %52 = arith.addf %48, %51 : vector<2x128xf32>
    %c0_29 = arith.constant 0 : index
    %53 = arith.index_cast %c0_i32 : i32 to index
    %c0_30 = arith.constant 0 : index
    %c0_31 = arith.constant 0 : index
    %54 = vector.load %arg7[%c0_29, %53, %c0_30, %c0_31] : memref<1x4x2x128xf32, #tpu.memory_space<vmem>>, vector<1x1x2x128xf32>
    %55 = vector.shape_cast %54 : vector<1x1x2x128xf32> to vector<2x128xf32>
    %56 = vector.shape_cast %52 : vector<2x128xf32> to vector<1x1x2x128xf32>
    tpu.vector_store %arg7[%c0_29, %53, %c0_30, %c0_31], %56 {strides = array<i32>} : memref<1x4x2x128xf32, #tpu.memory_space<vmem>>, vector<1x1x2x128xf32>,
    %c1_i32 = arith.constant 1 : i32
    %c2_i32_32 = arith.constant 2 : i32
    %57 = arith.muli %c1_i32, %c2_i32_32 : i32
    %58 = arith.index_cast %57 : i32 to index
    %c0_33 = arith.constant 0 : index
    %59 = vector.load %arg8[%58, %c0_33] : memref<8x1024xf32, #tpu.memory_space<vmem>>, vector<2x1024xf32>
    %60 = vector.extract_strided_slice %59 {offsets = [0, 0], sizes = [2, 512], strides = [1, 1]} : vector<2x1024xf32> to vector<2x512xf32>
    %c0_34 = arith.constant 0 : index
    %c0_35 = arith.constant 0 : index
    %c0_36 = arith.constant 0 : index
    %c0_37 = arith.constant 0 : index
    %61 = vector.load %arg3[%c0_34, %c0_35, %c0_36, %c0_37] : memref<1x2x128x512xf32, #tpu.memory_space<vmem>>, vector<1x1x128x512xf32>
    %62 = vector.shape_cast %61 : vector<1x1x128x512xf32> to vector<128x512xf32>
    %cst_38 = arith.constant dense<0.000000e+00> : vector<2x512xf32>
    %63 = tpu.matmul %45, %62, %cst_38 {dimension_numbers = #tpu.dot_dimension_numbers<[1], [0], [0], [1], [0, 0, 1, 1], [], []>} : vector<2x128xf32>, vector<128x512xf32>, vector<2x512xf32> -> vector<2x512xf32>
    %64 = arith.addf %60, %63 : vector<2x512xf32>
    %65 = vector.extract_strided_slice %64 {offsets = [0, 0], sizes = [2, 128], strides = [1, 1]} : vector<2x512xf32> to vector<2x128xf32>
    %cst_39 = arith.constant 0.000000e+00 : f32
    %66 = vector.broadcast %cst_39 : f32 to vector<2x128xf32>
    %67 = arith.subf %66, %65 : vector<2x128xf32>
    %68 = math.exp %67 : vector<2x128xf32>
    %cst_40 = arith.constant 1.000000e+00 : f32
    %69 = vector.broadcast %cst_40 : f32 to vector<2x128xf32>
    %70 = arith.addf %69, %68 : vector<2x128xf32>
    %71 = tpu.reciprocal %70 {approx = true} : vector<2x128xf32> -> vector<2x128xf32>
    %72 = vector.extract_strided_slice %64 {offsets = [0, 128], sizes = [2, 128], strides = [1, 1]} : vector<2x512xf32> to vector<2x128xf32>
    %cst_41 = arith.constant 0.000000e+00 : f32
    %73 = vector.broadcast %cst_41 : f32 to vector<2x128xf32>
    %74 = arith.subf %73, %72 : vector<2x128xf32>
    %75 = math.exp %74 : vector<2x128xf32>
    %cst_42 = arith.constant 1.000000e+00 : f32
    %76 = vector.broadcast %cst_42 : f32 to vector<2x128xf32>
    %77 = arith.addf %76, %75 : vector<2x128xf32>
    %78 = tpu.reciprocal %77 {approx = true} : vector<2x128xf32> -> vector<2x128xf32>
    %79 = vector.extract_strided_slice %64 {offsets = [0, 256], sizes = [2, 128], strides = [1, 1]} : vector<2x512xf32> to vector<2x128xf32>
    %80 = math.tanh %79 : vector<2x128xf32>
    %81 = vector.extract_strided_slice %64 {offsets = [0, 384], sizes = [2, 128], strides = [1, 1]} : vector<2x512xf32> to vector<2x128xf32>
    %cst_43 = arith.constant 0.000000e+00 : f32
    %82 = vector.broadcast %cst_43 : f32 to vector<2x128xf32>
    %83 = arith.subf %82, %81 : vector<2x128xf32>
    %84 = math.exp %83 : vector<2x128xf32>
    %cst_44 = arith.constant 1.000000e+00 : f32
    %85 = vector.broadcast %cst_44 : f32 to vector<2x128xf32>
    %86 = arith.addf %85, %84 : vector<2x128xf32>
    %87 = tpu.reciprocal %86 {approx = true} : vector<2x128xf32> -> vector<2x128xf32>
    %88 = arith.mulf %78, %43 : vector<2x128xf32>
    %89 = arith.mulf %71, %80 : vector<2x128xf32>
    %90 = arith.addf %88, %89 : vector<2x128xf32>
    %91 = math.tanh %90 : vector<2x128xf32>
    %92 = arith.mulf %87, %91 : vector<2x128xf32>
    %c0_45 = arith.constant 0 : index
    %c0_46 = arith.constant 0 : index
    %c0_47 = arith.constant 0 : index
    %93 = vector.load %arg5[%c0_45, %c0_46, %c0_47] : memref<1x256x128xf32, #tpu.memory_space<vmem>>, vector<1x128x128xf32>
    %94 = vector.shape_cast %93 : vector<1x128x128xf32> to vector<128x128xf32>
    %cst_48 = arith.constant dense<0.000000e+00> : vector<2x128xf32>
    %95 = tpu.matmul %92, %94, %cst_48 {dimension_numbers = #tpu.dot_dimension_numbers<[1], [0], [0], [1], [0, 0, 1, 1], [], []>} : vector<2x128xf32>, vector<128x128xf32>, vector<2x128xf32> -> vector<2x128xf32>
    %c0_49 = arith.constant 0 : index
    %c0_50 = arith.constant 0 : index
    %c0_51 = arith.constant 0 : index
    %96 = vector.load %arg6[%c0_49, %c0_50, %c0_51] : memref<1x1x128xf32, #tpu.memory_space<vmem>>, vector<1x1x128xf32>
    %97 = vector.shape_cast %96 : vector<1x1x128xf32> to vector<1x128xf32>
    %98 = vector.broadcast %97 : vector<1x128xf32> to vector<2x128xf32>
    %99 = arith.addf %95, %98 : vector<2x128xf32>
    %c0_52 = arith.constant 0 : index
    %100 = arith.index_cast %c1_i32 : i32 to index
    %c0_53 = arith.constant 0 : index
    %c0_54 = arith.constant 0 : index
    %101 = vector.load %arg7[%c0_52, %100, %c0_53, %c0_54] : memref<1x4x2x128xf32, #tpu.memory_space<vmem>>, vector<1x1x2x128xf32>
    %102 = vector.shape_cast %101 : vector<1x1x2x128xf32> to vector<2x128xf32>
    %103 = vector.shape_cast %99 : vector<2x128xf32> to vector<1x1x2x128xf32>
    tpu.vector_store %arg7[%c0_52, %100, %c0_53, %c0_54], %103 {strides = array<i32>} : memref<1x4x2x128xf32, #tpu.memory_space<vmem>>, vector<1x1x2x128xf32>,
    %c2_i32_55 = arith.constant 2 : i32
    %c2_i32_56 = arith.constant 2 : i32
    %104 = arith.muli %c2_i32_55, %c2_i32_56 : i32
    %105 = arith.index_cast %104 : i32 to index
    %c0_57 = arith.constant 0 : index
    %106 = vector.load %arg8[%105, %c0_57] : memref<8x1024xf32, #tpu.memory_space<vmem>>, vector<2x1024xf32>
    %107 = vector.extract_strided_slice %106 {offsets = [0, 0], sizes = [2, 512], strides = [1, 1]} : vector<2x1024xf32> to vector<2x512xf32>
    %c0_58 = arith.constant 0 : index
    %c0_59 = arith.constant 0 : index
    %c0_60 = arith.constant 0 : index
    %c0_61 = arith.constant 0 : index
    %108 = vector.load %arg3[%c0_58, %c0_59, %c0_60, %c0_61] : memref<1x2x128x512xf32, #tpu.memory_space<vmem>>, vector<1x1x128x512xf32>
    %109 = vector.shape_cast %108 : vector<1x1x128x512xf32> to vector<128x512xf32>
    %cst_62 = arith.constant dense<0.000000e+00> : vector<2x512xf32>
    %110 = tpu.matmul %92, %109, %cst_62 {dimension_numbers = #tpu.dot_dimension_numbers<[1], [0], [0], [1], [0, 0, 1, 1], [], []>} : vector<2x128xf32>, vector<128x512xf32>, vector<2x512xf32> -> vector<2x512xf32>
    %111 = arith.addf %107, %110 : vector<2x512xf32>
    %112 = vector.extract_strided_slice %111 {offsets = [0, 0], sizes = [2, 128], strides = [1, 1]} : vector<2x512xf32> to vector<2x128xf32>
    %cst_63 = arith.constant 0.000000e+00 : f32
    %113 = vector.broadcast %cst_63 : f32 to vector<2x128xf32>
    %114 = arith.subf %113, %112 : vector<2x128xf32>
    %115 = math.exp %114 : vector<2x128xf32>
    %cst_64 = arith.constant 1.000000e+00 : f32
    %116 = vector.broadcast %cst_64 : f32 to vector<2x128xf32>
    %117 = arith.addf %116, %115 : vector<2x128xf32>
    %118 = tpu.reciprocal %117 {approx = true} : vector<2x128xf32> -> vector<2x128xf32>
    %119 = vector.extract_strided_slice %111 {offsets = [0, 128], sizes = [2, 128], strides = [1, 1]} : vector<2x512xf32> to vector<2x128xf32>
    %cst_65 = arith.constant 0.000000e+00 : f32
    %120 = vector.broadcast %cst_65 : f32 to vector<2x128xf32>
    %121 = arith.subf %120, %119 : vector<2x128xf32>
    %122 = math.exp %121 : vector<2x128xf32>
    %cst_66 = arith.constant 1.000000e+00 : f32
    %123 = vector.broadcast %cst_66 : f32 to vector<2x128xf32>
    %124 = arith.addf %123, %122 : vector<2x128xf32>
    %125 = tpu.reciprocal %124 {approx = true} : vector<2x128xf32> -> vector<2x128xf32>
    %126 = vector.extract_strided_slice %111 {offsets = [0, 256], sizes = [2, 128], strides = [1, 1]} : vector<2x512xf32> to vector<2x128xf32>
    %127 = math.tanh %126 : vector<2x128xf32>
    %128 = vector.extract_strided_slice %111 {offsets = [0, 384], sizes = [2, 128], strides = [1, 1]} : vector<2x512xf32> to vector<2x128xf32>
    %cst_67 = arith.constant 0.000000e+00 : f32
    %129 = vector.broadcast %cst_67 : f32 to vector<2x128xf32>
    %130 = arith.subf %129, %128 : vector<2x128xf32>
    %131 = math.exp %130 : vector<2x128xf32>
    %cst_68 = arith.constant 1.000000e+00 : f32
    %132 = vector.broadcast %cst_68 : f32 to vector<2x128xf32>
    %133 = arith.addf %132, %131 : vector<2x128xf32>
    %134 = tpu.reciprocal %133 {approx = true} : vector<2x128xf32> -> vector<2x128xf32>
    %135 = arith.mulf %125, %90 : vector<2x128xf32>
    %136 = arith.mulf %118, %127 : vector<2x128xf32>
    %137 = arith.addf %135, %136 : vector<2x128xf32>
    %138 = math.tanh %137 : vector<2x128xf32>
    %139 = arith.mulf %134, %138 : vector<2x128xf32>
    %c0_69 = arith.constant 0 : index
    %c0_70 = arith.constant 0 : index
    %c0_71 = arith.constant 0 : index
    %140 = vector.load %arg5[%c0_69, %c0_70, %c0_71] : memref<1x256x128xf32, #tpu.memory_space<vmem>>, vector<1x128x128xf32>
    %141 = vector.shape_cast %140 : vector<1x128x128xf32> to vector<128x128xf32>
    %cst_72 = arith.constant dense<0.000000e+00> : vector<2x128xf32>
    %142 = tpu.matmul %139, %141, %cst_72 {dimension_numbers = #tpu.dot_dimension_numbers<[1], [0], [0], [1], [0, 0, 1, 1], [], []>} : vector<2x128xf32>, vector<128x128xf32>, vector<2x128xf32> -> vector<2x128xf32>
    %c0_73 = arith.constant 0 : index
    %c0_74 = arith.constant 0 : index
    %c0_75 = arith.constant 0 : index
    %143 = vector.load %arg6[%c0_73, %c0_74, %c0_75] : memref<1x1x128xf32, #tpu.memory_space<vmem>>, vector<1x1x128xf32>
    %144 = vector.shape_cast %143 : vector<1x1x128xf32> to vector<1x128xf32>
    %145 = vector.broadcast %144 : vector<1x128xf32> to vector<2x128xf32>
    %146 = arith.addf %142, %145 : vector<2x128xf32>
    %c0_76 = arith.constant 0 : index
    %147 = arith.index_cast %c2_i32_55 : i32 to index
    %c0_77 = arith.constant 0 : index
    %c0_78 = arith.constant 0 : index
    %148 = vector.load %arg7[%c0_76, %147, %c0_77, %c0_78] : memref<1x4x2x128xf32, #tpu.memory_space<vmem>>, vector<1x1x2x128xf32>
    %149 = vector.shape_cast %148 : vector<1x1x2x128xf32> to vector<2x128xf32>
    %150 = vector.shape_cast %146 : vector<2x128xf32> to vector<1x1x2x128xf32>
    tpu.vector_store %arg7[%c0_76, %147, %c0_77, %c0_78], %150 {strides = array<i32>} : memref<1x4x2x128xf32, #tpu.memory_space<vmem>>, vector<1x1x2x128xf32>,
    %c3_i32 = arith.constant 3 : i32
    %c2_i32_79 = arith.constant 2 : i32
    %151 = arith.muli %c3_i32, %c2_i32_79 : i32
    %152 = arith.index_cast %151 : i32 to index
    %c0_80 = arith.constant 0 : index
    %153 = vector.load %arg8[%152, %c0_80] : memref<8x1024xf32, #tpu.memory_space<vmem>>, vector<2x1024xf32>
    %154 = vector.extract_strided_slice %153 {offsets = [0, 0], sizes = [2, 512], strides = [1, 1]} : vector<2x1024xf32> to vector<2x512xf32>
    %c0_81 = arith.constant 0 : index
    %c0_82 = arith.constant 0 : index
    %c0_83 = arith.constant 0 : index
    %c0_84 = arith.constant 0 : index
    %155 = vector.load %arg3[%c0_81, %c0_82, %c0_83, %c0_84] : memref<1x2x128x512xf32, #tpu.memory_space<vmem>>, vector<1x1x128x512xf32>
    %156 = vector.shape_cast %155 : vector<1x1x128x512xf32> to vector<128x512xf32>
    %cst_85 = arith.constant dense<0.000000e+00> : vector<2x512xf32>
    %157 = tpu.matmul %139, %156, %cst_85 {dimension_numbers = #tpu.dot_dimension_numbers<[1], [0], [0], [1], [0, 0, 1, 1], [], []>} : vector<2x128xf32>, vector<128x512xf32>, vector<2x512xf32> -> vector<2x512xf32>
    %158 = arith.addf %154, %157 : vector<2x512xf32>
    %159 = vector.extract_strided_slice %158 {offsets = [0, 0], sizes = [2, 128], strides = [1, 1]} : vector<2x512xf32> to vector<2x128xf32>
    %cst_86 = arith.constant 0.000000e+00 : f32
    %160 = vector.broadcast %cst_86 : f32 to vector<2x128xf32>
    %161 = arith.subf %160, %159 : vector<2x128xf32>
    %162 = math.exp %161 : vector<2x128xf32>
    %cst_87 = arith.constant 1.000000e+00 : f32
    %163 = vector.broadcast %cst_87 : f32 to vector<2x128xf32>
    %164 = arith.addf %163, %162 : vector<2x128xf32>
    %165 = tpu.reciprocal %164 {approx = true} : vector<2x128xf32> -> vector<2x128xf32>
    %166 = vector.extract_strided_slice %158 {offsets = [0, 128], sizes = [2, 128], strides = [1, 1]} : vector<2x512xf32> to vector<2x128xf32>
    %cst_88 = arith.constant 0.000000e+00 : f32
    %167 = vector.broadcast %cst_88 : f32 to vector<2x128xf32>
    %168 = arith.subf %167, %166 : vector<2x128xf32>
    %169 = math.exp %168 : vector<2x128xf32>
    %cst_89 = arith.constant 1.000000e+00 : f32
    %170 = vector.broadcast %cst_89 : f32 to vector<2x128xf32>
    %171 = arith.addf %170, %169 : vector<2x128xf32>
    %172 = tpu.reciprocal %171 {approx = true} : vector<2x128xf32> -> vector<2x128xf32>
    %173 = vector.extract_strided_slice %158 {offsets = [0, 256], sizes = [2, 128], strides = [1, 1]} : vector<2x512xf32> to vector<2x128xf32>
    %174 = math.tanh %173 : vector<2x128xf32>
    %175 = vector.extract_strided_slice %158 {offsets = [0, 384], sizes = [2, 128], strides = [1, 1]} : vector<2x512xf32> to vector<2x128xf32>
    %cst_90 = arith.constant 0.000000e+00 : f32
    %176 = vector.broadcast %cst_90 : f32 to vector<2x128xf32>
    %177 = arith.subf %176, %175 : vector<2x128xf32>
    %178 = math.exp %177 : vector<2x128xf32>
    %cst_91 = arith.constant 1.000000e+00 : f32
    %179 = vector.broadcast %cst_91 : f32 to vector<2x128xf32>
    %180 = arith.addf %179, %178 : vector<2x128xf32>
    %181 = tpu.reciprocal %180 {approx = true} : vector<2x128xf32> -> vector<2x128xf32>
    %182 = arith.mulf %172, %137 : vector<2x128xf32>
    %183 = arith.mulf %165, %174 : vector<2x128xf32>
    %184 = arith.addf %182, %183 : vector<2x128xf32>
    %185 = math.tanh %184 : vector<2x128xf32>
    %186 = arith.mulf %181, %185 : vector<2x128xf32>
    %c0_92 = arith.constant 0 : index
    %c0_93 = arith.constant 0 : index
    %c0_94 = arith.constant 0 : index
    %187 = vector.load %arg5[%c0_92, %c0_93, %c0_94] : memref<1x256x128xf32, #tpu.memory_space<vmem>>, vector<1x128x128xf32>
    %188 = vector.shape_cast %187 : vector<1x128x128xf32> to vector<128x128xf32>
    %cst_95 = arith.constant dense<0.000000e+00> : vector<2x128xf32>
    %189 = tpu.matmul %186, %188, %cst_95 {dimension_numbers = #tpu.dot_dimension_numbers<[1], [0], [0], [1], [0, 0, 1, 1], [], []>} : vector<2x128xf32>, vector<128x128xf32>, vector<2x128xf32> -> vector<2x128xf32>
    %c0_96 = arith.constant 0 : index
    %c0_97 = arith.constant 0 : index
    %c0_98 = arith.constant 0 : index
    %190 = vector.load %arg6[%c0_96, %c0_97, %c0_98] : memref<1x1x128xf32, #tpu.memory_space<vmem>>, vector<1x1x128xf32>
    %191 = vector.shape_cast %190 : vector<1x1x128xf32> to vector<1x128xf32>
    %192 = vector.broadcast %191 : vector<1x128xf32> to vector<2x128xf32>
    %193 = arith.addf %189, %192 : vector<2x128xf32>
    %c0_99 = arith.constant 0 : index
    %194 = arith.index_cast %c3_i32 : i32 to index
    %c0_100 = arith.constant 0 : index
    %c0_101 = arith.constant 0 : index
    %195 = vector.load %arg7[%c0_99, %194, %c0_100, %c0_101] : memref<1x4x2x128xf32, #tpu.memory_space<vmem>>, vector<1x1x2x128xf32>
    %196 = vector.shape_cast %195 : vector<1x1x2x128xf32> to vector<2x128xf32>
    %197 = vector.shape_cast %193 : vector<2x128xf32> to vector<1x1x2x128xf32>
    tpu.vector_store %arg7[%c0_99, %194, %c0_100, %c0_101], %197 {strides = array<i32>} : memref<1x4x2x128xf32, #tpu.memory_space<vmem>>, vector<1x1x2x128xf32>,
    %c4_i32 = arith.constant 4 : i32
    %cst_102 = arith.constant 0.000000e+00 : f32
    %198 = vector.broadcast %cst_102 : f32 to vector<2x128xf32>
    %c0_i32_103 = arith.constant 0 : i32
    %c3_i32_104 = arith.constant 3 : i32
    %199 = arith.subi %c3_i32_104, %c0_i32_103 : i32
    %c2_i32_105 = arith.constant 2 : i32
    %200 = arith.muli %199, %c2_i32_105 : i32
    %201 = arith.index_cast %200 : i32 to index
    %c0_106 = arith.constant 0 : index
    %202 = vector.load %arg8[%201, %c0_106] : memref<8x1024xf32, #tpu.memory_space<vmem>>, vector<2x1024xf32>
    %203 = vector.extract_strided_slice %202 {offsets = [0, 512], sizes = [2, 512], strides = [1, 1]} : vector<2x1024xf32> to vector<2x512xf32>
    %c0_107 = arith.constant 0 : index
    %c1 = arith.constant 1 : index
    %c0_108 = arith.constant 0 : index
    %c0_109 = arith.constant 0 : index
    %204 = vector.load %arg3[%c0_107, %c1, %c0_108, %c0_109] : memref<1x2x128x512xf32, #tpu.memory_space<vmem>>, vector<1x1x128x512xf32>
    %205 = vector.shape_cast %204 : vector<1x1x128x512xf32> to vector<128x512xf32>
    %cst_110 = arith.constant dense<0.000000e+00> : vector<2x512xf32>
    %206 = tpu.matmul %198, %205, %cst_110 {dimension_numbers = #tpu.dot_dimension_numbers<[1], [0], [0], [1], [0, 0, 1, 1], [], []>} : vector<2x128xf32>, vector<128x512xf32>, vector<2x512xf32> -> vector<2x512xf32>
    %207 = arith.addf %203, %206 : vector<2x512xf32>
    %208 = vector.extract_strided_slice %207 {offsets = [0, 0], sizes = [2, 128], strides = [1, 1]} : vector<2x512xf32> to vector<2x128xf32>
    %cst_111 = arith.constant 0.000000e+00 : f32
    %209 = vector.broadcast %cst_111 : f32 to vector<2x128xf32>
    %210 = arith.subf %209, %208 : vector<2x128xf32>
    %211 = math.exp %210 : vector<2x128xf32>
    %cst_112 = arith.constant 1.000000e+00 : f32
    %212 = vector.broadcast %cst_112 : f32 to vector<2x128xf32>
    %213 = arith.addf %212, %211 : vector<2x128xf32>
    %214 = tpu.reciprocal %213 {approx = true} : vector<2x128xf32> -> vector<2x128xf32>
    %215 = vector.extract_strided_slice %207 {offsets = [0, 128], sizes = [2, 128], strides = [1, 1]} : vector<2x512xf32> to vector<2x128xf32>
    %cst_113 = arith.constant 0.000000e+00 : f32
    %216 = vector.broadcast %cst_113 : f32 to vector<2x128xf32>
    %217 = arith.subf %216, %215 : vector<2x128xf32>
    %218 = math.exp %217 : vector<2x128xf32>
    %cst_114 = arith.constant 1.000000e+00 : f32
    %219 = vector.broadcast %cst_114 : f32 to vector<2x128xf32>
    %220 = arith.addf %219, %218 : vector<2x128xf32>
    %221 = tpu.reciprocal %220 {approx = true} : vector<2x128xf32> -> vector<2x128xf32>
    %222 = vector.extract_strided_slice %207 {offsets = [0, 256], sizes = [2, 128], strides = [1, 1]} : vector<2x512xf32> to vector<2x128xf32>
    %223 = math.tanh %222 : vector<2x128xf32>
    %224 = vector.extract_strided_slice %207 {offsets = [0, 384], sizes = [2, 128], strides = [1, 1]} : vector<2x512xf32> to vector<2x128xf32>
    %cst_115 = arith.constant 0.000000e+00 : f32
    %225 = vector.broadcast %cst_115 : f32 to vector<2x128xf32>
    %226 = arith.subf %225, %224 : vector<2x128xf32>
    %227 = math.exp %226 : vector<2x128xf32>
    %cst_116 = arith.constant 1.000000e+00 : f32
    %228 = vector.broadcast %cst_116 : f32 to vector<2x128xf32>
    %229 = arith.addf %228, %227 : vector<2x128xf32>
    %230 = tpu.reciprocal %229 {approx = true} : vector<2x128xf32> -> vector<2x128xf32>
    %231 = arith.mulf %221, %198 : vector<2x128xf32>
    %232 = arith.mulf %214, %223 : vector<2x128xf32>
    %233 = arith.addf %231, %232 : vector<2x128xf32>
    %234 = math.tanh %233 : vector<2x128xf32>
    %235 = arith.mulf %230, %234 : vector<2x128xf32>
    %c0_117 = arith.constant 0 : index
    %c128 = arith.constant 128 : index
    %c0_118 = arith.constant 0 : index
    %236 = vector.load %arg5[%c0_117, %c128, %c0_118] : memref<1x256x128xf32, #tpu.memory_space<vmem>>, vector<1x128x128xf32>
    %237 = vector.shape_cast %236 : vector<1x128x128xf32> to vector<128x128xf32>
    %cst_119 = arith.constant dense<0.000000e+00> : vector<2x128xf32>
    %238 = tpu.matmul %235, %237, %cst_119 {dimension_numbers = #tpu.dot_dimension_numbers<[1], [0], [0], [1], [0, 0, 1, 1], [], []>} : vector<2x128xf32>, vector<128x128xf32>, vector<2x128xf32> -> vector<2x128xf32>
    %c0_120 = arith.constant 0 : index
    %239 = arith.index_cast %199 : i32 to index
    %c0_121 = arith.constant 0 : index
    %c0_122 = arith.constant 0 : index
    %240 = vector.load %arg7[%c0_120, %239, %c0_121, %c0_122] : memref<1x4x2x128xf32, #tpu.memory_space<vmem>>, vector<1x1x2x128xf32>
    %241 = vector.shape_cast %240 : vector<1x1x2x128xf32> to vector<2x128xf32>
    %242 = arith.addf %241, %238 : vector<2x128xf32>
    %c0_123 = arith.constant 0 : index
    %243 = arith.index_cast %199 : i32 to index
    %c0_124 = arith.constant 0 : index
    %c0_125 = arith.constant 0 : index
    %244 = vector.load %arg7[%c0_123, %243, %c0_124, %c0_125] : memref<1x4x2x128xf32, #tpu.memory_space<vmem>>, vector<1x1x2x128xf32>
    %245 = vector.shape_cast %244 : vector<1x1x2x128xf32> to vector<2x128xf32>
    %246 = vector.shape_cast %242 : vector<2x128xf32> to vector<1x1x2x128xf32>
    tpu.vector_store %arg7[%c0_123, %243, %c0_124, %c0_125], %246 {strides = array<i32>} : memref<1x4x2x128xf32, #tpu.memory_space<vmem>>, vector<1x1x2x128xf32>,
    %c1_i32_126 = arith.constant 1 : i32
    %c3_i32_127 = arith.constant 3 : i32
    %247 = arith.subi %c3_i32_127, %c1_i32_126 : i32
    %c2_i32_128 = arith.constant 2 : i32
    %248 = arith.muli %247, %c2_i32_128 : i32
    %249 = arith.index_cast %248 : i32 to index
    %c0_129 = arith.constant 0 : index
    %250 = vector.load %arg8[%249, %c0_129] : memref<8x1024xf32, #tpu.memory_space<vmem>>, vector<2x1024xf32>
    %251 = vector.extract_strided_slice %250 {offsets = [0, 512], sizes = [2, 512], strides = [1, 1]} : vector<2x1024xf32> to vector<2x512xf32>
    %c0_130 = arith.constant 0 : index
    %c1_131 = arith.constant 1 : index
    %c0_132 = arith.constant 0 : index
    %c0_133 = arith.constant 0 : index
    %252 = vector.load %arg3[%c0_130, %c1_131, %c0_132, %c0_133] : memref<1x2x128x512xf32, #tpu.memory_space<vmem>>, vector<1x1x128x512xf32>
    %253 = vector.shape_cast %252 : vector<1x1x128x512xf32> to vector<128x512xf32>
    %cst_134 = arith.constant dense<0.000000e+00> : vector<2x512xf32>
    %254 = tpu.matmul %235, %253, %cst_134 {dimension_numbers = #tpu.dot_dimension_numbers<[1], [0], [0], [1], [0, 0, 1, 1], [], []>} : vector<2x128xf32>, vector<128x512xf32>, vector<2x512xf32> -> vector<2x512xf32>
    %255 = arith.addf %251, %254 : vector<2x512xf32>
    %256 = vector.extract_strided_slice %255 {offsets = [0, 0], sizes = [2, 128], strides = [1, 1]} : vector<2x512xf32> to vector<2x128xf32>
    %cst_135 = arith.constant 0.000000e+00 : f32
    %257 = vector.broadcast %cst_135 : f32 to vector<2x128xf32>
    %258 = arith.subf %257, %256 : vector<2x128xf32>
    %259 = math.exp %258 : vector<2x128xf32>
    %cst_136 = arith.constant 1.000000e+00 : f32
    %260 = vector.broadcast %cst_136 : f32 to vector<2x128xf32>
    %261 = arith.addf %260, %259 : vector<2x128xf32>
    %262 = tpu.reciprocal %261 {approx = true} : vector<2x128xf32> -> vector<2x128xf32>
    %263 = vector.extract_strided_slice %255 {offsets = [0, 128], sizes = [2, 128], strides = [1, 1]} : vector<2x512xf32> to vector<2x128xf32>
    %cst_137 = arith.constant 0.000000e+00 : f32
    %264 = vector.broadcast %cst_137 : f32 to vector<2x128xf32>
    %265 = arith.subf %264, %263 : vector<2x128xf32>
    %266 = math.exp %265 : vector<2x128xf32>
    %cst_138 = arith.constant 1.000000e+00 : f32
    %267 = vector.broadcast %cst_138 : f32 to vector<2x128xf32>
    %268 = arith.addf %267, %266 : vector<2x128xf32>
    %269 = tpu.reciprocal %268 {approx = true} : vector<2x128xf32> -> vector<2x128xf32>
    %270 = vector.extract_strided_slice %255 {offsets = [0, 256], sizes = [2, 128], strides = [1, 1]} : vector<2x512xf32> to vector<2x128xf32>
    %271 = math.tanh %270 : vector<2x128xf32>
    %272 = vector.extract_strided_slice %255 {offsets = [0, 384], sizes = [2, 128], strides = [1, 1]} : vector<2x512xf32> to vector<2x128xf32>
    %cst_139 = arith.constant 0.000000e+00 : f32
    %273 = vector.broadcast %cst_139 : f32 to vector<2x128xf32>
    %274 = arith.subf %273, %272 : vector<2x128xf32>
    %275 = math.exp %274 : vector<2x128xf32>
    %cst_140 = arith.constant 1.000000e+00 : f32
    %276 = vector.broadcast %cst_140 : f32 to vector<2x128xf32>
    %277 = arith.addf %276, %275 : vector<2x128xf32>
    %278 = tpu.reciprocal %277 {approx = true} : vector<2x128xf32> -> vector<2x128xf32>
    %279 = arith.mulf %269, %233 : vector<2x128xf32>
    %280 = arith.mulf %262, %271 : vector<2x128xf32>
    %281 = arith.addf %279, %280 : vector<2x128xf32>
    %282 = math.tanh %281 : vector<2x128xf32>
    %283 = arith.mulf %278, %282 : vector<2x128xf32>
    %c0_141 = arith.constant 0 : index
    %c128_142 = arith.constant 128 : index
    %c0_143 = arith.constant 0 : index
    %284 = vector.load %arg5[%c0_141, %c128_142, %c0_143] : memref<1x256x128xf32, #tpu.memory_space<vmem>>, vector<1x128x128xf32>
    %285 = vector.shape_cast %284 : vector<1x128x128xf32> to vector<128x128xf32>
    %cst_144 = arith.constant dense<0.000000e+00> : vector<2x128xf32>
    %286 = tpu.matmul %283, %285, %cst_144 {dimension_numbers = #tpu.dot_dimension_numbers<[1], [0], [0], [1], [0, 0, 1, 1], [], []>} : vector<2x128xf32>, vector<128x128xf32>, vector<2x128xf32> -> vector<2x128xf32>
    %c0_145 = arith.constant 0 : index
    %287 = arith.index_cast %247 : i32 to index
    %c0_146 = arith.constant 0 : index
    %c0_147 = arith.constant 0 : index
    %288 = vector.load %arg7[%c0_145, %287, %c0_146, %c0_147] : memref<1x4x2x128xf32, #tpu.memory_space<vmem>>, vector<1x1x2x128xf32>
    %289 = vector.shape_cast %288 : vector<1x1x2x128xf32> to vector<2x128xf32>
    %290 = arith.addf %289, %286 : vector<2x128xf32>
    %c0_148 = arith.constant 0 : index
    %291 = arith.index_cast %247 : i32 to index
    %c0_149 = arith.constant 0 : index
    %c0_150 = arith.constant 0 : index
    %292 = vector.load %arg7[%c0_148, %291, %c0_149, %c0_150] : memref<1x4x2x128xf32, #tpu.memory_space<vmem>>, vector<1x1x2x128xf32>
    %293 = vector.shape_cast %292 : vector<1x1x2x128xf32> to vector<2x128xf32>
    %294 = vector.shape_cast %290 : vector<2x128xf32> to vector<1x1x2x128xf32>
    tpu.vector_store %arg7[%c0_148, %291, %c0_149, %c0_150], %294 {strides = array<i32>} : memref<1x4x2x128xf32, #tpu.memory_space<vmem>>, vector<1x1x2x128xf32>,
    %c2_i32_151 = arith.constant 2 : i32
    %c3_i32_152 = arith.constant 3 : i32
    %295 = arith.subi %c3_i32_152, %c2_i32_151 : i32
    %c2_i32_153 = arith.constant 2 : i32
    %296 = arith.muli %295, %c2_i32_153 : i32
    %297 = arith.index_cast %296 : i32 to index
    %c0_154 = arith.constant 0 : index
    %298 = vector.load %arg8[%297, %c0_154] : memref<8x1024xf32, #tpu.memory_space<vmem>>, vector<2x1024xf32>
    %299 = vector.extract_strided_slice %298 {offsets = [0, 512], sizes = [2, 512], strides = [1, 1]} : vector<2x1024xf32> to vector<2x512xf32>
    %c0_155 = arith.constant 0 : index
    %c1_156 = arith.constant 1 : index
    %c0_157 = arith.constant 0 : index
    %c0_158 = arith.constant 0 : index
    %300 = vector.load %arg3[%c0_155, %c1_156, %c0_157, %c0_158] : memref<1x2x128x512xf32, #tpu.memory_space<vmem>>, vector<1x1x128x512xf32>
    %301 = vector.shape_cast %300 : vector<1x1x128x512xf32> to vector<128x512xf32>
    %cst_159 = arith.constant dense<0.000000e+00> : vector<2x512xf32>
    %302 = tpu.matmul %283, %301, %cst_159 {dimension_numbers = #tpu.dot_dimension_numbers<[1], [0], [0], [1], [0, 0, 1, 1], [], []>} : vector<2x128xf32>, vector<128x512xf32>, vector<2x512xf32> -> vector<2x512xf32>
    %303 = arith.addf %299, %302 : vector<2x512xf32>
    %304 = vector.extract_strided_slice %303 {offsets = [0, 0], sizes = [2, 128], strides = [1, 1]} : vector<2x512xf32> to vector<2x128xf32>
    %cst_160 = arith.constant 0.000000e+00 : f32
    %305 = vector.broadcast %cst_160 : f32 to vector<2x128xf32>
    %306 = arith.subf %305, %304 : vector<2x128xf32>
    %307 = math.exp %306 : vector<2x128xf32>
    %cst_161 = arith.constant 1.000000e+00 : f32
    %308 = vector.broadcast %cst_161 : f32 to vector<2x128xf32>
    %309 = arith.addf %308, %307 : vector<2x128xf32>
    %310 = tpu.reciprocal %309 {approx = true} : vector<2x128xf32> -> vector<2x128xf32>
    %311 = vector.extract_strided_slice %303 {offsets = [0, 128], sizes = [2, 128], strides = [1, 1]} : vector<2x512xf32> to vector<2x128xf32>
    %cst_162 = arith.constant 0.000000e+00 : f32
    %312 = vector.broadcast %cst_162 : f32 to vector<2x128xf32>
    %313 = arith.subf %312, %311 : vector<2x128xf32>
    %314 = math.exp %313 : vector<2x128xf32>
    %cst_163 = arith.constant 1.000000e+00 : f32
    %315 = vector.broadcast %cst_163 : f32 to vector<2x128xf32>
    %316 = arith.addf %315, %314 : vector<2x128xf32>
    %317 = tpu.reciprocal %316 {approx = true} : vector<2x128xf32> -> vector<2x128xf32>
    %318 = vector.extract_strided_slice %303 {offsets = [0, 256], sizes = [2, 128], strides = [1, 1]} : vector<2x512xf32> to vector<2x128xf32>
    %319 = math.tanh %318 : vector<2x128xf32>
    %320 = vector.extract_strided_slice %303 {offsets = [0, 384], sizes = [2, 128], strides = [1, 1]} : vector<2x512xf32> to vector<2x128xf32>
    %cst_164 = arith.constant 0.000000e+00 : f32
    %321 = vector.broadcast %cst_164 : f32 to vector<2x128xf32>
    %322 = arith.subf %321, %320 : vector<2x128xf32>
    %323 = math.exp %322 : vector<2x128xf32>
    %cst_165 = arith.constant 1.000000e+00 : f32
    %324 = vector.broadcast %cst_165 : f32 to vector<2x128xf32>
    %325 = arith.addf %324, %323 : vector<2x128xf32>
    %326 = tpu.reciprocal %325 {approx = true} : vector<2x128xf32> -> vector<2x128xf32>
    %327 = arith.mulf %317, %281 : vector<2x128xf32>
    %328 = arith.mulf %310, %319 : vector<2x128xf32>
    %329 = arith.addf %327, %328 : vector<2x128xf32>
    %330 = math.tanh %329 : vector<2x128xf32>
    %331 = arith.mulf %326, %330 : vector<2x128xf32>
    %c0_166 = arith.constant 0 : index
    %c128_167 = arith.constant 128 : index
    %c0_168 = arith.constant 0 : index
    %332 = vector.load %arg5[%c0_166, %c128_167, %c0_168] : memref<1x256x128xf32, #tpu.memory_space<vmem>>, vector<1x128x128xf32>
    %333 = vector.shape_cast %332 : vector<1x128x128xf32> to vector<128x128xf32>
    %cst_169 = arith.constant dense<0.000000e+00> : vector<2x128xf32>
    %334 = tpu.matmul %331, %333, %cst_169 {dimension_numbers = #tpu.dot_dimension_numbers<[1], [0], [0], [1], [0, 0, 1, 1], [], []>} : vector<2x128xf32>, vector<128x128xf32>, vector<2x128xf32> -> vector<2x128xf32>
    %c0_170 = arith.constant 0 : index
    %335 = arith.index_cast %295 : i32 to index
    %c0_171 = arith.constant 0 : index
    %c0_172 = arith.constant 0 : index
    %336 = vector.load %arg7[%c0_170, %335, %c0_171, %c0_172] : memref<1x4x2x128xf32, #tpu.memory_space<vmem>>, vector<1x1x2x128xf32>
    %337 = vector.shape_cast %336 : vector<1x1x2x128xf32> to vector<2x128xf32>
    %338 = arith.addf %337, %334 : vector<2x128xf32>
    %c0_173 = arith.constant 0 : index
    %339 = arith.index_cast %295 : i32 to index
    %c0_174 = arith.constant 0 : index
    %c0_175 = arith.constant 0 : index
    %340 = vector.load %arg7[%c0_173, %339, %c0_174, %c0_175] : memref<1x4x2x128xf32, #tpu.memory_space<vmem>>, vector<1x1x2x128xf32>
    %341 = vector.shape_cast %340 : vector<1x1x2x128xf32> to vector<2x128xf32>
    %342 = vector.shape_cast %338 : vector<2x128xf32> to vector<1x1x2x128xf32>
    tpu.vector_store %arg7[%c0_173, %339, %c0_174, %c0_175], %342 {strides = array<i32>} : memref<1x4x2x128xf32, #tpu.memory_space<vmem>>, vector<1x1x2x128xf32>,
    %c3_i32_176 = arith.constant 3 : i32
    %c3_i32_177 = arith.constant 3 : i32
    %343 = arith.subi %c3_i32_177, %c3_i32_176 : i32
    %c2_i32_178 = arith.constant 2 : i32
    %344 = arith.muli %343, %c2_i32_178 : i32
    %345 = arith.index_cast %344 : i32 to index
    %c0_179 = arith.constant 0 : index
    %346 = vector.load %arg8[%345, %c0_179] : memref<8x1024xf32, #tpu.memory_space<vmem>>, vector<2x1024xf32>
    %347 = vector.extract_strided_slice %346 {offsets = [0, 512], sizes = [2, 512], strides = [1, 1]} : vector<2x1024xf32> to vector<2x512xf32>
    %c0_180 = arith.constant 0 : index
    %c1_181 = arith.constant 1 : index
    %c0_182 = arith.constant 0 : index
    %c0_183 = arith.constant 0 : index
    %348 = vector.load %arg3[%c0_180, %c1_181, %c0_182, %c0_183] : memref<1x2x128x512xf32, #tpu.memory_space<vmem>>, vector<1x1x128x512xf32>
    %349 = vector.shape_cast %348 : vector<1x1x128x512xf32> to vector<128x512xf32>
    %cst_184 = arith.constant dense<0.000000e+00> : vector<2x512xf32>
    %350 = tpu.matmul %331, %349, %cst_184 {dimension_numbers = #tpu.dot_dimension_numbers<[1], [0], [0], [1], [0, 0, 1, 1], [], []>} : vector<2x128xf32>, vector<128x512xf32>, vector<2x512xf32> -> vector<2x512xf32>
    %351 = arith.addf %347, %350 : vector<2x512xf32>
    %352 = vector.extract_strided_slice %351 {offsets = [0, 0], sizes = [2, 128], strides = [1, 1]} : vector<2x512xf32> to vector<2x128xf32>
    %cst_185 = arith.constant 0.000000e+00 : f32
    %353 = vector.broadcast %cst_185 : f32 to vector<2x128xf32>
    %354 = arith.subf %353, %352 : vector<2x128xf32>
    %355 = math.exp %354 : vector<2x128xf32>
    %cst_186 = arith.constant 1.000000e+00 : f32
    %356 = vector.broadcast %cst_186 : f32 to vector<2x128xf32>
    %357 = arith.addf %356, %355 : vector<2x128xf32>
    %358 = tpu.reciprocal %357 {approx = true} : vector<2x128xf32> -> vector<2x128xf32>
    %359 = vector.extract_strided_slice %351 {offsets = [0, 128], sizes = [2, 128], strides = [1, 1]} : vector<2x512xf32> to vector<2x128xf32>
    %cst_187 = arith.constant 0.000000e+00 : f32
    %360 = vector.broadcast %cst_187 : f32 to vector<2x128xf32>
    %361 = arith.subf %360, %359 : vector<2x128xf32>
    %362 = math.exp %361 : vector<2x128xf32>
    %cst_188 = arith.constant 1.000000e+00 : f32
    %363 = vector.broadcast %cst_188 : f32 to vector<2x128xf32>
    %364 = arith.addf %363, %362 : vector<2x128xf32>
    %365 = tpu.reciprocal %364 {approx = true} : vector<2x128xf32> -> vector<2x128xf32>
    %366 = vector.extract_strided_slice %351 {offsets = [0, 256], sizes = [2, 128], strides = [1, 1]} : vector<2x512xf32> to vector<2x128xf32>
    %367 = math.tanh %366 : vector<2x128xf32>
    %368 = vector.extract_strided_slice %351 {offsets = [0, 384], sizes = [2, 128], strides = [1, 1]} : vector<2x512xf32> to vector<2x128xf32>
    %cst_189 = arith.constant 0.000000e+00 : f32
    %369 = vector.broadcast %cst_189 : f32 to vector<2x128xf32>
    %370 = arith.subf %369, %368 : vector<2x128xf32>
    %371 = math.exp %370 : vector<2x128xf32>
    %cst_190 = arith.constant 1.000000e+00 : f32
    %372 = vector.broadcast %cst_190 : f32 to vector<2x128xf32>
    %373 = arith.addf %372, %371 : vector<2x128xf32>
    %374 = tpu.reciprocal %373 {approx = true} : vector<2x128xf32> -> vector<2x128xf32>
    %375 = arith.mulf %365, %329 : vector<2x128xf32>
    %376 = arith.mulf %358, %367 : vector<2x128xf32>
    %377 = arith.addf %375, %376 : vector<2x128xf32>
    %378 = math.tanh %377 : vector<2x128xf32>
    %379 = arith.mulf %374, %378 : vector<2x128xf32>
    %c0_191 = arith.constant 0 : index
    %c128_192 = arith.constant 128 : index
    %c0_193 = arith.constant 0 : index
    %380 = vector.load %arg5[%c0_191, %c128_192, %c0_193] : memref<1x256x128xf32, #tpu.memory_space<vmem>>, vector<1x128x128xf32>
    %381 = vector.shape_cast %380 : vector<1x128x128xf32> to vector<128x128xf32>
    %cst_194 = arith.constant dense<0.000000e+00> : vector<2x128xf32>
    %382 = tpu.matmul %379, %381, %cst_194 {dimension_numbers = #tpu.dot_dimension_numbers<[1], [0], [0], [1], [0, 0, 1, 1], [], []>} : vector<2x128xf32>, vector<128x128xf32>, vector<2x128xf32> -> vector<2x128xf32>
    %c0_195 = arith.constant 0 : index
    %383 = arith.index_cast %343 : i32 to index
    %c0_196 = arith.constant 0 : index
    %c0_197 = arith.constant 0 : index
    %384 = vector.load %arg7[%c0_195, %383, %c0_196, %c0_197] : memref<1x4x2x128xf32, #tpu.memory_space<vmem>>, vector<1x1x2x128xf32>
    %385 = vector.shape_cast %384 : vector<1x1x2x128xf32> to vector<2x128xf32>
    %386 = arith.addf %385, %382 : vector<2x128xf32>
    %c0_198 = arith.constant 0 : index
    %387 = arith.index_cast %343 : i32 to index
    %c0_199 = arith.constant 0 : index
    %c0_200 = arith.constant 0 : index
    %388 = vector.load %arg7[%c0_198, %387, %c0_199, %c0_200] : memref<1x4x2x128xf32, #tpu.memory_space<vmem>>, vector<1x1x2x128xf32>
    %389 = vector.shape_cast %388 : vector<1x1x2x128xf32> to vector<2x128xf32>
    %390 = vector.shape_cast %386 : vector<2x128xf32> to vector<1x1x2x128xf32>
    tpu.vector_store %arg7[%c0_198, %387, %c0_199, %c0_200], %390 {strides = array<i32>} : memref<1x4x2x128xf32, #tpu.memory_space<vmem>>, vector<1x1x2x128xf32>,
    %c4_i32_201 = arith.constant 4 : i32
    return
  }
  func.func @transform_0(%arg0: i32) -> (i32, i32) {
    %c0_i32 = arith.constant 0 : i32
    %c0_i32_0 = arith.constant 0 : i32
    %c0_i32_1 = arith.constant 0 : i32
    return %c0_i32, %c0_i32_0 : i32, i32
  }
  func.func @transform_1(%arg0: i32) -> (i32, i32, i32) {
    %c0_i32 = arith.constant 0 : i32
    %c0_i32_0 = arith.constant 0 : i32
    %c0_i32_1 = arith.constant 0 : i32
    return %arg0, %c0_i32, %c0_i32_0 : i32, i32, i32
  }
  func.func @transform_2(%arg0: i32) -> (i32, i32, i32, i32) {
    %c0_i32 = arith.constant 0 : i32
    %c0_i32_0 = arith.constant 0 : i32
    %c0_i32_1 = arith.constant 0 : i32
    %c0_i32_2 = arith.constant 0 : i32
    return %arg0, %c0_i32, %c0_i32_0, %c0_i32_1 : i32, i32, i32, i32
  }
  func.func @transform_3(%arg0: i32) -> (i32, i32, i32) {
    %c0_i32 = arith.constant 0 : i32
    %c0_i32_0 = arith.constant 0 : i32
    %c0_i32_1 = arith.constant 0 : i32
    return %arg0, %c0_i32, %c0_i32_0 : i32, i32, i32
  }
  func.func @transform_4(%arg0: i32) -> (i32, i32, i32) {
    %c0_i32 = arith.constant 0 : i32
    %c0_i32_0 = arith.constant 0 : i32
    %c0_i32_1 = arith.constant 0 : i32
    return %arg0, %c0_i32, %c0_i32_0 : i32, i32, i32
  }
  func.func @transform_5(%arg0: i32) -> (i32, i32, i32) {
    %c0_i32 = arith.constant 0 : i32
    %c0_i32_0 = arith.constant 0 : i32
    %c0_i32_1 = arith.constant 0 : i32
    return %arg0, %c0_i32, %c0_i32_0 : i32, i32, i32
  }
  func.func @transform_6(%arg0: i32) -> (i32, i32, i32, i32) {
    %c0_i32 = arith.constant 0 : i32
    %c0_i32_0 = arith.constant 0 : i32
    %c0_i32_1 = arith.constant 0 : i32
    %c0_i32_2 = arith.constant 0 : i32
    return %arg0, %c0_i32, %c0_i32_0, %c0_i32_1 : i32, i32, i32, i32
  }
}

</mosaic_0001>

<bundles_post_ra>
// kernel: onsets_and_frames_forward.2
= control target key start
LH: loop header
LB: loop body
LE: loop exit
PB: predicated region body
PF: predicated region fallthrough
CT: control target
= control target key end

     0   :  { %s1833_s24 = smov 0   ;;  %s2711_s0 = inlined_call_operand.vmem [shape: f32[2,96,21], index: 0, kind: input, shape index: {}]   ;;  %s2712_s1 = inlined_call_operand.vmem [shape: f32[21,48], index: 1, kind: input, shape index: {}]   ;;  %s2713_s2 = inlined_call_operand.vmem [shape: f32[1,48], index: 2, kind: input, shape index: {}]   ;;  %s2714_s3 = inlined_call_operand.vmem [shape: f32[1,48], index: 3, kind: input, shape index: {}]   ;;  %s2715_s4 = inlined_call_operand.vmem [shape: f32[9,48,48], index: 4, kind: input, shape index: {}]   ;;  %s2716_s5 = inlined_call_operand.vmem [shape: f32[1,48], index: 5, kind: input, shape index: {}]   ;;  %s2717_s6 = inlined_call_operand.vmem [shape: f32[1,48], index: 6, kind: input, shape index: {}]   ;;  %s2718_s7 = inlined_call_operand.vmem [shape: f32[2,32,48], index: 7, kind: output, shape index: {}]  }
   0x1 LB: > { %s1581_s25 = sadd.s32 4294967295, %s1789_s24   ;;  %p1585_p0 = scmp.ge.s32.totalorder %s1789_s24, 1  ;;  %s1789_s24 = sphi %s1833_s24, %s17_s24  }
   0x2   : > { %p237_p1 = scmp.lt.s32.totalorder %s1789_s24, 3 }
   0x4   : > { %p238_p2 = pnand %p1585_p0, %p237_p1 }
   0x6   : > { %241 = sbr.rel (%p238_p2) target bundleno = 593 (0x251), region = 48 }
   0xb   : > { %v293_v0 = vld [vmem:[%s2712_s1 + $0x10] sm:$0x1f]  ;;  %vm331_vm0 = vcmask 1044480   ;;  %v292_v1 = vld [vmem:[%s2712_s1 + $0x8] sm:$0xff]  ;;  %p269_p3 = scmp.lt.s32.totalorder %s1581_s25, 1  ;;  %v291_v2 = vld [vmem:[%s2712_s1] sm:$0xff] }
   0xc   : > { %1589 = vmatpush.msk.msra.mxu0 %vm331_vm0, %v293_v0  ;;  %1759 = vmatpush.msk.msra.mxu3 %vm331_vm0, %v293_v0  ;;  %vm294_vm1 = vcmask 171008   ;;  %v1607_v15 = vld [vmem:[%s2715_s4 + $0xb8] sm:$0xff]  ;;  %v1659_v16 = vld [vmem:[%s2715_s4 + $0xe8] sm:$0xff]  ;;  %v1606_v17 = vld [vmem:[%s2715_s4 + $0xb0] sm:$0xff]  ;;  %vm489_vm2 = vcmask 1043456   ;;  %vm515_vm3 = vcmask 392192  }
   0xd   : > { %s2736_s25 = smov (!%p269_p3, %s1581_s25), 1  ;;  %550 = vmatpush.msra.mxu1 %v1607_v15  ;;  %v1658_v18 = vld [vmem:[%s2715_s4 + $0xe0] sm:$0xff]  ;;  %1762 = vmatpush.msra.mxu2 %v1607_v15  ;;  %v1605_v19 = vld [vmem:[%s2715_s4 + $0xa8] sm:$0xff]  ;;  %v1657_v20 = vld [vmem:[%s2715_s4 + $0xd8] sm:$0xff]  ;;  %vm797_vm4 = vcmask 1042432   ;;  %vm900_vm5 = vcmask 1046528  }
   0xe   : > { %349 = vmatpush.msra.mxu0 %v292_v1  ;;  %1760 = vmatpush.msra.mxu3 %v292_v1  ;;  %s1768_s9 = smul.u32 96, %s2736_s25  ;;  %v1636_v21 = vld [vmem:[%s2715_s4 + $0x148] sm:$0xff]  ;;  %v1604_v22 = vld [vmem:[%s2715_s4 + $0xa0] sm:$0xff]  ;;  %v1656_v23 = vld [vmem:[%s2715_s4 + $0xd0] sm:$0xff]  ;;  %vm1214_vm6 = vcmask 1045504   ;;  %vm1111_vm7 = vcmask 1041408  }
   0xf   : > { %551 = vmatpush.msra.mxu1 %v1606_v17  ;;  %1763 = vmatpush.msra.mxu2 %v1606_v17  ;;  %v1635_v24 = vld [vmem:[%s2715_s4 + $0x140] sm:$0xff]  ;;  %v1603_v25 = vld [vmem:[%s2715_s4 + $0x98] sm:$0xff]  ;;  %v1655_v26 = vld [vmem:[%s2715_s4 + $0xc8] sm:$0xff]  ;;  %s1758_s26 = sshll.u32 %s2736_s25, 5 }
  0x10   : > { %350 = vmatpush.msra.mxu0 %v291_v2  ;;  %1761 = vmatpush.msra.mxu3 %v291_v2  ;;  %s273_s12 = scalar_lea.vmem %s2711_s0, %s1768_s9  ;;  %v1634_v27 = vld [vmem:[%s2715_s4 + $0x138] sm:$0xff]  ;;  %v1602_v28 = vld [vmem:[%s2715_s4 + $0x90] sm:$0xff]  ;;  %v1654_v29 = vld [vmem:[%s2715_s4 + $0xc0] sm:$0xff]  ;;  %s2637_s29 = scalar_lea.vmem %s2718_s7, %s1758_s26 }
  0x11   : > { %v279_v3 = vld [vmem:[%s273_s12] sm:$0xff]  ;;  %v286_v4 = vld [vmem:[%s273_s12 + $0x38] sm:$0xff]  ;;  %v280_v5 = vld [vmem:[%s273_s12 + $0x8] sm:$0xff]  ;;  %552 = vmatpush.msra.mxu1 %v1605_v19  ;;  %1764 = vmatpush.msra.mxu2 %v1605_v19 }
  0x12   : > { %1590 = vmatmul.msk.f32.vlgmr.msra.gmra.mxu0 %vm294_vm1, %v279_v3  ;;  %1597 = vmatmul.msk.f32.vlgmr.msra.gmra.mxu3 %vm294_vm1, %v286_v4  ;;  %v287_v6 = vld [vmem:[%s273_s12 + $0x40] sm:$0xff]  ;;  %v281_v7 = vld [vmem:[%s273_s12 + $0x10] sm:$0xff]  ;;  %v288_v8 = vld [vmem:[%s273_s12 + $0x48] sm:$0xff] }
  0x13   : > { %v282_v9 = vld [vmem:[%s273_s12 + $0x18] sm:$0xff]  ;;  %v289_v10 = vld [vmem:[%s273_s12 + $0x50] sm:$0xff]  ;;  %v283_v11 = vld [vmem:[%s273_s12 + $0x20] sm:$0xff]  ;;  %857 = vmatpush.msrb.mxu0 %v1659_v16  ;;  %692 = vmatpush.msrb.mxu3 %v1636_v21 }
  0x14   : > { %v290_v12 = vld [vmem:[%s273_s12 + $0x58] sm:$0xff]  ;;  %v284_v13 = vld [vmem:[%s273_s12 + $0x28] sm:$0xff]  ;;  %v285_v14 = vld [vmem:[%s273_s12 + $0x30] sm:$0xff]  ;;  %553 = vmatpush.msra.mxu1 %v1604_v22  ;;  %1765 = vmatpush.msra.mxu2 %v1604_v22 }
  0x15   : > { %858 = vmatpush.msrb.mxu0 %v1658_v18  ;;  %693 = vmatpush.msrb.mxu3 %v1635_v24  ;;  %v1633_v30 = vld [vmem:[%s2715_s4 + $0x130] sm:$0xff]  ;;  %v1632_v31 = vld [vmem:[%s2715_s4 + $0x128] sm:$0xff]  ;;  %v1631_v32 = vld [vmem:[%s2715_s4 + $0x120] sm:$0xff] }
  0x16   : > { %554 = vmatpush.msra.mxu1 %v1603_v25  ;;  %1766 = vmatpush.msra.mxu2 %v1603_v25  ;;  %v1927_v33 = vld [vmem:[%s2713_s2] ss:$0 sm:$0xff]  ;;  %v1653_v0 = vld [vmem:[%s2715_s4 + $0x58] sm:$0xff]  ;;  %v1652_v3 = vld [vmem:[%s2715_s4 + $0x50] sm:$0xff] }
  0x17   : > { %859 = vmatpush.msrb.mxu0 %v1657_v20  ;;  %694 = vmatpush.msrb.mxu3 %v1634_v27  ;;  %v1932_v34 = vld [vmem:[%s2714_s3] ss:$0 sm:$0xff]  ;;  %v1649_v21 = vld [vmem:[%s2715_s4 + $0x38] sm:$0xff] }
  0x18   : > { %555 = vmatpush.msra.mxu1 %v1602_v28  ;;  %1767 = vmatpush.msra.mxu2 %v1602_v28 }
  0x19   : > { %860 = vmatpush.msrb.mxu0 %v1656_v23  ;;  %695 = vmatpush.msrb.mxu3 %v1633_v30  ;;  %v1648_v23 = vld [vmem:[%s2715_s4 + $0x30] sm:$0xff] }
  0x1a   : > { %1591 = vmatmul.msk.f32.gmra.mxu0 %vm294_vm1, %v280_v5  ;;  %1598 = vmatmul.msk.f32.gmra.mxu3 %vm294_vm1, %v287_v6 }
  0x1b   : > { %861 = vmatpush.msrb.mxu0 %v1655_v26  ;;  %696 = vmatpush.msrb.mxu3 %v1632_v31 }
  0x1c   : > { %960 = vmatpush.msrb.mxu1 %v1653_v0 }
  0x1d   : > { %862 = vmatpush.msrb.mxu0 %v1654_v29  ;;  %697 = vmatpush.msrb.mxu3 %v1631_v32  ;;  %v478_v29 = vld [vmem:[%s2715_s4 + $0x20] sm:$0xff] }
  0x1e   : > { %961 = vmatpush.msrb.mxu1 %v1652_v3 }
  0x22   : > { %1592 = vmatmul.msk.f32.gmra.mxu0 %vm294_vm1, %v281_v7  ;;  %1599 = vmatmul.msk.f32.gmra.mxu3 %vm294_vm1, %v288_v8  ;;  %v479_v8 = vld [vmem:[%s2715_s4 + $0x28] sm:$0xff] }
  0x23   : > { %628 = vmatpush.msrb.mxu2 %v479_v8 }
  0x25   : > { %629 = vmatpush.msrb.mxu2 %v478_v29 }
  0x2a   : > { %1593 = vmatmul.msk.f32.gmra.mxu0 %vm294_vm1, %v282_v9  ;;  %1600 = vmatmul.msk.f32.gmra.mxu3 %vm294_vm1, %v289_v10  ;;  %v1651_v9 = vld [vmem:[%s2715_s4 + $0x48] sm:$0xff]  ;;  %v1650_v10 = vld [vmem:[%s2715_s4 + $0x40] sm:$0xff] }
  0x2b   : > { %962 = vmatpush.msrb.mxu1 %v1651_v9 }
  0x2d   : > { %963 = vmatpush.msrb.mxu1 %v1650_v10 }
  0x2f   : > { %964 = vmatpush.msrb.mxu1 %v1649_v21 }
  0x31   : > { %965 = vmatpush.msrb.mxu1 %v1648_v23 }
  0x32   : > { %1594 = vmatmul.msk.f32.gmra.mxu0 %vm294_vm1, %v283_v11  ;;  %1601 = vmatmul.msk.f32.gmra.mxu3 %vm294_vm1, %v290_v12 }
  0x3a   : > { %1595 = vmatmul.msk.f32.gmra.mxu0 %vm294_vm1, %v284_v13 }
  0x42   : > { %1596 = vmatmul.msk.f32.gmra.mxu0 %vm294_vm1, %v285_v14 }
  0x8f   : > { %v352_v35 = vpop.f32.mrf.mxu0 }
  0x90   : > { %v392_v36 = vmul.f32 %v1927_v33, %v352_v35 }
  0x92   : > { %v408_v37 = vadd.f32 %v1932_v34, %v392_v36 }
  0x94   : > { %v420_v38 = vmax.f32 %v408_v37, 0.0 }
  0x95   : > { %v1936_v39 = vpop.f32.mrf.mxu3 }
  0x96   : > { %v444_v42 = vrot.slane %v420_v38, 3  ;;  %v399_v28 = vmul.f32 %v1927_v33, %v1936_v39 }
  0x97   : > { %v355_v40 = vpop.f32.mrf.mxu0 }
  0x98   : > { %v393_v41 = vmul.f32 %v1927_v33, %v355_v40  ;;  %v1941_v45 = vsel %vm331_vm0, 0.0, %v444_v42  ;;  %v415_v39 = vadd.f32 %v1932_v34, %v399_v28 }
  0x99   : > { %v490_v51 = vrot.slane %v1941_v45, 4  ;;  %v798_v53 = vrot.slane %v1941_v45, 5 }
  0x9a   : > { %v409_v43 = vadd.f32 %v1932_v34, %v393_v41 }
  0x9c   : > { %v421_v44 = vmax.f32 %v409_v43, 0.0 }
  0x9d   : > { %v1943_v47 = vpop.f32.mrf.mxu3 }
  0x9e   : > { %v445_v46 = vrot.slane %v421_v44, 3  ;;  %v400_v41 = vmul.f32 %v1927_v33, %v1943_v47 }
  0x9f   : > { %v358_v48 = vpop.f32.mrf.mxu0 }
  0xa0   : > { %v1946_v49 = vsel %vm331_vm0, %v444_v42, %v445_v46  ;;  %v394_v50 = vmul.f32 %v1927_v33, %v358_v48 }
  0xa1   : > { %v491_v52 = vrot.slane %v1946_v49, 4  ;;  %v799_v54 = vrot.slane %v1946_v49, 5 }
  0xa2   : > { %v410_v55 = vadd.f32 %v1932_v34, %v394_v50 }
  0xa3   : > { %v492_v56 = vsel %vm489_vm2, %v490_v51, %v491_v52  ;;  %v800_v57 = vsel %vm797_vm4, %v798_v53, %v799_v54 }
  0xa4   : > { %v422_v58 = vmax.f32 %v410_v55, 0.0  ;;  %1608 = vmatmul.msk.f32.vlgmr.msra.gmra.mxu1 %vm515_vm3, %v492_v56  ;;  %1660 = vmatmul.msk.f32.vlgmr.msrb.gmra.mxu0 %vm515_vm3, %v800_v57  ;;  %v427_v55 = vmax.f32 %v415_v39, 0.0  ;;  %v416_v56 = vadd.f32 %v1932_v34, %v400_v41 }
  0xa5   : > { %v379_v60 = vpop.f32.mrf.mxu3 }
  0xa6   : > { %v447_v59 = vrot.slane %v422_v58, 3  ;;  %v401_v14 = vmul.f32 %v1927_v33, %v379_v60 }
  0xa7   : > { %v361_v61 = vpop.f32.mrf.mxu0 }
  0xa8   : > { %v1959_v62 = vsel %vm331_vm0, %v445_v46, %v447_v59  ;;  %v395_v63 = vmul.f32 %v1927_v33, %v361_v61  ;;  %v417_v26 = vadd.f32 %v1932_v34, %v401_v14 }
  0xa9   : > { %1637 = vmatmul.msk.f32.vlgmr.msrb.gmra.mxu3 %vm515_vm3, %v1959_v62  ;;  %v493_v1 = vrot.slane %v1959_v62, 4  ;;  %v801_v2 = vrot.slane %v1959_v62, 5 }
  0xaa   : > { %v411_v4 = vadd.f32 %v1932_v34, %v395_v63  ;;  %v429_v36 = vmax.f32 %v417_v26, 0.0 }
  0xab   : > { %v494_v5 = vsel %vm489_vm2, %v491_v52, %v493_v1  ;;  %v802_v6 = vsel %vm797_vm4, %v799_v54, %v801_v2  ;;  %v477_v54 = vld [vmem:[%s2715_s4 + $0x18] sm:$0xff] }
  0xac   : > { %v423_v7 = vmax.f32 %v411_v4, 0.0  ;;  %1609 = vmatmul.msk.f32.gmra.mxu1 %vm515_vm3, %v494_v5  ;;  %1661 = vmatmul.msk.f32.gmra.mxu0 %vm515_vm3, %v802_v6  ;;  %v2030_v52 = vrot.slane %v429_v36, 3  ;;  %v457_v4 = vrot.slane %v427_v55, 3  ;;  %v428_v5 = vmax.f32 %v416_v56, 0.0 }
  0xad   : > { %v382_v12 = vpop.f32.mrf.mxu3  ;;  %630 = vmatpush.msrb.mxu2 %v477_v54  ;;  %v902_v55 = vrot.slane %v1941_v45, 1 }
  0xae   : > { %v449_v11 = vrot.slane %v423_v7, 3  ;;  %v402_v15 = vmul.f32 %v1927_v33, %v382_v12  ;;  %v459_v28 = vrot.slane %v428_v5, 3  ;;  %v474_v5 = vld [vmem:[%s2715_s4] sm:$0xff] }
  0xaf   : > { %v364_v13 = vpop.f32.mrf.mxu0 }
  0xb0   : > { %v1989_v16 = vsel %vm331_vm0, %v447_v59, %v449_v11  ;;  %v396_v17 = vmul.f32 %v1927_v33, %v364_v13  ;;  %v418_v20 = vadd.f32 %v1932_v34, %v402_v15 }
  0xb1   : > { %1638 = vmatmul.msk.f32.gmra.mxu3 %vm515_vm3, %v1989_v16  ;;  %v495_v18 = vrot.slane %v1989_v16, 4  ;;  %v803_v19 = vrot.slane %v1989_v16, 5 }
  0xb2   : > { %v412_v22 = vadd.f32 %v1932_v34, %v396_v17  ;;  %v430_v30 = vmax.f32 %v418_v20, 0.0 }
  0xb3   : > { %v496_v24 = vsel %vm489_vm2, %v493_v1, %v495_v18  ;;  %v804_v25 = vsel %vm797_vm4, %v801_v2, %v803_v19 }
  0xb4   : > { %v424_v27 = vmax.f32 %v412_v22, 0.0  ;;  %1610 = vmatmul.msk.f32.gmra.mxu1 %vm515_vm3, %v496_v24  ;;  %1662 = vmatmul.msk.f32.gmra.mxu0 %vm515_vm3, %v804_v25  ;;  %v463_v44 = vrot.slane %v430_v30, 3 }
  0xb5   : > { %v385_v32 = vpop.f32.mrf.mxu3 }
  0xb6   : > { %v451_v31 = vrot.slane %v424_v27, 3  ;;  %v403_v37 = vmul.f32 %v1927_v33, %v385_v32  ;;  %v2040_v57 = vsel %vm331_vm0, %v2030_v52, %v463_v44 }
  0xb7   : > { %v367_v35 = vpop.f32.mrf.mxu0  ;;  %v817_v2 = vrot.slane %v2040_v57, 5  ;;  %v922_v14 = vrot.slane %v2040_v57, 1  ;;  %v1236_v21 = vrot.slane %v2040_v57, 2 }
  0xb8   : > { %v2016_v38 = vsel %vm331_vm0, %v449_v11, %v451_v31  ;;  %v397_v40 = vmul.f32 %v1927_v33, %v367_v35  ;;  %v419_v46 = vadd.f32 %v1932_v34, %v403_v37 }
  0xb9   : > { %1639 = vmatmul.msk.f32.gmra.mxu3 %vm515_vm3, %v2016_v38  ;;  %v497_v42 = vrot.slane %v2016_v38, 4  ;;  %v805_v43 = vrot.slane %v2016_v38, 5 }
  0xba   : > { %v413_v48 = vadd.f32 %v1932_v34, %v397_v40  ;;  %v431_v53 = vmax.f32 %v419_v46, 0.0  ;;  %v2127_v46 = vsel %vm331_vm0, %v457_v4, %v459_v28 }
  0xbb   : > { %v498_v50 = vsel %vm489_vm2, %v495_v18, %v497_v42  ;;  %v806_v51 = vsel %vm797_vm4, %v803_v19, %v805_v43  ;;  %v1131_v19 = vrot.slane %v2040_v57, 6  ;;  %v505_v54 = vrot.slane %v2127_v46, 4 }
  0xbc   : > { %v425_v47 = vmax.f32 %v413_v48, 0.0  ;;  %1611 = vmatmul.msk.f32.gmra.mxu1 %vm515_vm3, %v498_v50  ;;  %1663 = vmatmul.msk.f32.gmra.mxu0 %vm515_vm3, %v806_v51  ;;  %v465_v58 = vrot.slane %v431_v53, 3  ;;  %v475_v48 = vld [vmem:[%s2715_s4 + $0x8] sm:$0xff]  ;;  %v1791_v50 = vmov 0.0  }
  0xbd   : > { %v2136_v51 = vrot.slane %v1791_v50, 1  ;;  %v2139_v53 = vrot.slane %v1791_v50, 2 }
  0xbe   : > { %v453_v59 = vrot.slane %v425_v47, 3  ;;  %v2043_v61 = vsel %vm331_vm0, %v463_v44, %v465_v58  ;;  %v2046_v63 = vsel %vm331_vm0, %v465_v58, 0.0 }
  0xbf   : > { %v370_v60 = vpop.f32.mrf.mxu0  ;;  %v819_v3 = vrot.slane %v2043_v61, 5  ;;  %v511_v9 = vrot.slane %v2043_v61, 4  ;;  %v513_v10 = vrot.slane %v2046_v63, 4  ;;  %v821_v13 = vrot.slane %v2046_v63, 5 }
  0xc0   : > { %v2049_v0 = vsel %vm331_vm0, %v451_v31, %v453_v59  ;;  %v398_v1 = vmul.f32 %v1927_v33, %v370_v60  ;;  %v924_v18 = vrot.slane %v2043_v61, 1  ;;  %v1133_v22 = vrot.slane %v2043_v61, 6 }
  0xc1   : > { %1640 = vmatmul.msk.f32.gmra.mxu3 %vm515_vm3, %v2049_v0  ;;  %v499_v6 = vrot.slane %v2049_v0, 4  ;;  %v807_v7 = vrot.slane %v2049_v0, 5  ;;  %v2064_v33 = vsel %vm797_vm4, %v817_v2, %v819_v3  ;;  %v2078_v17 = vsel %vm489_vm2, %v511_v9, %v513_v10  ;;  %v1713_v10 = vld [vmem:[%s2715_s4 + $0x118] sm:$0xff] }
  0xc2   : > { %v414_v8 = vadd.f32 %v1932_v34, %v398_v1  ;;  %v476_v34 = vld [vmem:[%s2715_s4 + $0x10] sm:$0xff]  ;;  %v2083_v20 = vsel %vm797_vm4, %v819_v3, %v821_v13  ;;  %v1238_v23 = vrot.slane %v2043_v61, 2  ;;  %v2091_v25 = vsel %vm900_vm5, %v922_v14, %v924_v18  ;;  %1171 = vmatpush.msra.mxu3 %v1713_v10  ;;  %v1706_v13 = vld [vmem:[%s2715_s4 + $0x80] sm:$0xff] }
  0xc3   : > { %v500_v11 = vsel %vm489_vm2, %v497_v42, %v499_v6  ;;  %v808_v12 = vsel %vm797_vm4, %v805_v43, %v807_v7  ;;  %631 = vmatpush.msrb.mxu2 %v476_v34  ;;  %v1135_v26 = vrot.slane %v2046_v63, 6  ;;  %v1324_v27 = vrot.slane %v2046_v63, 2  ;;  %v1689_v34 = vld [vmem:[%s2715_s4 + $0x178] sm:$0xff] }
  0xc4   : > { %v426_v15 = vmax.f32 %v414_v8, 0.0  ;;  %1612 = vmatmul.msk.f32.gmra.mxu1 %vm515_vm3, %v500_v11  ;;  %1664 = vmatmul.msk.f32.gmra.mxu0 %vm515_vm3, %v808_v12  ;;  %v2098_v29 = vsel %vm1111_vm7, %v1131_v19, %v1133_v22  ;;  %v2103_v30 = vsel %vm1214_vm6, %v1236_v21, %v1238_v23  ;;  %v1010_v41 = vrot.slane %v2046_v63, 1  ;;  %v1707_v8 = vld [vmem:[%s2715_s4 + $0x88] sm:$0xff] }
  0xc5   : > { %v2112_v35 = vsel %vm1111_vm7, %v1133_v22, %v1135_v26  ;;  %v2115_v36 = vsel %vm1214_vm6, %v1238_v23, %v1324_v27  ;;  %632 = vmatpush.msrb.mxu2 %v475_v48  ;;  %v2148_v56 = vsel %vm1214_vm6, %v1324_v27, %v2139_v53  ;;  %v903_v1 = vsel %vm900_vm5, %v2136_v51, %v902_v55  ;;  %v1712_v22 = vld [vmem:[%s2715_s4 + $0x110] sm:$0xff]  ;;  %v1709_v48 = vld [vmem:[%s2715_s4 + $0xf8] sm:$0xff] }
  0xc6   : > { %v455_v24 = vrot.slane %v426_v15, 3  ;;  %v2142_v47 = vsel %vm900_vm5, %v924_v18, %v1010_v41  ;;  %v2152_v58 = vsel %vm900_vm5, %v1010_v41, %v2136_v51  ;;  %v2162_v3 = vsel %vm331_vm0, %v459_v28, %v2030_v52  ;;  %1274 = vmatpush.msra.mxu0 %v1707_v8  ;;  %v1705_v18 = vld [vmem:[%s2715_s4 + $0x78] sm:$0xff]  ;;  %v1704_v26 = vld [vmem:[%s2715_s4 + $0x70] sm:$0xff]  ;;  %1172 = vmatpush.msra.mxu3 %v1712_v22  ;;  %v1711_v28 = vld [vmem:[%s2715_s4 + $0x108] sm:$0xff] }
  0xc7   : > { %633 = vmatpush.msrb.mxu2 %v474_v5  ;;  %v813_v52 = vrot.slane %v2127_v46, 5  ;;  %v509_v23 = vrot.slane %v2040_v57, 4  ;;  %v815_v27 = vrot.slane %v2162_v3, 5  ;;  %v1703_v41 = vld [vmem:[%s2715_s4 + $0x68] sm:$0xff]  ;;  %v1742_v5 = vld [vmem:[%s2715_s4 + $0x1a0] sm:$0xff]  ;;  %v1113_v8 = vrot.slane %v1946_v49, 6 }
  0xc8   : > { %v2106_v31 = vsel %vm331_vm0, %v453_v59, %v455_v24  ;;  %v2109_v32 = vsel %vm331_vm0, %v455_v24, %v457_v4  ;;  %1275 = vmatpush.msra.mxu0 %v1706_v13  ;;  %v906_v24 = vrot.slane %v1959_v62, 1  ;;  %1173 = vmatpush.msra.mxu3 %v1711_v28  ;;  %v1112_v10 = vrot.slane %v1941_v45, 6  ;;  %v1740_v22 = vld [vmem:[%s2715_s4 + $0x190] sm:$0xff] }
  0xc9   : > { %1641 = vmatmul.msk.f32.gmra.mxu3 %vm515_vm3, %v2106_v31  ;;  %v501_v37 = vrot.slane %v2106_v31, 4  ;;  %v503_v39 = vrot.slane %v2109_v32, 4  ;;  %v809_v40 = vrot.slane %v2106_v31, 5  ;;  %v811_v59 = vrot.slane %v2109_v32, 5 }
  0xca   : > { %1276 = vmatpush.msra.mxu0 %v1705_v18  ;;  %v1218_v13 = vrot.slane %v1946_v49, 2  ;;  %v1686_v18 = vld [vmem:[%s2715_s4 + $0x160] sm:$0xff] }
  0xcb   : > { %v502_v42 = vsel %vm489_vm2, %v499_v6, %v501_v37  ;;  %v504_v43 = vsel %vm489_vm2, %v501_v37, %v503_v39  ;;  %v810_v44 = vsel %vm797_vm4, %v807_v7, %v809_v40  ;;  %v506_v60 = vsel %vm489_vm2, %v503_v39, %v505_v54  ;;  %v1743_v37 = vld [vmem:[%s2715_s4 + $0x1a8] sm:$0xff] }
  0xcc   : > { %1613 = vmatmul.msk.f32.gmra.mxu1 %vm515_vm3, %v502_v42  ;;  %1614 = vmatmul.msk.f32.vlgmr.msra.gmra.mxu2 %vm515_vm3, %v504_v43  ;;  %v812_v4 = vsel %vm797_vm4, %v809_v40, %v811_v59  ;;  %v507_v6 = vrot.slane %v2162_v3, 4  ;;  %v904_v7 = vrot.slane %v1946_v49, 1  ;;  %v814_v15 = vsel %vm797_vm4, %v811_v59, %v813_v52  ;;  %v1710_v43 = vld [vmem:[%s2715_s4 + $0x100] sm:$0xff] }
  0xcd   : > { %1665 = vmatmul.msk.f32.gmra.mxu0 %vm515_vm3, %v810_v44  ;;  %1030 = vmatpush.msra.mxu2 %v1689_v34  ;;  %v816_v42 = vsel %vm797_vm4, %v813_v52, %v815_v27  ;;  %v1702_v44 = vld [vmem:[%s2715_s4 + $0x60] sm:$0xff]  ;;  %v512_v59 = vsel %vm489_vm2, %v509_v23, %v511_v9  ;;  %v910_v9 = vrot.slane %v2016_v38, 1 }
  0xce   : > { %v508_v11 = vsel %vm489_vm2, %v505_v54, %v507_v6  ;;  %v905_v12 = vsel %vm900_vm5, %v902_v55, %v904_v7  ;;  %1277 = vmatpush.msra.mxu0 %v1704_v26  ;;  %v510_v39 = vsel %vm489_vm2, %v507_v6, %v509_v23  ;;  %v907_v40 = vsel %vm900_vm5, %v904_v7, %v906_v24  ;;  %v1708_v55 = vld [vmem:[%s2715_s4 + $0xf0] sm:$0xff]  ;;  %v1741_v7 = vld [vmem:[%s2715_s4 + $0x198] sm:$0xff]  ;;  %v1739_v26 = vld [vmem:[%s2715_s4 + $0x188] sm:$0xff] }
  0xcf   : > { %1344 = vmatpush.msra.mxu1 %v1743_v37  ;;  %1174 = vmatpush.msra.mxu3 %v1710_v43  ;;  %v908_v54 = vrot.slane %v1989_v16, 1  ;;  %v912_v6 = vrot.slane %v2049_v0, 1 }
  0xd0   : > { %1278 = vmatpush.msra.mxu0 %v1703_v41 }
  0xd1   : > { %1642 = vmatmul.msk.f32.gmra.mxu3 %vm515_vm3, %v2109_v32  ;;  %1345 = vmatpush.msra.mxu1 %v1742_v5  ;;  %v1226_v5 = vrot.slane %v2049_v0, 2 }
  0xd2   : > { %1175 = vmatpush.msra.mxu3 %v1709_v48  ;;  %1279 = vmatpush.msra.mxu0 %v1702_v44  ;;  %v1119_v44 = vrot.slane %v2016_v38, 6  ;;  %v1685_v48 = vld [vmem:[%s2715_s4 + $0x158] sm:$0xff] }
  0xd3   : > { %1346 = vmatpush.msra.mxu1 %v1741_v7 }
  0xd4   : > { %1615 = vmatmul.msk.f32.gmra.mxu2 %vm515_vm3, %v506_v60  ;;  %1672 = vmatmul.msk.f32.vlgmr.msrb.gmra.mxu1 %vm515_vm3, %v903_v1  ;;  %v2242_v60 = vsel %vm900_vm5, %v906_v24, %v908_v54  ;;  %v818_v1 = vsel %vm797_vm4, %v815_v27, %v817_v2  ;;  %v2261_v2 = vsel %vm900_vm5, %v908_v54, %v910_v9  ;;  %v1220_v24 = vrot.slane %v1959_v62, 2  ;;  %v1738_v27 = vld [vmem:[%s2715_s4 + $0x180] sm:$0xff] }
  0xd5   : > { %1666 = vmatmul.msk.f32.gmra.mxu0 %vm515_vm3, %v812_v4  ;;  %1176 = vmatpush.msra.mxu3 %v1708_v55  ;;  %v1688_v4 = vld [vmem:[%s2715_s4 + $0x170] sm:$0xff]  ;;  %v1224_v55 = vrot.slane %v2016_v38, 2 }
  0xd6   : > { %1031 = vmatpush.msra.mxu2 %v1688_v4  ;;  %1347 = vmatpush.msra.mxu1 %v1740_v22  ;;  %v1221_v37 = vsel %vm1214_vm6, %v1218_v13, %v1220_v24  ;;  %v1121_v4 = vrot.slane %v2049_v0, 6  ;;  %v1129_v22 = vrot.slane %v2162_v3, 6 }
  0xd8   : > { %1348 = vmatpush.msra.mxu1 %v1739_v26 }
  0xd9   : > { %1643 = vmatmul.msk.f32.gmra.mxu3 %vm515_vm3, %v2127_v46 }
  0xda   : > { %1349 = vmatpush.msra.mxu1 %v1738_v27 }
  0xdc   : > { %1616 = vmatmul.msk.f32.gmra.mxu2 %vm515_vm3, %v508_v11  ;;  %1673 = vmatmul.msk.f32.gmra.mxu1 %vm515_vm3, %v905_v12  ;;  %v916_v11 = vrot.slane %v2109_v32, 1  ;;  %v1114_v12 = vsel %vm1111_vm7, %v1112_v10, %v1113_v8  ;;  %v1230_v10 = vrot.slane %v2109_v32, 2 }
  0xdd   : > { %1667 = vmatmul.msk.f32.gmra.mxu0 %vm515_vm3, %v814_v15 }
  0xe1   : > { %1644 = vmatmul.msk.f32.gmra.mxu3 %vm515_vm3, %v2162_v3 }
  0xe4   : > { %1617 = vmatmul.msk.f32.gmra.mxu2 %vm515_vm3, %v510_v39  ;;  %1674 = vmatmul.msk.f32.gmra.mxu1 %vm515_vm3, %v907_v40  ;;  %v1117_v39 = vrot.slane %v1989_v16, 6  ;;  %v920_v40 = vrot.slane %v2162_v3, 1 }
  0xe5   : > { %1668 = vmatmul.msk.f32.gmra.mxu0 %vm515_vm3, %v816_v42  ;;  %v1222_v42 = vrot.slane %v1989_v16, 2 }
  0xe6   : > { %v1120_v54 = vsel %vm1111_vm7, %v1117_v39, %v1119_v44 }
  0xe7   : > { %v1223_v43 = vsel %vm1214_vm6, %v1220_v24, %v1222_v42  ;;  %v1234_v24 = vrot.slane %v2162_v3, 2 }
  0xe9   : > { %1645 = vmatmul.msk.f32.gmra.mxu3 %vm515_vm3, %v2040_v57 }
  0xec   : > { %1618 = vmatmul.msk.f32.gmra.mxu2 %vm515_vm3, %v512_v59  ;;  %1675 = vmatmul.msk.f32.gmra.mxu1 %vm515_vm3, %v2242_v60 }
  0xed   : > { %1669 = vmatmul.msk.f32.gmra.mxu0 %vm515_vm3, %v818_v1  ;;  %v1225_v1 = vsel %vm1214_vm6, %v1222_v42, %v1224_v55 }
  0xf1   : > { %1646 = vmatmul.msk.f32.gmra.mxu3 %vm515_vm3, %v2043_v61  ;;  %v2273_v61 = vsel %vm900_vm5, %v910_v9, %v912_v6  ;;  %v1122_v9 = vsel %vm1111_vm7, %v1119_v44, %v1121_v4 }
  0xf4   : > { %1619 = vmatmul.msk.f32.gmra.mxu2 %vm515_vm3, %v2078_v17  ;;  %1676 = vmatmul.msk.f32.gmra.mxu1 %vm515_vm3, %v2261_v2  ;;  %v1687_v17 = vld [vmem:[%s2715_s4 + $0x168] sm:$0xff] }
  0xf5   : > { %1670 = vmatmul.msk.f32.gmra.mxu0 %vm515_vm3, %v2064_v33  ;;  %1032 = vmatpush.msra.mxu2 %v1687_v17  ;;  %v914_v33 = vrot.slane %v2106_v31, 1  ;;  %v1684_v17 = vld [vmem:[%s2715_s4 + $0x150] sm:$0xff] }
  0xf7   : > { %v2290_v52 = vsel %vm900_vm5, %v912_v6, %v914_v33  ;;  %v2306_v15 = vsel %vm900_vm5, %v914_v33, %v916_v11  ;;  %1033 = vmatpush.msra.mxu2 %v1686_v18 }
  0xf9   : > { %1647 = vmatmul.msk.f32.gmra.mxu3 %vm515_vm3, %v2046_v63  ;;  %v1216_v63 = vrot.slane %v1941_v45, 2  ;;  %1034 = vmatpush.msra.mxu2 %v1685_v48 }
  0xfb   : > { %v1219_v34 = vsel %vm1214_vm6, %v1216_v63, %v1218_v13  ;;  %1035 = vmatpush.msra.mxu2 %v1684_v17  ;;  %v1127_v13 = vrot.slane %v2127_v46, 6 }
  0xfc   : > { %634 = vmatmul.f32.vlgmr.msrb.gmra.mxu2 %v1791_v50  ;;  %1677 = vmatmul.msk.f32.gmra.mxu1 %vm515_vm3, %v2273_v61 }
  0xfd   : > { %1671 = vmatmul.msk.f32.gmra.mxu0 %vm515_vm3, %v2083_v20  ;;  %v1217_v20 = vsel %vm1214_vm6, %v2139_v53, %v1216_v63  ;;  %v1228_v63 = vrot.slane %v2106_v31, 2 }
 0x101   : > { %731 = vmatmul.f32.gmra.mxu3 %v1791_v50 }
 0x104   : > { %1620 = vmatmul.msk.f32.gmra.mxu2 %vm515_vm3, %v1941_v45  ;;  %1678 = vmatmul.msk.f32.gmra.mxu1 %vm515_vm3, %v2290_v52  ;;  %v1115_v45 = vrot.slane %v1959_v62, 6 }
 0x105   : > { %1726 = vmatmul.msk.f32.vlgmr.msra.gmra.mxu0 %vm515_vm3, %v1217_v20  ;;  %v1125_v20 = vrot.slane %v2109_v32, 6 }
 0x106   : > { %v1116_v23 = vsel %vm1111_vm7, %v1113_v8, %v1115_v45  ;;  %v1118_v41 = vsel %vm1111_vm7, %v1115_v45, %v1117_v39  ;;  %v1232_v45 = vrot.slane %v2127_v46, 2 }
 0x109   : > { %1714 = vmatmul.msk.f32.vlgmr.msra.gmra.mxu3 %vm515_vm3, %v1114_v12 }
 0x10c   : > { %1621 = vmatmul.msk.f32.gmra.mxu2 %vm515_vm3, %v1946_v49  ;;  %1679 = vmatmul.msk.f32.gmra.mxu1 %vm515_vm3, %v2306_v15  ;;  %v918_v49 = vrot.slane %v2127_v46, 1 }
 0x10d   : > { %1727 = vmatmul.msk.f32.gmra.mxu0 %vm515_vm3, %v1219_v34  ;;  %v1128_v34 = vsel %vm1111_vm7, %v1125_v20, %v1127_v13 }
 0x10e   : > { %v2332_v28 = vsel %vm900_vm5, %v916_v11, %v918_v49 }
 0x111   : > { %1715 = vmatmul.msk.f32.gmra.mxu3 %vm515_vm3, %v1116_v23  ;;  %v1130_v23 = vsel %vm1111_vm7, %v1127_v13, %v1129_v22 }
 0x114   : > { %1622 = vmatmul.msk.f32.gmra.mxu2 %vm515_vm3, %v1959_v62  ;;  %1680 = vmatmul.msk.f32.gmra.mxu1 %vm515_vm3, %v2332_v28  ;;  %v2346_v62 = vsel %vm900_vm5, %v918_v49, %v920_v40 }
 0x115   : > { %1728 = vmatmul.msk.f32.gmra.mxu0 %vm515_vm3, %v1221_v37 }
 0x119   : > { %1716 = vmatmul.msk.f32.gmra.mxu3 %vm515_vm3, %v1118_v41 }
 0x11c   : > { %1623 = vmatmul.msk.f32.gmra.mxu2 %vm515_vm3, %v1989_v16  ;;  %1681 = vmatmul.msk.f32.gmra.mxu1 %vm515_vm3, %v2346_v62  ;;  %v2366_v16 = vsel %vm900_vm5, %v920_v40, %v922_v14  ;;  %v1123_v14 = vrot.slane %v2106_v31, 6  ;;  %v1132_v40 = vsel %vm1111_vm7, %v1129_v22, %v1131_v19 }
 0x11d   : > { %1729 = vmatmul.msk.f32.gmra.mxu0 %vm515_vm3, %v1223_v43 }
 0x11e   : > { %v1124_v33 = vsel %vm1111_vm7, %v1121_v4, %v1123_v14  ;;  %v1126_v8 = vsel %vm1111_vm7, %v1123_v14, %v1125_v20 }
 0x121   : > { %v2360_v59 = vpop.f32.mrf.mxu1  ;;  %1717 = vmatmul.msk.f32.gmra.mxu3 %vm515_vm3, %v1120_v54  ;;  %v864_v12 = vpop.f32.mrf.mxu0 }
 0x124   : > { %1624 = vmatmul.msk.f32.gmra.mxu2 %vm515_vm3, %v2016_v38  ;;  %1682 = vmatmul.msk.f32.gmra.mxu1 %vm515_vm3, %v2366_v16  ;;  %v1227_v38 = vsel %vm1214_vm6, %v1224_v55, %v1226_v5 }
 0x125   : > { %1730 = vmatmul.msk.f32.gmra.mxu0 %vm515_vm3, %v1225_v1 }
 0x129   : > { %v2377_v6 = vpop.f32.mrf.mxu1  ;;  %1718 = vmatmul.msk.f32.gmra.mxu3 %vm515_vm3, %v1122_v9  ;;  %v867_v49 = vpop.f32.mrf.mxu0 }
 0x12c   : > { %1625 = vmatmul.msk.f32.gmra.mxu2 %vm515_vm3, %v2049_v0  ;;  %1683 = vmatmul.msk.f32.gmra.mxu1 %vm515_vm3, %v2091_v25  ;;  %v1229_v0 = vsel %vm1214_vm6, %v1226_v5, %v1228_v63  ;;  %v2428_v27 = vpop.f32.mrf.mxu3 }
 0x12d   : > { %1731 = vmatmul.msk.f32.gmra.mxu0 %vm515_vm3, %v1227_v38 }
 0x131   : > { %v2392_v7 = vpop.f32.mrf.mxu1  ;;  %1719 = vmatmul.msk.f32.gmra.mxu3 %vm515_vm3, %v1124_v33  ;;  %v870_v37 = vpop.f32.mrf.mxu0 }
 0x134   : > { %1626 = vmatmul.msk.f32.gmra.mxu2 %vm515_vm3, %v2106_v31  ;;  %1744 = vmatmul.msk.f32.vlgmr.msra.gmra.mxu1 %vm515_vm3, %v1223_v43  ;;  %v1231_v31 = vsel %vm1214_vm6, %v1228_v63, %v1230_v10  ;;  %v2449_v43 = vpop.f32.mrf.mxu3 }
 0x135   : > { %1732 = vmatmul.msk.f32.gmra.mxu0 %vm515_vm3, %v1229_v0 }
 0x139   : > { %v2403_v11 = vpop.f32.mrf.mxu1  ;;  %1720 = vmatmul.msk.f32.gmra.mxu3 %vm515_vm3, %v1126_v8  ;;  %v873_v19 = vpop.f32.mrf.mxu0 }
 0x13c   : > { %1627 = vmatmul.msk.f32.gmra.mxu2 %vm515_vm3, %v2109_v32  ;;  %1745 = vmatmul.msk.f32.gmra.mxu1 %vm515_vm3, %v1225_v1  ;;  %v1233_v32 = vsel %vm1214_vm6, %v1230_v10, %v1232_v45 }
 0x13d   : > { %1733 = vmatmul.msk.f32.gmra.mxu0 %vm515_vm3, %v1231_v31 }
 0x141   : > { %v2414_v18 = vpop.f32.mrf.mxu1  ;;  %1721 = vmatmul.msk.f32.gmra.mxu3 %vm515_vm3, %v1128_v34 }
 0x144   : > { %1628 = vmatmul.msk.f32.gmra.mxu2 %vm515_vm3, %v2127_v46  ;;  %1746 = vmatmul.msk.f32.gmra.mxu1 %vm515_vm3, %v1227_v38  ;;  %v1235_v46 = vsel %vm1214_vm6, %v1232_v45, %v1234_v24 }
 0x145   : > { %1734 = vmatmul.msk.f32.gmra.mxu0 %vm515_vm3, %v1233_v32 }
 0x149   : > { %v2425_v26 = vpop.f32.mrf.mxu1  ;;  %1722 = vmatmul.msk.f32.gmra.mxu3 %vm515_vm3, %v1130_v23 }
 0x14c   : > { %1629 = vmatmul.msk.f32.gmra.mxu2 %vm515_vm3, %v2162_v3  ;;  %1747 = vmatmul.msk.f32.gmra.mxu1 %vm515_vm3, %v1229_v0  ;;  %v1237_v3 = vsel %vm1214_vm6, %v1234_v24, %v1236_v21 }
 0x14d   : > { %1735 = vmatmul.msk.f32.gmra.mxu0 %vm515_vm3, %v1235_v46 }
 0x14f   : > { %v2435_v39 = vpop.f32.mrf.mxu2 }
 0x151   : > { %v967_v41 = vpop.f32.mrf.mxu1  ;;  %1723 = vmatmul.msk.f32.gmra.mxu3 %vm515_vm3, %v1132_v40 }
 0x152   : > { %v2441_v42 = vadd.f32 %v967_v41, %v864_v12 }
 0x154   : > { %1630 = vmatmul.msk.f32.gmra.mxu2 %vm515_vm3, %v2040_v57  ;;  %1748 = vmatmul.msk.f32.gmra.mxu1 %vm515_vm3, %v1231_v31  ;;  %v2463_v57 = vpop.f32.mrf.mxu3 }
 0x155   : > { %1736 = vmatmul.msk.f32.gmra.mxu0 %vm515_vm3, %v1237_v3 }
 0x157   : > { %v2452_v44 = vpop.f32.mrf.mxu2 }
 0x159   : > { %v970_v48 = vpop.f32.mrf.mxu1  ;;  %1724 = vmatmul.msk.f32.gmra.mxu3 %vm515_vm3, %v2098_v29  ;;  %v876_v29 = vpop.f32.mrf.mxu0 }
 0x15a   : > { %v2456_v54 = vadd.f32 %v970_v48, %v867_v49 }
 0x15c   : > { %1690 = vmatmul.msk.f32.vlgmr.msra.gmra.mxu2 %vm515_vm3, %v2242_v60  ;;  %1749 = vmatmul.msk.f32.gmra.mxu1 %vm515_vm3, %v1233_v32  ;;  %v2476_v4 = vpop.f32.mrf.mxu3 }
 0x15d   : > { %1737 = vmatmul.msk.f32.gmra.mxu0 %vm515_vm3, %v2103_v30 }
 0x15f   : > { %v2465_v21 = vpop.f32.mrf.mxu2 }
 0x161   : > { %v973_v55 = vpop.f32.mrf.mxu1  ;;  %1725 = vmatmul.msk.f32.gmra.mxu3 %vm515_vm3, %v2112_v35  ;;  %v879_v35 = vpop.f32.mrf.mxu0 }
 0x162   : > { %v2469_v1 = vadd.f32 %v973_v55, %v870_v37 }
 0x164   : > { %1691 = vmatmul.msk.f32.gmra.mxu2 %vm515_vm3, %v2261_v2  ;;  %1750 = vmatmul.msk.f32.gmra.mxu1 %vm515_vm3, %v1235_v46  ;;  %v2487_v2 = vpop.f32.mrf.mxu3 }
 0x167   : > { %v2474_v60 = vpop.f32.mrf.mxu2 }
 0x169   : > { %v976_v9 = vpop.f32.mrf.mxu1  ;;  %v882_v33 = vpop.f32.mrf.mxu0 }
 0x16a   : > { %v2478_v5 = vadd.f32 %v976_v9, %v873_v19 }
 0x16c   : > { %1692 = vmatmul.msk.f32.gmra.mxu2 %vm515_vm3, %v2273_v61  ;;  %1751 = vmatmul.msk.f32.gmra.mxu1 %vm515_vm3, %v1237_v3  ;;  %v2501_v20 = vpop.f32.mrf.mxu3 }
 0x16f   : > { %v2483_v38 = vpop.f32.mrf.mxu2 }
 0x171   : > { %v979_v14 = vpop.f32.mrf.mxu1  ;;  %v885_v10 = vpop.f32.mrf.mxu0 }
 0x172   : > { %v2485_v17 = vadd.f32 %v979_v14, %v876_v29 }
 0x174   : > { %1693 = vmatmul.msk.f32.gmra.mxu2 %vm515_vm3, %v2290_v52  ;;  %1752 = vmatmul.msk.f32.gmra.mxu1 %vm515_vm3, %v2103_v30  ;;  %v2509_v30 = vpop.f32.mrf.mxu3 }
 0x177   : > { %v2493_v63 = vpop.f32.mrf.mxu2 }
 0x178   : > { %2719 = vst [vmem:[#allocation3_spill] sm:$0xff] %v2493_v63 }
 0x179   : > { %v982_v61 = vpop.f32.mrf.mxu1 }
 0x17a   : > { %v2495_v0 = vadd.f32 %v982_v61, %v879_v35 }
 0x17c   : > { %1694 = vmatmul.msk.f32.gmra.mxu2 %vm515_vm3, %v2306_v15  ;;  %1753 = vmatmul.msk.f32.gmra.mxu1 %vm515_vm3, %v2115_v36  ;;  %v888_v36 = vpop.f32.mrf.mxu0  ;;  %v2519_v45 = vpop.f32.mrf.mxu3 }
 0x17f   : > { %v635_v8 = vpop.f32.mrf.mxu2 }
 0x181   : > { %v985_v52 = vpop.f32.mrf.mxu1 }
 0x182   : > { %v2503_v12 = vadd.f32 %v985_v52, %v882_v33 }
 0x184   : > { %1695 = vmatmul.msk.f32.gmra.mxu2 %vm515_vm3, %v2332_v28  ;;  %1754 = vmatmul.msk.f32.gmra.mxu1 %vm515_vm3, %v2148_v56  ;;  %v891_v56 = vpop.f32.mrf.mxu0 }
 0x187   : > { %v638_v31 = vpop.f32.mrf.mxu2 }
 0x189   : > { %v988_v15 = vpop.f32.mrf.mxu1 }
 0x18a   : > { %v2511_v13 = vadd.f32 %v988_v15, %v885_v10  ;;  %v471_v15 = vlaneseq }
 0x18c   : > { %1696 = vmatmul.msk.f32.gmra.mxu2 %vm515_vm3, %v2346_v62  ;;  %1755 = vmatmul.msk.f32.gmra.mxu1 %vm515_vm3, %v2139_v53  ;;  %v2529_v62 = vpop.f32.mrf.mxu3  ;;  %v894_v53 = vpop.f32.mrf.mxu0 }
 0x18f   : > { %v2517_v34 = vpop.f32.mrf.mxu2 }
 0x191   : > { %v991_v28 = vpop.f32.mrf.mxu1 }
 0x192   : > { %v2521_v32 = vadd.f32 %v991_v28, %v888_v36  ;;  %v472_v36 = vshrl.u32 %v471_v15, 7 }
 0x194   : > { %1697 = vmatmul.msk.f32.gmra.mxu2 %vm515_vm3, %v2366_v16  ;;  %v2539_v16 = vpop.f32.mrf.mxu3  ;;  %v897_v41 = vpop.f32.mrf.mxu0  ;;  %vm747_vm8 = vcmp.ge.s32.totalorder %v472_v36, 1 }
 0x197   : > { %v2525_v22 = vpop.f32.mrf.mxu2 }
 0x199   : > { %v994_v49 = vpop.f32.mrf.mxu1 }
 0x19a   : > { %v2527_v23 = vadd.f32 %v994_v49, %v891_v56  ;;  %v636_v56 = vadd.f32 %v635_v8, %v2360_v59 }
 0x19c   : > { %2720 = vst [vmem:[#allocation4_spill] sm:$0xff] %v2527_v23  ;;  %1698 = vmatmul.msk.f32.gmra.mxu2 %vm515_vm3, %v2091_v25  ;;  %v2547_v25 = vpop.f32.mrf.mxu3  ;;  %v1281_v35 = vpop.f32.mrf.mxu0 }
 0x19d   : > { %2723 = vst [vmem:[#allocation7_spill] sm:$0xff] %v2547_v25 }
 0x19f   : > { %v2533_v24 = vpop.f32.mrf.mxu2 }
 0x1a1   : > { %v997_v46 = vpop.f32.mrf.mxu1 }
 0x1a2   : > { %v2535_v37 = vadd.f32 %v997_v46, %v894_v53  ;;  %v735_v46 = vadd.f32 %v2428_v27, %v636_v56  ;;  %v2577_v27 = vld [vmem:[%s2716_s5] ss:$0 sm:$0xff] }
 0x1a4   : > { %2721 = vst [vmem:[#allocation5_spill] sm:$0xff] %v2535_v37  ;;  %1699 = vmatmul.msk.f32.gmra.mxu2 %vm515_vm3, %v2142_v47  ;;  %v2555_v47 = vpop.f32.mrf.mxu3 }
 0x1a5   : > { %2724 = vst [vmem:[#allocation8_spill] sm:$0xff] %v2555_v47  ;;  %v639_v47 = vadd.f32 %v638_v31, %v2377_v6 }
 0x1a7   : > { %v2541_v40 = vpop.f32.mrf.mxu2  ;;  %v736_v6 = vadd.f32 %v2449_v43, %v639_v47 }
 0x1a9   : > { %v1000_v3 = vpop.f32.mrf.mxu1 }
 0x1aa   : > { %v2543_v19 = vadd.f32 %v1000_v3, %v897_v41  ;;  %v473_v41 = vadd.s32 8, %v472_v36  ;;  %v2568_v3 = vsel %vm747_vm8, 1.0, %v1791_v50 }
 0x1ab   : > { %v759_v15 = vmul.f32 %v2568_v3, %v735_v46  ;;  %v753_v59 = vrot.slane %v2568_v3, 4 }
 0x1ac   : > { %2722 = vst [vmem:[#allocation6_spill] sm:$0xff] %v2543_v19  ;;  %1700 = vmatmul.msk.f32.gmra.mxu2 %vm515_vm3, %v2152_v58  ;;  %v1178_v9 = vpop.f32.mrf.mxu3  ;;  %v1284_v58 = vpop.f32.mrf.mxu0  ;;  %vm1400_vm9 = vcmp.le.s32.totalorder %v473_v41, 10 }
 0x1ad   : > { %v1282_v37 = vadd.f32 %v1281_v35, %v1178_v9  ;;  %v1402_v9 = vsel %vm1400_vm9, 1.0, %v1791_v50  ;;  %v642_v50 = vadd.f32 %v2517_v34, %v2392_v7 }
 0x1af   : > { %v2549_v48 = vpop.f32.mrf.mxu2 }
 0x1b1   : > { %v1351_v14 = vpop.f32.mrf.mxu1 }
 0x1b2   : > { %v1387_v25 = vadd.f32 %v1351_v14, %v1282_v37 }
 0x1b4   : > { %1701 = vmatmul.msk.f32.gmra.mxu2 %vm515_vm3, %v2136_v51  ;;  %v1181_v61 = vpop.f32.mrf.mxu3  ;;  %v1287_v49 = vpop.f32.mrf.mxu0 }
 0x1b5   : > { %v1285_v31 = vadd.f32 %v1284_v58, %v1181_v61 }
 0x1b7   : > { %v2553_v55 = vpop.f32.mrf.mxu2 }
 0x1b9   : > { %v1354_v10 = vpop.f32.mrf.mxu1 }
 0x1ba   : > { %v1388_v14 = vadd.f32 %v1354_v10, %v1285_v31  ;;  %v737_v31 = vadd.f32 %v2463_v57, %v642_v50 }
 0x1bc   : > { %v1184_v28 = vpop.f32.mrf.mxu3  ;;  %v1290_v8 = vpop.f32.mrf.mxu0 }
 0x1bf   : > { %v2557_v29 = vpop.f32.mrf.mxu2 }
 0x1c1   : > { %v1357_v53 = vpop.f32.mrf.mxu1 }
 0x1c7   : > { %v2559_v33 = vpop.f32.mrf.mxu2 }
 0x1c9   : > { %v1360_v36 = vpop.f32.mrf.mxu1 }
 0x1cf   : > { %v2561_v52 = vpop.f32.mrf.mxu2 }
 0x1d0   : > { %2725 = vst [vmem:[#allocation9_spill] sm:$0xff] %v2561_v52 }
 0x1d1   : > { %v1363_v7 = vpop.f32.mrf.mxu1 }
 0x1d7   : > { %v2563_v51 = vpop.f32.mrf.mxu2 }
 0x1d8   : > { %2726 = vst [vmem:[#allocation10_spill] sm:$0xff] %v2563_v51  ;;  %v1187_v51 = vpop.f32.mrf.mxu3 }
 0x1df   : > { %v1037_v19 = vpop.f32.mrf.mxu2 }
 0x1e0   : > { %v1073_v63 = vadd.f32 %v1037_v19, %v2441_v42  ;;  %v2584_v42 = vld [vmem:[%s2717_s6] ss:$0 sm:$0xff]  ;;  %v1792_v19 = vmov 1.0   ;;  %v1190_v10 = vpop.f32.mrf.mxu3 }
 0x1e1   : > { %v754_v37 = vrot.slane %v1792_v19, 4  ;;  %v1293_v19 = vpop.f32.mrf.mxu0 }
 0x1e2   : > { %v1085_v23 = vadd.f32 %v1073_v63, %v759_v15  ;;  %v2587_v63 = vsel %vm489_vm2, 1.0, %v753_v59  ;;  %v1406_v15 = vrot.slane %v1402_v9, 4 }
 0x1e3   : > { %v2591_v46 = vsel %vm489_vm2, %v1402_v9, %v754_v37  ;;  %v2602_v34 = vsel %vm489_vm2, %v753_v59, %v754_v37 }
 0x1e4   : > { %v1423_v35 = vadd.f32 %v1387_v25, %v1085_v23  ;;  %v760_v25 = vmul.f32 %v2587_v63, %v736_v6  ;;  %v1412_v61 = vmul.f32 %v2591_v46, %v1388_v14  ;;  %v645_v14 = vadd.f32 %v2525_v22, %v2403_v11 }
 0x1e6   : > { %v1439_v56 = vmul.f32 %v2577_v27, %v1423_v35  ;;  %v1288_v35 = vadd.f32 %v1287_v49, %v1184_v28  ;;  %v761_v28 = vmul.f32 %v2602_v34, %v737_v31 }
 0x1e7   : > { %v1040_v43 = vpop.f32.mrf.mxu2 }
 0x1e8   : > { %v1455_v23 = vadd.f32 %v2584_v42, %v1439_v56  ;;  %v1074_v47 = vadd.f32 %v1040_v43, %v2456_v54  ;;  %v1389_v6 = vadd.f32 %v1357_v53, %v1288_v35  ;;  %v2608_v56 = vsel %vm489_vm2, %v754_v37, %v1406_v15  ;;  %v1193_v11 = vpop.f32.mrf.mxu3 }
 0x1e9   : > { %v738_v53 = vadd.f32 %v2476_v4, %v645_v14  ;;  %v1296_v22 = vpop.f32.mrf.mxu0 }
 0x1ea   : > { %v1467_v58 = vmax.f32 %v1455_v23, 0.0  ;;  %v1086_v41 = vadd.f32 %v1074_v47, %v760_v25  ;;  %v1413_v43 = vmul.f32 %v2608_v56, %v1389_v6  ;;  %v1366_v23 = vpop.f32.mrf.mxu1  ;;  %v1294_v6 = vadd.f32 %v1293_v19, %v1190_v10 }
 0x1eb   : > { %v762_v25 = vmul.f32 %v2568_v3, %v738_v53 }
 0x1ec   : > { %1479 = vst.msk [vmem:[#allocation2] sm:$0xff] %vm515_vm3, %v1467_v58  ;;  %v1424_v52 = vadd.f32 %v1412_v61, %v1086_v41  ;;  %v1291_v61 = vadd.f32 %v1290_v8, %v1187_v51  ;;  %v1391_v14 = vadd.f32 %v1363_v7, %v1294_v6 }
 0x1ee   : > { %v1440_v54 = vmul.f32 %v2577_v27, %v1424_v52  ;;  %v1390_v4 = vadd.f32 %v1360_v36, %v1291_v61  ;;  %v1415_v10 = vmul.f32 %v2591_v46, %v1391_v14 }
 0x1ef   : > { %v1043_v9 = vpop.f32.mrf.mxu2 }
 0x1f0   : > { %v1456_v57 = vadd.f32 %v2584_v42, %v1440_v54  ;;  %v1075_v49 = vadd.f32 %v1043_v9, %v2469_v1  ;;  %v648_v1 = vadd.f32 %v2533_v24, %v2414_v18  ;;  %v651_v24 = vadd.f32 %v2541_v40, %v2425_v26 }
 0x1f1   : > { %v1299_v51 = vpop.f32.mrf.mxu0 }
 0x1f2   : > { %v1468_v59 = vmax.f32 %v1456_v57, 0.0  ;;  %v1087_v50 = vadd.f32 %v1075_v49, %v761_v28  ;;  %v739_v35 = vadd.f32 %v2487_v2, %v648_v1  ;;  %v1196_v57 = vpop.f32.mrf.mxu3  ;;  %v1369_v2 = vpop.f32.mrf.mxu1 }
 0x1f4   : > { %1480 = vst.msk [vmem:[#allocation2 + $0x8] sm:$0xff] %vm515_vm3, %v1468_v59  ;;  %v1425_v52 = vadd.f32 %v1413_v43, %v1087_v50  ;;  %v763_v8 = vmul.f32 %v2587_v63, %v739_v35  ;;  %v740_v43 = vadd.f32 %v2501_v20, %v651_v24  ;;  %v1297_v59 = vadd.f32 %v1296_v22, %v1193_v11 }
 0x1f5   : > { %v1300_v35 = vadd.f32 %v1299_v51, %v1196_v57  ;;  %v660_v57 = vadd.f32 %v2557_v29, %v2465_v21 }
 0x1f6   : > { %v1441_v37 = vmul.f32 %v2577_v27, %v1425_v52  ;;  %v1392_v40 = vadd.f32 %v1366_v23, %v1297_v59  ;;  %v764_v22 = vmul.f32 %v2602_v34, %v740_v43 }
 0x1f7   : > { %v1046_v47 = vpop.f32.mrf.mxu2  ;;  %v1393_v14 = vadd.f32 %v1369_v2, %v1300_v35  ;;  %v743_v59 = vadd.f32 %v2529_v62, %v660_v57 }
 0x1f8   : > { %v1457_v58 = vadd.f32 %v2584_v42, %v1441_v37  ;;  %v1076_v41 = vadd.f32 %v1046_v47, %v2478_v5  ;;  %v654_v37 = vadd.f32 %v2549_v48, %v2435_v39  ;;  %v1416_v61 = vmul.f32 %v2608_v56, %v1392_v40 }
 0x1f9   : > { %v1302_v1 = vpop.f32.mrf.mxu0 }
 0x1fa   : > { %v1469_v15 = vmax.f32 %v1457_v58, 0.0  ;;  %v1088_v31 = vadd.f32 %v1076_v41, %v762_v25  ;;  %v1199_v47 = vpop.f32.mrf.mxu3  ;;  %v741_v41 = vadd.f32 %v2509_v30, %v654_v37  ;;  %v663_v37 = vadd.f32 %v2559_v33, %v2474_v60 }
 0x1fc   : > { %1481 = vst.msk [vmem:[#allocation2 + $0x10] sm:$0xff] %vm515_vm3, %v1469_v15  ;;  %v1426_v54 = vadd.f32 %v1390_v4, %v1088_v31  ;;  %v1372_v4 = vpop.f32.mrf.mxu1  ;;  %v765_v15 = vmul.f32 %v2568_v3, %v741_v41 }
 0x1fe   : > { %v1442_v9 = vmul.f32 %v2577_v27, %v1426_v54 }
 0x1ff   : > { %v1049_v18 = vpop.f32.mrf.mxu2 }
 0x200   : > { %v1458_v5 = vadd.f32 %v2584_v42, %v1442_v9  ;;  %v1077_v36 = vadd.f32 %v1049_v18, %v2485_v17 }
 0x202   : > { %v1470_v19 = vmax.f32 %v1458_v5, 0.0  ;;  %v1089_v7 = vadd.f32 %v1077_v36, %v763_v8  ;;  %v1202_v18 = vpop.f32.mrf.mxu3  ;;  %v1305_v5 = vpop.f32.mrf.mxu0  ;;  %v1303_v8 = vadd.f32 %v1302_v1, %v1199_v47 }
 0x203   : > { %v1499_v28 = vld [vmem:[#allocation2 + $0x1] ss:$3 sm:$0xff]  ;;  %v1507_v49 = vld [vmem:[#allocation2 + $0x2] ss:$3 sm:$0xff]  ;;  %v1491_v17 = vld [vmem:[#allocation2] ss:$3 sm:$0xff] }
 0x204   : > { %v1514_v50 = vmax.f32 %v1499_v28, %v1507_v49  ;;  %1482 = vst.msk [vmem:[#allocation2 + $0x18] sm:$0xff] %vm515_vm3, %v1470_v19  ;;  %v1427_v26 = vadd.f32 %v1415_v10, %v1089_v7  ;;  %v1375_v10 = vpop.f32.mrf.mxu1  ;;  %v1394_v19 = vadd.f32 %v1372_v4, %v1303_v8  ;;  %v2730_v8 = vld [vmem:[#allocation3_spill] sm:$0xff] }
 0x206   : > { %v1518_v53 = vmax.f32 %v1491_v17, %v1514_v50  ;;  %v1443_v52 = vmul.f32 %v2577_v27, %v1427_v26  ;;  %v1306_v50 = vadd.f32 %v1305_v5, %v1202_v18 }
 0x207   : > { %v1052_v20 = vpop.f32.mrf.mxu2 }
 0x208   : > { %1522 = vst.msk [vmem:[%s2637_s29] sm:$0xff] %vm515_vm3, %v1518_v53  ;;  %v1459_v11 = vadd.f32 %v2584_v42, %v1443_v52  ;;  %v1078_v25 = vadd.f32 %v1052_v20, %v2495_v0  ;;  %v657_v0 = vadd.f32 %v2553_v55, %v2452_v44  ;;  %v1395_v53 = vadd.f32 %v1375_v10, %v1306_v50 }
 0x20a   : > { %v1471_v23 = vmax.f32 %v1459_v11, 0.0  ;;  %v1090_v58 = vadd.f32 %v1078_v25, %v764_v22  ;;  %v742_v24 = vadd.f32 %v2519_v45, %v657_v0  ;;  %v1418_v45 = vmul.f32 %v2591_v46, %v1394_v19  ;;  %v1205_v29 = vpop.f32.mrf.mxu3  ;;  %v1308_v40 = vpop.f32.mrf.mxu0 }
 0x20b   : > { %v767_v22 = vmul.f32 %v2602_v34, %v743_v59  ;;  %v1419_v47 = vmul.f32 %v2608_v56, %v1395_v53  ;;  %v2733_v59 = vld [vmem:[#allocation8_spill] sm:$0xff] }
 0x20c   : > { %1483 = vst.msk [vmem:[#allocation2 + $0x20] sm:$0xff] %vm515_vm3, %v1471_v23  ;;  %v1428_v39 = vadd.f32 %v1416_v61, %v1090_v58  ;;  %v766_v51 = vmul.f32 %v2587_v63, %v742_v24  ;;  %v1378_v20 = vpop.f32.mrf.mxu1  ;;  %v744_v23 = vadd.f32 %v2539_v16, %v663_v37  ;;  %v2734_v37 = vld [vmem:[#allocation6_spill] sm:$0xff] }
 0x20e   : > { %v1444_v48 = vmul.f32 %v2577_v27, %v1428_v39  ;;  %v768_v41 = vmul.f32 %v2568_v3, %v744_v23  ;;  %v2727_v39 = vld [vmem:[#allocation9_spill] sm:$0xff] }
 0x20f   : > { %v1055_v31 = vpop.f32.mrf.mxu2 }
 0x210   : > { %v1460_v6 = vadd.f32 %v2584_v42, %v1444_v48  ;;  %v1079_v54 = vadd.f32 %v1055_v31, %v2503_v12  ;;  %v666_v48 = vadd.f32 %v2727_v39, %v2483_v38  ;;  %v2728_v31 = vld [vmem:[#allocation4_spill] sm:$0xff] }
 0x212   : > { %v1472_v9 = vmax.f32 %v1460_v6, 0.0  ;;  %v1091_v30 = vadd.f32 %v1079_v54, %v765_v15  ;;  %v1208_v33 = vpop.f32.mrf.mxu3  ;;  %v1309_v15 = vadd.f32 %v1308_v40, %v1205_v29  ;;  %v1311_v35 = vpop.f32.mrf.mxu0 }
 0x213   : > { %v1312_v18 = vadd.f32 %v1311_v35, %v1208_v33 }
 0x214   : > { %1484 = vst.msk [vmem:[#allocation2 + $0x28] sm:$0xff] %vm515_vm3, %v1472_v9  ;;  %v1429_v36 = vadd.f32 %v1393_v14, %v1091_v30  ;;  %v1381_v6 = vpop.f32.mrf.mxu1  ;;  %v1396_v16 = vadd.f32 %v1378_v20, %v1309_v15  ;;  %v2729_v9 = vld [vmem:[#allocation7_spill] sm:$0xff] }
 0x215   : > { %v745_v30 = vadd.f32 %v2729_v9, %v666_v48  ;;  %v1397_v24 = vadd.f32 %v1381_v6, %v1312_v18 }
 0x216   : > { %v1445_v44 = vmul.f32 %v2577_v27, %v1429_v36  ;;  %v2731_v36 = vld [vmem:[#allocation10_spill] sm:$0xff] }
 0x217   : > { %v1058_v55 = vpop.f32.mrf.mxu2  ;;  %v669_v10 = vadd.f32 %v2731_v36, %v2730_v8 }
 0x218   : > { %v1461_v12 = vadd.f32 %v2584_v42, %v1445_v44  ;;  %v1080_v2 = vadd.f32 %v1058_v55, %v2511_v13  ;;  %v769_v44 = vmul.f32 %v2587_v63, %v745_v30  ;;  %v2732_v55 = vld [vmem:[#allocation5_spill] sm:$0xff] }
 0x219   : > { %v746_v50 = vadd.f32 %v2733_v59, %v669_v10 }
 0x21a   : > { %v1473_v7 = vmax.f32 %v1461_v12, 0.0  ;;  %v1092_v28 = vadd.f32 %v1080_v2, %v766_v51  ;;  %v1211_v12 = vpop.f32.mrf.mxu3  ;;  %v1421_v51 = vmul.f32 %v2591_v46, %v1397_v24 }
 0x21b   : > { %v1501_v49 = vld [vmem:[#allocation2 + $0x19] ss:$3 sm:$0xff]  ;;  %v1509_v43 = vld [vmem:[#allocation2 + $0x1a] ss:$3 sm:$0xff]  ;;  %v1493_v17 = vld [vmem:[#allocation2 + $0x18] ss:$3 sm:$0xff] }
 0x21c   : > { %v1515_v26 = vmax.f32 %v1501_v49, %v1509_v43  ;;  %1485 = vst.msk [vmem:[#allocation2 + $0x30] sm:$0xff] %vm515_vm3, %v1473_v7  ;;  %v1430_v21 = vadd.f32 %v1418_v45, %v1092_v28  ;;  %v1314_v7 = vpop.f32.mrf.mxu0  ;;  %v1384_v28 = vpop.f32.mrf.mxu1 }
 0x21e   : > { %v1519_v52 = vmax.f32 %v1493_v17, %v1515_v26  ;;  %v1446_v13 = vmul.f32 %v2577_v27, %v1430_v21  ;;  %v1315_v26 = vadd.f32 %v1314_v7, %v1211_v12 }
 0x21f   : > { %v1061_v11 = vpop.f32.mrf.mxu2 }
 0x220   : > { %1523 = vst.msk [vmem:[%s2637_s29 + $0x8] sm:$0xff] %vm515_vm3, %v1519_v52  ;;  %v1462_v62 = vadd.f32 %v2584_v42, %v1446_v13  ;;  %v1081_v25 = vadd.f32 %v1061_v11, %v2521_v32  ;;  %v1398_v17 = vadd.f32 %v1384_v28, %v1315_v26  ;;  %v770_v13 = vmul.f32 %v2602_v34, %v746_v50 }
 0x222   : > { %v1474_v1 = vmax.f32 %v1462_v62, 0.0  ;;  %v1093_v61 = vadd.f32 %v1081_v25, %v767_v22  ;;  %v1422_v11 = vmul.f32 %v2608_v56, %v1398_v17 }
 0x224   : > { %1486 = vst.msk [vmem:[#allocation2 + $0x38] sm:$0xff] %vm515_vm3, %v1474_v1  ;;  %v1431_v58 = vadd.f32 %v1419_v47, %v1093_v61 }
 0x226   : > { %v1447_v60 = vmul.f32 %v2577_v27, %v1431_v58 }
 0x227   : > { %v1064_v4 = vpop.f32.mrf.mxu2 }
 0x228   : > { %v1463_v32 = vadd.f32 %v2584_v42, %v1447_v60  ;;  %v1082_v0 = vadd.f32 %v1064_v4, %v2728_v31 }
 0x22a   : > { %v1475_v54 = vmax.f32 %v1463_v32, 0.0  ;;  %v1094_v14 = vadd.f32 %v1082_v0, %v768_v41 }
 0x22c   : > { %1487 = vst.msk [vmem:[#allocation2 + $0x40] sm:$0xff] %vm515_vm3, %v1475_v54  ;;  %v1432_v3 = vadd.f32 %v1396_v16, %v1094_v14 }
 0x22e   : > { %v1448_v5 = vmul.f32 %v2577_v27, %v1432_v3 }
 0x22f   : > { %v1067_v38 = vpop.f32.mrf.mxu2 }
 0x230   : > { %v1464_v19 = vadd.f32 %v2584_v42, %v1448_v5  ;;  %v1083_v57 = vadd.f32 %v1067_v38, %v2732_v55 }
 0x232   : > { %v1476_v2 = vmax.f32 %v1464_v19, 0.0  ;;  %v1095_v45 = vadd.f32 %v1083_v57, %v769_v44 }
 0x233   : > { %v1503_v49 = vld [vmem:[#allocation2 + $0x31] ss:$3 sm:$0xff]  ;;  %v1511_v43 = vld [vmem:[#allocation2 + $0x32] ss:$3 sm:$0xff]  ;;  %v1495_v63 = vld [vmem:[#allocation2 + $0x30] ss:$3 sm:$0xff] }
 0x234   : > { %v1516_v21 = vmax.f32 %v1503_v49, %v1511_v43  ;;  %1488 = vst.msk [vmem:[#allocation2 + $0x48] sm:$0xff] %vm515_vm3, %v1476_v2  ;;  %v1433_v29 = vadd.f32 %v1421_v51, %v1095_v45 }
 0x236   : > { %v1520_v40 = vmax.f32 %v1495_v63, %v1516_v21  ;;  %v1449_v53 = vmul.f32 %v2577_v27, %v1433_v29 }
 0x237   : > { %v1070_v46 = vpop.f32.mrf.mxu2 }
 0x238   : > { %1524 = vst.msk [vmem:[%s2637_s29 + $0x10] sm:$0xff] %vm515_vm3, %v1520_v40  ;;  %v1465_v52 = vadd.f32 %v2584_v42, %v1449_v53  ;;  %v1084_v20 = vadd.f32 %v1070_v46, %v2734_v37 }
 0x23a   : > { %v1477_v62 = vmax.f32 %v1465_v52, 0.0  ;;  %v1096_v22 = vadd.f32 %v1084_v20, %v770_v13 }
 0x23c   : > { %1489 = vst.msk [vmem:[#allocation2 + $0x50] sm:$0xff] %vm515_vm3, %v1477_v62  ;;  %v1434_v25 = vadd.f32 %v1422_v11, %v1096_v22 }
 0x23e   : > { %v1450_v47 = vmul.f32 %v2577_v27, %v1434_v25 }
 0x240   : > { %v1466_v1 = vadd.f32 %v2584_v42, %v1450_v47 }
 0x242   : > { %v1478_v61 = vmax.f32 %v1466_v1, 0.0 }
 0x244   : > { %1490 = vst.msk [vmem:[#allocation2 + $0x58] sm:$0xff] %vm515_vm3, %v1478_v61 }
 0x24b   : > { %v1505_v23 = vld [vmem:[#allocation2 + $0x49] ss:$3 sm:$0xff]  ;;  %v1513_v58 = vld [vmem:[#allocation2 + $0x4a] ss:$3 sm:$0xff]  ;;  %v1497_v60 = vld [vmem:[#allocation2 + $0x48] ss:$3 sm:$0xff] }
 0x24c   : > { %v1517_v34 = vmax.f32 %v1505_v23, %v1513_v58 }
 0x24e   : > { %v1521_v33 = vmax.f32 %v1497_v60, %v1517_v34 }
 0x250   : > { %1525 = vst.msk [vmem:[%s2637_s29 + $0x18] sm:$0xff] %vm515_vm3, %v1521_v33 }
 0x251 PF: > { %s17_s24 = sadd.s32 1, %s1789_s24  }
 0x252   : > { %p14_p4 = scmp.ge.s32.totalorder %s17_s24, 4  }
 0x254   :  { %16 = sbr.rel (!%p14_p4) target bundleno = 1 (0x1), region = 97 }

// kernel: onsets_and_frames_forward.3
= control target key start
LH: loop header
LB: loop body
LE: loop exit
PB: predicated region body
PF: predicated region fallthrough
CT: control target
= control target key end

     0   :  { %s3604_s21 = smov 0   ;;  %s5298_s0 = inlined_call_operand.vmem [shape: f32[8,384], index: 0, kind: input, shape index: {}]   ;;  %s5299_s1 = inlined_call_operand.vmem [shape: f32[2,384,1024], index: 1, kind: input, shape index: {}]   ;;  %s5300_s2 = inlined_call_operand.vmem [shape: f32[2,2,128,512], index: 2, kind: input, shape index: {}]   ;;  %s5301_s3 = inlined_call_operand.vmem [shape: f32[2,1,1024], index: 3, kind: input, shape index: {}]   ;;  %s5302_s4 = inlined_call_operand.vmem [shape: f32[2,256,128], index: 4, kind: input, shape index: {}]   ;;  %s5303_s5 = inlined_call_operand.vmem [shape: f32[2,1,128], index: 5, kind: input, shape index: {}]   ;;  %s5304_s6 = inlined_call_operand.vmem [shape: f32[2,4,2,128], index: 6, kind: output, shape index: {}]  }
   0x1 LB: > { %s3132_s22 = sadd.s32 4294967295, %s3566_s21   ;;  %p3136_p0 = scmp.ge.s32.totalorder %s3566_s21, 1  ;;  %s3566_s21 = sphi %s3604_s21, %s16_s21  }
   0x2   : > { %p249_p1 = scmp.lt.s32.totalorder %s3566_s21, 3 }
   0x4   : > { %p250_p2 = pnand %p3136_p0, %p249_p1 }
   0x6   : > { %253 = sbr.rel (%p250_p2) target bundleno = 1757 (0x6dd), region = 44 }
   0xb   : > { %p296_p3 = scmp.lt.s32.totalorder %s3132_s22, 1 }
   0xd   : > { %s5340_s22 = smov (!%p296_p3, %s3132_s22), 1 }
   0xe   : > { %s3415_s23 = smul.u32 3072, %s5340_s22  ;;  %s3140_s9 = sshll.u32 %s5340_s22, 3 }
   0xf   : > { %s309_s12 = scalar_lea.vmem %s5301_s3, %s3140_s9  ;;  %s3412_s13 = sshll.u32 %s5340_s22, 10 }
  0x10   : > { %s3618_s26 = scalar_lea.vmem %s5299_s1, %s3415_s23  ;;  %s4048_s16 = scalar_lea.vmem %s5300_s2, %s3412_s13 }
  0x11   : > { %v446_v0 = vld [vmem:[%s3618_s26 + $0x3c0] sm:$0xff]  ;;  %v447_v3 = vld [vmem:[%s3618_s26 + $0x3c8] sm:$0xff]  ;;  %s4393_s27 = scalar_lea.vmem %s5303_s5, %s5340_s22  ;;  %s3413_s28 = sshll.u32 %s5340_s22, 8 }
  0x12   : > { %v574_v1 = vld [vmem:[%s3618_s26 + $0x7c0] sm:$0xff]  ;;  %728 = vmatpush.msra.mxu0 %v446_v0  ;;  %788 = vmatpush.msra.mxu3 %v447_v3  ;;  %v439_v7 = vld [vmem:[%s3618_s26 + $0x388] sm:$0xff]  ;;  %v576_v3 = vld [vmem:[%s3618_s26 + $0x7d0] sm:$0xff]  ;;  %s4424_s7 = scalar_lea.vmem %s5302_s4, %s3413_s28  ;;  %s4581_s11 = scalar_lea.vmem %s5304_s6, %s3140_s9 }
  0x13   : > { %v702_v2 = vld [vmem:[%s3618_s26 + $0xbc0] sm:$0xff]  ;;  %748 = vmatpush.msra.mxu1 %v574_v1  ;;  %v431_v11 = vld [vmem:[%s3618_s26 + $0x348] sm:$0xff] }
  0x14   : > { %v438_v4 = vld [vmem:[%s3618_s26 + $0x380] sm:$0xff]  ;;  %768 = vmatpush.msra.mxu2 %v702_v2  ;;  %789 = vmatpush.msra.mxu3 %v439_v7  ;;  %v423_v15 = vld [vmem:[%s3618_s26 + $0x308] sm:$0xff]  ;;  %v448_v2 = vld [vmem:[%s3618_s26 + $0x3d0] sm:$0xff] }
  0x15   : > { %v566_v5 = vld [vmem:[%s3618_s26 + $0x780] sm:$0xff]  ;;  %729 = vmatpush.msra.mxu0 %v438_v4  ;;  %v415_v19 = vld [vmem:[%s3618_s26 + $0x2c8] sm:$0xff]  ;;  %v568_v7 = vld [vmem:[%s3618_s26 + $0x790] sm:$0xff] }
  0x16   : > { %v694_v6 = vld [vmem:[%s3618_s26 + $0xb80] sm:$0xff]  ;;  %749 = vmatpush.msra.mxu1 %v566_v5  ;;  %790 = vmatpush.msra.mxu3 %v431_v11  ;;  %v407_v23 = vld [vmem:[%s3618_s26 + $0x288] sm:$0xff]  ;;  %v560_v11 = vld [vmem:[%s3618_s26 + $0x750] sm:$0xff] }
  0x17   : > { %v430_v8 = vld [vmem:[%s3618_s26 + $0x340] sm:$0xff]  ;;  %769 = vmatpush.msra.mxu2 %v694_v6  ;;  %v399_v27 = vld [vmem:[%s3618_s26 + $0x248] sm:$0xff]  ;;  %v440_v6 = vld [vmem:[%s3618_s26 + $0x390] sm:$0xff] }
  0x18   : > { %v558_v9 = vld [vmem:[%s3618_s26 + $0x740] sm:$0xff]  ;;  %730 = vmatpush.msra.mxu0 %v430_v8  ;;  %791 = vmatpush.msra.mxu3 %v423_v15  ;;  %v391_v31 = vld [vmem:[%s3618_s26 + $0x208] sm:$0xff]  ;;  %v552_v15 = vld [vmem:[%s3618_s26 + $0x710] sm:$0xff] }
  0x19   : > { %v686_v10 = vld [vmem:[%s3618_s26 + $0xb40] sm:$0xff]  ;;  %750 = vmatpush.msra.mxu1 %v558_v9  ;;  %v383_v35 = vld [vmem:[%s3618_s26 + $0x1c8] sm:$0xff] }
  0x1a   : > { %v422_v12 = vld [vmem:[%s3618_s26 + $0x300] sm:$0xff]  ;;  %770 = vmatpush.msra.mxu2 %v686_v10  ;;  %792 = vmatpush.msra.mxu3 %v415_v19  ;;  %v375_v39 = vld [vmem:[%s3618_s26 + $0x188] sm:$0xff]  ;;  %v432_v10 = vld [vmem:[%s3618_s26 + $0x350] sm:$0xff] }
  0x1b   : > { %v550_v13 = vld [vmem:[%s3618_s26 + $0x700] sm:$0xff]  ;;  %731 = vmatpush.msra.mxu0 %v422_v12  ;;  %v367_v43 = vld [vmem:[%s3618_s26 + $0x148] sm:$0xff]  ;;  %v544_v19 = vld [vmem:[%s3618_s26 + $0x6d0] sm:$0xff] }
  0x1c   : > { %v678_v14 = vld [vmem:[%s3618_s26 + $0xb00] sm:$0xff]  ;;  %751 = vmatpush.msra.mxu1 %v550_v13  ;;  %793 = vmatpush.msra.mxu3 %v407_v23  ;;  %v359_v47 = vld [vmem:[%s3618_s26 + $0x108] sm:$0xff]  ;;  %v536_v23 = vld [vmem:[%s3618_s26 + $0x690] sm:$0xff] }
  0x1d   : > { %v414_v16 = vld [vmem:[%s3618_s26 + $0x2c0] sm:$0xff]  ;;  %771 = vmatpush.msra.mxu2 %v678_v14  ;;  %v351_v51 = vld [vmem:[%s3618_s26 + $0xc8] sm:$0xff]  ;;  %v424_v14 = vld [vmem:[%s3618_s26 + $0x310] sm:$0xff] }
  0x1e   : > { %v542_v17 = vld [vmem:[%s3618_s26 + $0x6c0] sm:$0xff]  ;;  %732 = vmatpush.msra.mxu0 %v414_v16  ;;  %794 = vmatpush.msra.mxu3 %v399_v27  ;;  %v343_v55 = vld [vmem:[%s3618_s26 + $0x88] sm:$0xff]  ;;  %v528_v27 = vld [vmem:[%s3618_s26 + $0x650] sm:$0xff] }
  0x1f   : > { %v670_v18 = vld [vmem:[%s3618_s26 + $0xac0] sm:$0xff]  ;;  %752 = vmatpush.msra.mxu1 %v542_v17  ;;  %v335_v59 = vld [vmem:[%s3618_s26 + $0x48] sm:$0xff] }
  0x20   : > { %v406_v20 = vld [vmem:[%s3618_s26 + $0x280] sm:$0xff]  ;;  %772 = vmatpush.msra.mxu2 %v670_v18  ;;  %795 = vmatpush.msra.mxu3 %v391_v31  ;;  %v327_v63 = vld [vmem:[%s3618_s26 + $0x8] sm:$0xff]  ;;  %v416_v18 = vld [vmem:[%s3618_s26 + $0x2d0] sm:$0xff] }
  0x21   : > { %v534_v21 = vld [vmem:[%s3618_s26 + $0x680] sm:$0xff]  ;;  %733 = vmatpush.msra.mxu0 %v406_v20  ;;  %v575_v0 = vld [vmem:[%s3618_s26 + $0x7c8] sm:$0xff]  ;;  %v520_v31 = vld [vmem:[%s3618_s26 + $0x610] sm:$0xff] }
  0x22   : > { %v662_v22 = vld [vmem:[%s3618_s26 + $0xa80] sm:$0xff]  ;;  %753 = vmatpush.msra.mxu1 %v534_v21  ;;  %796 = vmatpush.msra.mxu3 %v383_v35  ;;  %v703_v1 = vld [vmem:[%s3618_s26 + $0xbc8] sm:$0xff]  ;;  %v512_v35 = vld [vmem:[%s3618_s26 + $0x5d0] sm:$0xff] }
  0x23   : > { %v398_v24 = vld [vmem:[%s3618_s26 + $0x240] sm:$0xff]  ;;  %773 = vmatpush.msra.mxu2 %v662_v22  ;;  %v567_v4 = vld [vmem:[%s3618_s26 + $0x788] sm:$0xff]  ;;  %v408_v22 = vld [vmem:[%s3618_s26 + $0x290] sm:$0xff] }
  0x24   : > { %v526_v25 = vld [vmem:[%s3618_s26 + $0x640] sm:$0xff]  ;;  %734 = vmatpush.msra.mxu0 %v398_v24  ;;  %797 = vmatpush.msra.mxu3 %v375_v39  ;;  %v695_v5 = vld [vmem:[%s3618_s26 + $0xb88] sm:$0xff]  ;;  %v504_v39 = vld [vmem:[%s3618_s26 + $0x590] sm:$0xff] }
  0x25   : > { %v654_v26 = vld [vmem:[%s3618_s26 + $0xa40] sm:$0xff]  ;;  %754 = vmatpush.msra.mxu1 %v526_v25  ;;  %v559_v8 = vld [vmem:[%s3618_s26 + $0x748] sm:$0xff] }
  0x26   : > { %v390_v28 = vld [vmem:[%s3618_s26 + $0x200] sm:$0xff]  ;;  %774 = vmatpush.msra.mxu2 %v654_v26  ;;  %798 = vmatpush.msra.mxu3 %v367_v43  ;;  %v687_v9 = vld [vmem:[%s3618_s26 + $0xb48] sm:$0xff]  ;;  %v400_v26 = vld [vmem:[%s3618_s26 + $0x250] sm:$0xff] }
  0x27   : > { %v518_v29 = vld [vmem:[%s3618_s26 + $0x600] sm:$0xff]  ;;  %735 = vmatpush.msra.mxu0 %v390_v28  ;;  %v551_v12 = vld [vmem:[%s3618_s26 + $0x708] sm:$0xff]  ;;  %v496_v43 = vld [vmem:[%s3618_s26 + $0x550] sm:$0xff] }
  0x28   : > { %v646_v30 = vld [vmem:[%s3618_s26 + $0xa00] sm:$0xff]  ;;  %755 = vmatpush.msra.mxu1 %v518_v29  ;;  %799 = vmatpush.msra.mxu3 %v359_v47  ;;  %v679_v13 = vld [vmem:[%s3618_s26 + $0xb08] sm:$0xff]  ;;  %v488_v47 = vld [vmem:[%s3618_s26 + $0x510] sm:$0xff] }
  0x29   : > { %v382_v32 = vld [vmem:[%s3618_s26 + $0x1c0] sm:$0xff]  ;;  %775 = vmatpush.msra.mxu2 %v646_v30  ;;  %v543_v16 = vld [vmem:[%s3618_s26 + $0x6c8] sm:$0xff]  ;;  %v392_v30 = vld [vmem:[%s3618_s26 + $0x210] sm:$0xff] }
  0x2a   : > { %v510_v33 = vld [vmem:[%s3618_s26 + $0x5c0] sm:$0xff]  ;;  %736 = vmatpush.msra.mxu0 %v382_v32  ;;  %800 = vmatpush.msra.mxu3 %v351_v51  ;;  %v671_v17 = vld [vmem:[%s3618_s26 + $0xac8] sm:$0xff]  ;;  %v480_v51 = vld [vmem:[%s3618_s26 + $0x4d0] sm:$0xff] }
  0x2b   : > { %v638_v34 = vld [vmem:[%s3618_s26 + $0x9c0] sm:$0xff]  ;;  %756 = vmatpush.msra.mxu1 %v510_v33  ;;  %v535_v20 = vld [vmem:[%s3618_s26 + $0x688] sm:$0xff] }
  0x2c   : > { %v374_v36 = vld [vmem:[%s3618_s26 + $0x180] sm:$0xff]  ;;  %776 = vmatpush.msra.mxu2 %v638_v34  ;;  %801 = vmatpush.msra.mxu3 %v343_v55  ;;  %v663_v21 = vld [vmem:[%s3618_s26 + $0xa88] sm:$0xff]  ;;  %v384_v34 = vld [vmem:[%s3618_s26 + $0x1d0] sm:$0xff] }
  0x2d   : > { %v502_v37 = vld [vmem:[%s3618_s26 + $0x580] sm:$0xff]  ;;  %737 = vmatpush.msra.mxu0 %v374_v36  ;;  %v527_v24 = vld [vmem:[%s3618_s26 + $0x648] sm:$0xff]  ;;  %v472_v55 = vld [vmem:[%s3618_s26 + $0x490] sm:$0xff] }
  0x2e   : > { %v630_v38 = vld [vmem:[%s3618_s26 + $0x980] sm:$0xff]  ;;  %757 = vmatpush.msra.mxu1 %v502_v37  ;;  %802 = vmatpush.msra.mxu3 %v335_v59  ;;  %v655_v25 = vld [vmem:[%s3618_s26 + $0xa48] sm:$0xff]  ;;  %v336_v59 = vld [vmem:[%s3618_s26 + $0x50] sm:$0xff] }
  0x2f   : > { %v366_v40 = vld [vmem:[%s3618_s26 + $0x140] sm:$0xff]  ;;  %777 = vmatpush.msra.mxu2 %v630_v38  ;;  %v519_v28 = vld [vmem:[%s3618_s26 + $0x608] sm:$0xff]  ;;  %v376_v38 = vld [vmem:[%s3618_s26 + $0x190] sm:$0xff] }
  0x30   : > { %v494_v41 = vld [vmem:[%s3618_s26 + $0x540] sm:$0xff]  ;;  %738 = vmatpush.msra.mxu0 %v366_v40  ;;  %803 = vmatpush.msra.mxu3 %v327_v63  ;;  %v647_v29 = vld [vmem:[%s3618_s26 + $0xa08] sm:$0xff] }
  0x31   : > { %v622_v42 = vld [vmem:[%s3618_s26 + $0x940] sm:$0xff]  ;;  %758 = vmatpush.msra.mxu1 %v494_v41  ;;  %v511_v32 = vld [vmem:[%s3618_s26 + $0x5c8] sm:$0xff] }
  0x32   : > { %v358_v44 = vld [vmem:[%s3618_s26 + $0x100] sm:$0xff]  ;;  %778 = vmatpush.msra.mxu2 %v622_v42  ;;  %868 = vmatpush.msrb.mxu3 %v576_v3  ;;  %v639_v33 = vld [vmem:[%s3618_s26 + $0x9c8] sm:$0xff]  ;;  %v368_v42 = vld [vmem:[%s3618_s26 + $0x150] sm:$0xff] }
  0x33   : > { %v486_v45 = vld [vmem:[%s3618_s26 + $0x500] sm:$0xff]  ;;  %739 = vmatpush.msra.mxu0 %v358_v44  ;;  %v503_v36 = vld [vmem:[%s3618_s26 + $0x588] sm:$0xff]  ;;  %v704_v3 = vld [vmem:[%s3618_s26 + $0xbd0] sm:$0xff] }
  0x34   : > { %v614_v46 = vld [vmem:[%s3618_s26 + $0x900] sm:$0xff]  ;;  %759 = vmatpush.msra.mxu1 %v486_v45  ;;  %869 = vmatpush.msrb.mxu3 %v568_v7  ;;  %v631_v37 = vld [vmem:[%s3618_s26 + $0x988] sm:$0xff]  ;;  %v696_v7 = vld [vmem:[%s3618_s26 + $0xb90] sm:$0xff] }
  0x35   : > { %v350_v48 = vld [vmem:[%s3618_s26 + $0xc0] sm:$0xff]  ;;  %779 = vmatpush.msra.mxu2 %v614_v46  ;;  %v495_v40 = vld [vmem:[%s3618_s26 + $0x548] sm:$0xff]  ;;  %v360_v46 = vld [vmem:[%s3618_s26 + $0x110] sm:$0xff] }
  0x36   : > { %v478_v49 = vld [vmem:[%s3618_s26 + $0x4c0] sm:$0xff]  ;;  %740 = vmatpush.msra.mxu0 %v350_v48  ;;  %870 = vmatpush.msrb.mxu3 %v560_v11  ;;  %v623_v41 = vld [vmem:[%s3618_s26 + $0x948] sm:$0xff]  ;;  %v688_v11 = vld [vmem:[%s3618_s26 + $0xb50] sm:$0xff] }
  0x37   : > { %v606_v50 = vld [vmem:[%s3618_s26 + $0x8c0] sm:$0xff]  ;;  %760 = vmatpush.msra.mxu1 %v478_v49  ;;  %v487_v44 = vld [vmem:[%s3618_s26 + $0x508] sm:$0xff] }
  0x38   : > { %v342_v52 = vld [vmem:[%s3618_s26 + $0x80] sm:$0xff]  ;;  %780 = vmatpush.msra.mxu2 %v606_v50  ;;  %871 = vmatpush.msrb.mxu3 %v552_v15  ;;  %v615_v45 = vld [vmem:[%s3618_s26 + $0x908] sm:$0xff]  ;;  %v352_v50 = vld [vmem:[%s3618_s26 + $0xd0] sm:$0xff] }
  0x39   : > { %v470_v53 = vld [vmem:[%s3618_s26 + $0x480] sm:$0xff]  ;;  %741 = vmatpush.msra.mxu0 %v342_v52  ;;  %v479_v48 = vld [vmem:[%s3618_s26 + $0x4c8] sm:$0xff]  ;;  %v680_v15 = vld [vmem:[%s3618_s26 + $0xb10] sm:$0xff] }
  0x3a   : > { %v598_v54 = vld [vmem:[%s3618_s26 + $0x880] sm:$0xff]  ;;  %761 = vmatpush.msra.mxu1 %v470_v53  ;;  %872 = vmatpush.msrb.mxu3 %v544_v19  ;;  %v607_v49 = vld [vmem:[%s3618_s26 + $0x8c8] sm:$0xff]  ;;  %v672_v19 = vld [vmem:[%s3618_s26 + $0xad0] sm:$0xff] }
  0x3b   : > { %v334_v56 = vld [vmem:[%s3618_s26 + $0x40] sm:$0xff]  ;;  %781 = vmatpush.msra.mxu2 %v598_v54  ;;  %v471_v52 = vld [vmem:[%s3618_s26 + $0x488] sm:$0xff]  ;;  %v344_v54 = vld [vmem:[%s3618_s26 + $0x90] sm:$0xff] }
  0x3c   : > { %v462_v57 = vld [vmem:[%s3618_s26 + $0x440] sm:$0xff]  ;;  %742 = vmatpush.msra.mxu0 %v334_v56  ;;  %873 = vmatpush.msrb.mxu3 %v536_v23  ;;  %v599_v53 = vld [vmem:[%s3618_s26 + $0x888] sm:$0xff]  ;;  %v3743_v56 = vld [vmem:[%s5298_s0 + $0x10] sm:$0xff] }
  0x3d   : > { %v590_v58 = vld [vmem:[%s3618_s26 + $0x840] sm:$0xff]  ;;  %762 = vmatpush.msra.mxu1 %v462_v57  ;;  %v463_v57 = vld [vmem:[%s3618_s26 + $0x448] sm:$0xff]  ;;  %v664_v23 = vld [vmem:[%s3618_s26 + $0xa90] sm:$0xff] }
  0x3e   : > { %v326_v60 = vld [vmem:[%s3618_s26] sm:$0xff]  ;;  %782 = vmatpush.msra.mxu2 %v590_v58  ;;  %874 = vmatpush.msrb.mxu3 %v528_v27  ;;  %v591_v58 = vld [vmem:[%s3618_s26 + $0x848] sm:$0xff]  ;;  %v656_v27 = vld [vmem:[%s3618_s26 + $0xa50] sm:$0xff] }
  0x3f   : > { %v454_v61 = vld [vmem:[%s3618_s26 + $0x400] sm:$0xff]  ;;  %743 = vmatpush.msra.mxu0 %v326_v60  ;;  %v464_v60 = vld [vmem:[%s3618_s26 + $0x450] sm:$0xff]  ;;  %v583_v63 = vld [vmem:[%s3618_s26 + $0x808] sm:$0xff] }
  0x40   : > { %v582_v62 = vld [vmem:[%s3618_s26 + $0x800] sm:$0xff]  ;;  %763 = vmatpush.msra.mxu1 %v454_v61  ;;  %875 = vmatpush.msrb.mxu3 %v520_v31  ;;  %v393_v31 = vld [vmem:[%s3618_s26 + $0x218] sm:$0xff] }
  0x41   : > { %783 = vmatpush.msra.mxu2 %v582_v62  ;;  %808 = vmatpush.msrb.mxu0 %v575_v0  ;;  %v3752_v61 = vld [vmem:[%s5298_s0] sm:$0xff]  ;;  %v455_v62 = vld [vmem:[%s3618_s26 + $0x408] sm:$0xff]  ;;  %v328_v0 = vld [vmem:[%s3618_s26 + $0x10] sm:$0xff] }
  0x42   : > { %828 = vmatpush.msrb.mxu1 %v703_v1  ;;  %876 = vmatpush.msrb.mxu3 %v512_v35  ;;  %v456_v1 = vld [vmem:[%s3618_s26 + $0x410] sm:$0xff] }
  0x43   : > { %848 = vmatpush.msrb.mxu2 %v448_v2  ;;  %809 = vmatpush.msrb.mxu0 %v567_v4  ;;  %v3763_v2 = vld [vmem:[%s5298_s0 + $0x8] sm:$0xff]  ;;  %v449_v4 = vld [vmem:[%s3618_s26 + $0x3d8] sm:$0xff]  ;;  %v640_v35 = vld [vmem:[%s3618_s26 + $0x9d0] sm:$0xff] }
  0x44   : > { %829 = vmatpush.msrb.mxu1 %v695_v5  ;;  %877 = vmatpush.msrb.mxu3 %v504_v39  ;;  %v577_v5 = vld [vmem:[%s3618_s26 + $0x7d8] sm:$0xff]  ;;  %v632_v39 = vld [vmem:[%s3618_s26 + $0x990] sm:$0xff] }
  0x45   : > { %849 = vmatpush.msrb.mxu2 %v440_v6  ;;  %810 = vmatpush.msrb.mxu0 %v559_v8  ;;  %v705_v6 = vld [vmem:[%s3618_s26 + $0xbd8] sm:$0xff] }
  0x46   : > { %830 = vmatpush.msrb.mxu1 %v687_v9  ;;  %878 = vmatpush.msrb.mxu3 %v496_v43  ;;  %v441_v8 = vld [vmem:[%s3618_s26 + $0x398] sm:$0xff]  ;;  %v624_v43 = vld [vmem:[%s3618_s26 + $0x950] sm:$0xff] }
  0x47   : > { %850 = vmatpush.msrb.mxu2 %v432_v10  ;;  %811 = vmatpush.msrb.mxu0 %v551_v12  ;;  %v569_v9 = vld [vmem:[%s3618_s26 + $0x798] sm:$0xff] }
  0x48   : > { %831 = vmatpush.msrb.mxu1 %v679_v13  ;;  %879 = vmatpush.msrb.mxu3 %v488_v47  ;;  %v697_v10 = vld [vmem:[%s3618_s26 + $0xb98] sm:$0xff]  ;;  %v616_v47 = vld [vmem:[%s3618_s26 + $0x910] sm:$0xff] }
  0x49   : > { %851 = vmatpush.msrb.mxu2 %v424_v14  ;;  %812 = vmatpush.msrb.mxu0 %v543_v16  ;;  %v433_v12 = vld [vmem:[%s3618_s26 + $0x358] sm:$0xff] }
  0x4a   : > { %832 = vmatpush.msrb.mxu1 %v671_v17  ;;  %880 = vmatpush.msrb.mxu3 %v480_v51  ;;  %v561_v13 = vld [vmem:[%s3618_s26 + $0x758] sm:$0xff]  ;;  %v608_v51 = vld [vmem:[%s3618_s26 + $0x8d0] sm:$0xff] }
  0x4b   : > { %852 = vmatpush.msrb.mxu2 %v416_v18  ;;  %813 = vmatpush.msrb.mxu0 %v535_v20  ;;  %v689_v14 = vld [vmem:[%s3618_s26 + $0xb58] sm:$0xff] }
  0x4c   : > { %833 = vmatpush.msrb.mxu1 %v663_v21  ;;  %881 = vmatpush.msrb.mxu3 %v472_v55  ;;  %v425_v16 = vld [vmem:[%s3618_s26 + $0x318] sm:$0xff]  ;;  %v600_v55 = vld [vmem:[%s3618_s26 + $0x890] sm:$0xff] }
  0x4d   : > { %853 = vmatpush.msrb.mxu2 %v408_v22  ;;  %814 = vmatpush.msrb.mxu0 %v527_v24  ;;  %v553_v17 = vld [vmem:[%s3618_s26 + $0x718] sm:$0xff] }
  0x4e   : > { %834 = vmatpush.msrb.mxu1 %v655_v25  ;;  %784 = vmatmul.f32.vlgmr.msra.gmra.mxu2 %v3743_v56  ;;  %v681_v18 = vld [vmem:[%s3618_s26 + $0xb18] sm:$0xff] }
  0x4f   : > { %854 = vmatpush.msrb.mxu2 %v400_v26  ;;  %815 = vmatpush.msrb.mxu0 %v519_v28  ;;  %v417_v20 = vld [vmem:[%s3618_s26 + $0x2d8] sm:$0xff] }
  0x50   : > { %835 = vmatpush.msrb.mxu1 %v647_v29  ;;  %882 = vmatpush.msrb.mxu3 %v464_v60  ;;  %v545_v21 = vld [vmem:[%s3618_s26 + $0x6d8] sm:$0xff]  ;;  %v592_v60 = vld [vmem:[%s3618_s26 + $0x850] sm:$0xff] }
  0x51   : > { %855 = vmatpush.msrb.mxu2 %v392_v30  ;;  %816 = vmatpush.msrb.mxu0 %v511_v32  ;;  %v673_v22 = vld [vmem:[%s3618_s26 + $0xad8] sm:$0xff]  ;;  %v648_v32 = vld [vmem:[%s3618_s26 + $0xa10] sm:$0xff] }
  0x52   : > { %836 = vmatpush.msrb.mxu1 %v639_v33  ;;  %744 = vmatmul.f32.vlgmr.msra.gmra.mxu0 %v3752_v61  ;;  %v409_v24 = vld [vmem:[%s3618_s26 + $0x298] sm:$0xff] }
  0x53   : > { %856 = vmatpush.msrb.mxu2 %v384_v34  ;;  %817 = vmatpush.msrb.mxu0 %v503_v36  ;;  %v537_v25 = vld [vmem:[%s3618_s26 + $0x698] sm:$0xff] }
  0x54   : > { %837 = vmatpush.msrb.mxu1 %v631_v37  ;;  %883 = vmatpush.msrb.mxu3 %v456_v1  ;;  %v665_v26 = vld [vmem:[%s3618_s26 + $0xa98] sm:$0xff]  ;;  %v584_v1 = vld [vmem:[%s3618_s26 + $0x810] sm:$0xff] }
  0x55   : > { %857 = vmatpush.msrb.mxu2 %v376_v38  ;;  %818 = vmatpush.msrb.mxu0 %v495_v40  ;;  %v401_v28 = vld [vmem:[%s3618_s26 + $0x258] sm:$0xff] }
  0x56   : > { %838 = vmatpush.msrb.mxu1 %v623_v41  ;;  %804 = vmatmul.f32.vlgmr.msra.gmra.mxu3 %v3752_v61  ;;  %v529_v29 = vld [vmem:[%s3618_s26 + $0x658] sm:$0xff] }
  0x57   : > { %858 = vmatpush.msrb.mxu2 %v368_v42  ;;  %819 = vmatpush.msrb.mxu0 %v487_v44  ;;  %v657_v30 = vld [vmem:[%s3618_s26 + $0xa58] sm:$0xff] }
  0x58   : > { %839 = vmatpush.msrb.mxu1 %v615_v45  ;;  %948 = vmatpush.msra.mxu3 %v705_v6  ;;  %v521_v33 = vld [vmem:[%s3618_s26 + $0x618] sm:$0xff]  ;;  %v450_v6 = vld [vmem:[%s3618_s26 + $0x3e0] sm:$0xff] }
  0x59   : > { %859 = vmatpush.msrb.mxu2 %v360_v46  ;;  %820 = vmatpush.msrb.mxu0 %v479_v48  ;;  %v649_v34 = vld [vmem:[%s3618_s26 + $0xa18] sm:$0xff] }
  0x5a   : > { %840 = vmatpush.msrb.mxu1 %v607_v49  ;;  %949 = vmatpush.msra.mxu3 %v697_v10  ;;  %v385_v36 = vld [vmem:[%s3618_s26 + $0x1d8] sm:$0xff]  ;;  %v442_v10 = vld [vmem:[%s3618_s26 + $0x3a0] sm:$0xff] }
  0x5b   : > { %860 = vmatpush.msrb.mxu2 %v352_v50  ;;  %821 = vmatpush.msrb.mxu0 %v471_v52  ;;  %v513_v37 = vld [vmem:[%s3618_s26 + $0x5d8] sm:$0xff] }
  0x5c   : > { %841 = vmatpush.msrb.mxu1 %v599_v53  ;;  %950 = vmatpush.msra.mxu3 %v689_v14  ;;  %v641_v38 = vld [vmem:[%s3618_s26 + $0x9d8] sm:$0xff]  ;;  %v434_v14 = vld [vmem:[%s3618_s26 + $0x360] sm:$0xff] }
  0x5d   : > { %861 = vmatpush.msrb.mxu2 %v344_v54  ;;  %822 = vmatpush.msrb.mxu0 %v463_v57  ;;  %v377_v40 = vld [vmem:[%s3618_s26 + $0x198] sm:$0xff] }
  0x5e   : > { %842 = vmatpush.msrb.mxu1 %v591_v58  ;;  %951 = vmatpush.msra.mxu3 %v681_v18  ;;  %v505_v41 = vld [vmem:[%s3618_s26 + $0x598] sm:$0xff]  ;;  %v426_v18 = vld [vmem:[%s3618_s26 + $0x320] sm:$0xff] }
  0x5f   : > { %862 = vmatpush.msrb.mxu2 %v336_v59  ;;  %823 = vmatpush.msrb.mxu0 %v455_v62  ;;  %v633_v42 = vld [vmem:[%s3618_s26 + $0x998] sm:$0xff] }
  0x60   : > { %843 = vmatpush.msrb.mxu1 %v583_v63  ;;  %952 = vmatpush.msra.mxu3 %v673_v22  ;;  %v369_v44 = vld [vmem:[%s3618_s26 + $0x158] sm:$0xff]  ;;  %v418_v22 = vld [vmem:[%s3618_s26 + $0x2e0] sm:$0xff] }
  0x61   : > { %863 = vmatpush.msrb.mxu2 %v328_v0  ;;  %764 = vmatmul.f32.vlgmr.msra.gmra.mxu1 %v3763_v2  ;;  %v497_v45 = vld [vmem:[%s3618_s26 + $0x558] sm:$0xff] }
  0x62   : > { %888 = vmatpush.msra.mxu0 %v704_v3  ;;  %908 = vmatpush.msra.mxu1 %v449_v4  ;;  %v625_v46 = vld [vmem:[%s3618_s26 + $0x958] sm:$0xff] }
  0x63   : > { %928 = vmatpush.msra.mxu2 %v577_v5  ;;  %953 = vmatpush.msra.mxu3 %v665_v26  ;;  %v361_v48 = vld [vmem:[%s3618_s26 + $0x118] sm:$0xff]  ;;  %v410_v26 = vld [vmem:[%s3618_s26 + $0x2a0] sm:$0xff] }
  0x64   : > { %889 = vmatpush.msra.mxu0 %v696_v7  ;;  %909 = vmatpush.msra.mxu1 %v441_v8  ;;  %v489_v49 = vld [vmem:[%s3618_s26 + $0x518] sm:$0xff]  ;;  %v578_v7 = vld [vmem:[%s3618_s26 + $0x7e0] sm:$0xff] }
  0x65   : > { %929 = vmatpush.msra.mxu2 %v569_v9  ;;  %954 = vmatpush.msra.mxu3 %v657_v30  ;;  %v617_v50 = vld [vmem:[%s3618_s26 + $0x918] sm:$0xff]  ;;  %v706_v8 = vld [vmem:[%s3618_s26 + $0xbe0] sm:$0xff]  ;;  %v451_v9 = vld [vmem:[%s3618_s26 + $0x3e8] sm:$0xff] }
  0x66   : > { %890 = vmatpush.msra.mxu0 %v688_v11  ;;  %910 = vmatpush.msra.mxu1 %v433_v12  ;;  %v353_v52 = vld [vmem:[%s3618_s26 + $0xd8] sm:$0xff]  ;;  %v570_v11 = vld [vmem:[%s3618_s26 + $0x7a0] sm:$0xff] }
  0x67   : > { %930 = vmatpush.msra.mxu2 %v561_v13  ;;  %824 = vmatmul.f32.vlgmr.msrb.gmra.mxu0 %v3763_v2  ;;  %v481_v53 = vld [vmem:[%s3618_s26 + $0x4d8] sm:$0xff]  ;;  %v698_v12 = vld [vmem:[%s3618_s26 + $0xba0] sm:$0xff]  ;;  %v443_v13 = vld [vmem:[%s3618_s26 + $0x3a8] sm:$0xff] }
  0x68   : > { %891 = vmatpush.msra.mxu0 %v680_v15  ;;  %911 = vmatpush.msra.mxu1 %v425_v16  ;;  %v609_v54 = vld [vmem:[%s3618_s26 + $0x8d8] sm:$0xff]  ;;  %v562_v15 = vld [vmem:[%s3618_s26 + $0x760] sm:$0xff] }
  0x69   : > { %931 = vmatpush.msra.mxu2 %v553_v17  ;;  %955 = vmatpush.msra.mxu3 %v649_v34  ;;  %v345_v57 = vld [vmem:[%s3618_s26 + $0x98] sm:$0xff]  ;;  %v690_v16 = vld [vmem:[%s3618_s26 + $0xb60] sm:$0xff]  ;;  %v435_v17 = vld [vmem:[%s3618_s26 + $0x368] sm:$0xff] }
  0x6a   : > { %892 = vmatpush.msra.mxu0 %v672_v19  ;;  %912 = vmatpush.msra.mxu1 %v417_v20  ;;  %v473_v58 = vld [vmem:[%s3618_s26 + $0x498] sm:$0xff]  ;;  %v554_v19 = vld [vmem:[%s3618_s26 + $0x720] sm:$0xff] }
  0x6b   : > { %932 = vmatpush.msra.mxu2 %v545_v21  ;;  %844 = vmatmul.f32.vlgmr.msrb.gmra.mxu1 %v3743_v56  ;;  %v601_v59 = vld [vmem:[%s3618_s26 + $0x898] sm:$0xff]  ;;  %v682_v20 = vld [vmem:[%s3618_s26 + $0xb20] sm:$0xff]  ;;  %v427_v21 = vld [vmem:[%s3618_s26 + $0x328] sm:$0xff] }
  0x6c   : > { %893 = vmatpush.msra.mxu0 %v664_v23  ;;  %913 = vmatpush.msra.mxu1 %v409_v24  ;;  %v337_v62 = vld [vmem:[%s3618_s26 + $0x58] sm:$0xff]  ;;  %v546_v23 = vld [vmem:[%s3618_s26 + $0x6e0] sm:$0xff] }
  0x6d   : > { %933 = vmatpush.msra.mxu2 %v537_v25  ;;  %956 = vmatpush.msra.mxu3 %v641_v38  ;;  %v465_v63 = vld [vmem:[%s3618_s26 + $0x458] sm:$0xff]  ;;  %v674_v24 = vld [vmem:[%s3618_s26 + $0xae0] sm:$0xff]  ;;  %v419_v25 = vld [vmem:[%s3618_s26 + $0x2e8] sm:$0xff] }
  0x6e   : > { %894 = vmatpush.msra.mxu0 %v656_v27  ;;  %914 = vmatpush.msra.mxu1 %v401_v28  ;;  %v593_v0 = vld [vmem:[%s3618_s26 + $0x858] sm:$0xff]  ;;  %v538_v27 = vld [vmem:[%s3618_s26 + $0x6a0] sm:$0xff] }
  0x6f   : > { %934 = vmatpush.msra.mxu2 %v529_v29  ;;  %957 = vmatpush.msra.mxu3 %v633_v42  ;;  %v329_v3 = vld [vmem:[%s3618_s26 + $0x18] sm:$0xff]  ;;  %v666_v28 = vld [vmem:[%s3618_s26 + $0xaa0] sm:$0xff]  ;;  %v411_v29 = vld [vmem:[%s3618_s26 + $0x2a8] sm:$0xff] }
  0x70   : > { %915 = vmatpush.msra.mxu1 %v393_v31  ;;  %895 = vmatpush.msra.mxu0 %v648_v32  ;;  %v457_v4 = vld [vmem:[%s3618_s26 + $0x418] sm:$0xff]  ;;  %v402_v30 = vld [vmem:[%s3618_s26 + $0x260] sm:$0xff] }
  0x71   : > { %935 = vmatpush.msra.mxu2 %v521_v33  ;;  %958 = vmatpush.msra.mxu3 %v625_v46  ;;  %v585_v5 = vld [vmem:[%s3618_s26 + $0x818] sm:$0xff]  ;;  %v530_v31 = vld [vmem:[%s3618_s26 + $0x660] sm:$0xff]  ;;  %v403_v33 = vld [vmem:[%s3618_s26 + $0x268] sm:$0xff] }
  0x72   : > { %896 = vmatpush.msra.mxu0 %v640_v35  ;;  %916 = vmatpush.msra.mxu1 %v385_v36  ;;  %v658_v32 = vld [vmem:[%s3618_s26 + $0xa60] sm:$0xff] }
  0x73   : > { %936 = vmatpush.msra.mxu2 %v513_v37  ;;  %959 = vmatpush.msra.mxu3 %v617_v50  ;;  %v522_v34 = vld [vmem:[%s3618_s26 + $0x620] sm:$0xff]  ;;  %v395_v37 = vld [vmem:[%s3618_s26 + $0x228] sm:$0xff] }
  0x74   : > { %897 = vmatpush.msra.mxu0 %v632_v39  ;;  %917 = vmatpush.msra.mxu1 %v377_v40  ;;  %v394_v35 = vld [vmem:[%s3618_s26 + $0x220] sm:$0xff] }
  0x75   : > { %937 = vmatpush.msra.mxu2 %v505_v41  ;;  %960 = vmatpush.msra.mxu3 %v609_v54  ;;  %v650_v36 = vld [vmem:[%s3618_s26 + $0xa20] sm:$0xff]  ;;  %v387_v41 = vld [vmem:[%s3618_s26 + $0x1e8] sm:$0xff] }
  0x76   : > { %898 = vmatpush.msra.mxu0 %v624_v43  ;;  %918 = vmatpush.msra.mxu1 %v369_v44  ;;  %v514_v38 = vld [vmem:[%s3618_s26 + $0x5e0] sm:$0xff] }
  0x77   : > { %938 = vmatpush.msra.mxu2 %v497_v45  ;;  %961 = vmatpush.msra.mxu3 %v601_v59  ;;  %v386_v39 = vld [vmem:[%s3618_s26 + $0x1e0] sm:$0xff]  ;;  %v379_v45 = vld [vmem:[%s3618_s26 + $0x1a8] sm:$0xff] }
  0x78   : > { %899 = vmatpush.msra.mxu0 %v616_v47  ;;  %919 = vmatpush.msra.mxu1 %v361_v48  ;;  %v642_v40 = vld [vmem:[%s3618_s26 + $0x9e0] sm:$0xff] }
  0x79   : > { %939 = vmatpush.msra.mxu2 %v489_v49  ;;  %962 = vmatpush.msra.mxu3 %v593_v0  ;;  %v506_v42 = vld [vmem:[%s3618_s26 + $0x5a0] sm:$0xff]  ;;  %v371_v49 = vld [vmem:[%s3618_s26 + $0x168] sm:$0xff] }
  0x7a   : > { %900 = vmatpush.msra.mxu0 %v608_v51  ;;  %920 = vmatpush.msra.mxu1 %v353_v52  ;;  %v378_v43 = vld [vmem:[%s3618_s26 + $0x1a0] sm:$0xff] }
  0x7b   : > { %940 = vmatpush.msra.mxu2 %v481_v53  ;;  %963 = vmatpush.msra.mxu3 %v585_v5  ;;  %v634_v44 = vld [vmem:[%s3618_s26 + $0x9a0] sm:$0xff]  ;;  %v363_v53 = vld [vmem:[%s3618_s26 + $0x128] sm:$0xff] }
  0x7c   : > { %901 = vmatpush.msra.mxu0 %v600_v55  ;;  %921 = vmatpush.msra.mxu1 %v345_v57  ;;  %v498_v46 = vld [vmem:[%s3618_s26 + $0x560] sm:$0xff] }
  0x7d   : > { %941 = vmatpush.msra.mxu2 %v473_v58  ;;  %884 = vmatmul.f32.vlgmr.msrb.gmra.mxu3 %v3763_v2  ;;  %v370_v47 = vld [vmem:[%s3618_s26 + $0x160] sm:$0xff]  ;;  %v355_v58 = vld [vmem:[%s3618_s26 + $0xe8] sm:$0xff] }
  0x7e   : > { %902 = vmatpush.msra.mxu0 %v592_v60  ;;  %922 = vmatpush.msra.mxu1 %v337_v62  ;;  %v626_v48 = vld [vmem:[%s3618_s26 + $0x960] sm:$0xff] }
  0x7f   : > { %942 = vmatpush.msra.mxu2 %v465_v63  ;;  %1028 = vmatpush.msrb.mxu3 %v451_v9  ;;  %v490_v50 = vld [vmem:[%s3618_s26 + $0x520] sm:$0xff]  ;;  %v347_v63 = vld [vmem:[%s3618_s26 + $0xa8] sm:$0xff] }
  0x80   : > { %903 = vmatpush.msra.mxu0 %v584_v1  ;;  %923 = vmatpush.msra.mxu1 %v329_v3  ;;  %v362_v51 = vld [vmem:[%s3618_s26 + $0x120] sm:$0xff]  ;;  %v579_v9 = vld [vmem:[%s3618_s26 + $0x7e8] sm:$0xff] }
  0x81   : > { %943 = vmatpush.msra.mxu2 %v457_v4  ;;  %1029 = vmatpush.msrb.mxu3 %v443_v13  ;;  %v618_v52 = vld [vmem:[%s3618_s26 + $0x920] sm:$0xff]  ;;  %v339_v4 = vld [vmem:[%s3618_s26 + $0x68] sm:$0xff] }
  0x82   : > { %864 = vmatmul.f32.vlgmr.msrb.gmra.mxu2 %v3752_v61  ;;  %968 = vmatpush.msrb.mxu0 %v450_v6  ;;  %v482_v54 = vld [vmem:[%s3618_s26 + $0x4e0] sm:$0xff]  ;;  %v571_v13 = vld [vmem:[%s3618_s26 + $0x7a8] sm:$0xff] }
  0x83   : > { %988 = vmatpush.msrb.mxu1 %v578_v7  ;;  %1008 = vmatpush.msrb.mxu2 %v706_v8  ;;  %v354_v55 = vld [vmem:[%s3618_s26 + $0xe0] sm:$0xff]  ;;  %v331_v8 = vld [vmem:[%s3618_s26 + $0x28] sm:$0xff] }
  0x84   : > { %969 = vmatpush.msrb.mxu0 %v442_v10  ;;  %1030 = vmatpush.msrb.mxu3 %v435_v17  ;;  %v610_v57 = vld [vmem:[%s3618_s26 + $0x8e0] sm:$0xff]  ;;  %v707_v10 = vld [vmem:[%s3618_s26 + $0xbe8] sm:$0xff] }
  0x85   : > { %989 = vmatpush.msrb.mxu1 %v570_v11  ;;  %1009 = vmatpush.msrb.mxu2 %v698_v12  ;;  %v474_v59 = vld [vmem:[%s3618_s26 + $0x4a0] sm:$0xff]  ;;  %v452_v11 = vld [vmem:[%s3618_s26 + $0x3f0] sm:$0xff]  ;;  %v563_v17 = vld [vmem:[%s3618_s26 + $0x768] sm:$0xff] }
  0x86   : > { %970 = vmatpush.msrb.mxu0 %v434_v14  ;;  %1031 = vmatpush.msrb.mxu3 %v427_v21  ;;  %v346_v60 = vld [vmem:[%s3618_s26 + $0xa0] sm:$0xff]  ;;  %v580_v12 = vld [vmem:[%s3618_s26 + $0x7f0] sm:$0xff]  ;;  %v699_v14 = vld [vmem:[%s3618_s26 + $0xba8] sm:$0xff] }
  0x87   : > { %990 = vmatpush.msrb.mxu1 %v562_v15  ;;  %1010 = vmatpush.msrb.mxu2 %v690_v16  ;;  %v602_v62 = vld [vmem:[%s3618_s26 + $0x8a0] sm:$0xff]  ;;  %v444_v15 = vld [vmem:[%s3618_s26 + $0x3b0] sm:$0xff]  ;;  %v555_v21 = vld [vmem:[%s3618_s26 + $0x728] sm:$0xff] }
  0x88   : > { %971 = vmatpush.msrb.mxu0 %v426_v18  ;;  %1032 = vmatpush.msrb.mxu3 %v419_v25  ;;  %v338_v0 = vld [vmem:[%s3618_s26 + $0x60] sm:$0xff]  ;;  %v572_v16 = vld [vmem:[%s3618_s26 + $0x7b0] sm:$0xff]  ;;  %v691_v18 = vld [vmem:[%s3618_s26 + $0xb68] sm:$0xff] }
  0x89   : > { %991 = vmatpush.msrb.mxu1 %v554_v19  ;;  %1011 = vmatpush.msrb.mxu2 %v682_v20  ;;  %v466_v1 = vld [vmem:[%s3618_s26 + $0x460] sm:$0xff]  ;;  %v436_v19 = vld [vmem:[%s3618_s26 + $0x370] sm:$0xff]  ;;  %v547_v25 = vld [vmem:[%s3618_s26 + $0x6e8] sm:$0xff] }
  0x8a   : > { %972 = vmatpush.msrb.mxu0 %v418_v22  ;;  %1033 = vmatpush.msrb.mxu3 %v411_v29  ;;  %v594_v3 = vld [vmem:[%s3618_s26 + $0x860] sm:$0xff]  ;;  %v564_v20 = vld [vmem:[%s3618_s26 + $0x770] sm:$0xff]  ;;  %v683_v22 = vld [vmem:[%s3618_s26 + $0xb28] sm:$0xff] }
  0x8b   : > { %992 = vmatpush.msrb.mxu1 %v546_v23  ;;  %1012 = vmatpush.msrb.mxu2 %v674_v24  ;;  %v330_v5 = vld [vmem:[%s3618_s26 + $0x20] sm:$0xff]  ;;  %v428_v23 = vld [vmem:[%s3618_s26 + $0x330] sm:$0xff]  ;;  %v539_v29 = vld [vmem:[%s3618_s26 + $0x6a8] sm:$0xff] }
  0x8c   : > { %973 = vmatpush.msrb.mxu0 %v410_v26  ;;  %1034 = vmatpush.msrb.mxu3 %v403_v33  ;;  %v458_v6 = vld [vmem:[%s3618_s26 + $0x420] sm:$0xff]  ;;  %v556_v24 = vld [vmem:[%s3618_s26 + $0x730] sm:$0xff]  ;;  %v675_v26 = vld [vmem:[%s3618_s26 + $0xae8] sm:$0xff] }
  0x8d   : > { %993 = vmatpush.msrb.mxu1 %v538_v27  ;;  %1013 = vmatpush.msrb.mxu2 %v666_v28  ;;  %v586_v7 = vld [vmem:[%s3618_s26 + $0x820] sm:$0xff]  ;;  %v420_v27 = vld [vmem:[%s3618_s26 + $0x2f0] sm:$0xff]  ;;  %v531_v33 = vld [vmem:[%s3618_s26 + $0x668] sm:$0xff] }
  0x8e   : > { %974 = vmatpush.msrb.mxu0 %v402_v30  ;;  %1035 = vmatpush.msrb.mxu3 %v395_v37  ;;  %v548_v28 = vld [vmem:[%s3618_s26 + $0x6f0] sm:$0xff]  ;;  %v667_v30 = vld [vmem:[%s3618_s26 + $0xaa8] sm:$0xff] }
  0x8f   : > { %994 = vmatpush.msrb.mxu1 %v530_v31  ;;  %1014 = vmatpush.msrb.mxu2 %v658_v32  ;;  %v412_v31 = vld [vmem:[%s3618_s26 + $0x2b0] sm:$0xff]  ;;  %v523_v37 = vld [vmem:[%s3618_s26 + $0x628] sm:$0xff] }
  0x90   : > { %904 = vmatmul.f32.vlgmr.msra.gmra.mxu0 %v3743_v56  ;;  %1036 = vmatpush.msrb.mxu3 %v387_v41  ;;  %v540_v32 = vld [vmem:[%s3618_s26 + $0x6b0] sm:$0xff]  ;;  %v515_v41 = vld [vmem:[%s3618_s26 + $0x5e8] sm:$0xff] }
  0x91   : > { %995 = vmatpush.msrb.mxu1 %v522_v34  ;;  %975 = vmatpush.msrb.mxu0 %v394_v35  ;;  %v659_v34 = vld [vmem:[%s3618_s26 + $0xa68] sm:$0xff]  ;;  %v404_v35 = vld [vmem:[%s3618_s26 + $0x270] sm:$0xff] }
  0x92   : > { %1015 = vmatpush.msrb.mxu2 %v650_v36  ;;  %1037 = vmatpush.msrb.mxu3 %v379_v45  ;;  %v532_v36 = vld [vmem:[%s3618_s26 + $0x670] sm:$0xff]  ;;  %v507_v45 = vld [vmem:[%s3618_s26 + $0x5a8] sm:$0xff] }
  0x93   : > { %996 = vmatpush.msrb.mxu1 %v514_v38  ;;  %976 = vmatpush.msrb.mxu0 %v386_v39  ;;  %v651_v38 = vld [vmem:[%s3618_s26 + $0xa28] sm:$0xff]  ;;  %v396_v39 = vld [vmem:[%s3618_s26 + $0x230] sm:$0xff] }
  0x94   : > { %1016 = vmatpush.msrb.mxu2 %v642_v40  ;;  %1038 = vmatpush.msrb.mxu3 %v371_v49  ;;  %v524_v40 = vld [vmem:[%s3618_s26 + $0x630] sm:$0xff]  ;;  %v499_v49 = vld [vmem:[%s3618_s26 + $0x568] sm:$0xff] }
  0x95   : > { %997 = vmatpush.msrb.mxu1 %v506_v42  ;;  %977 = vmatpush.msrb.mxu0 %v378_v43  ;;  %v643_v42 = vld [vmem:[%s3618_s26 + $0x9e8] sm:$0xff]  ;;  %v388_v43 = vld [vmem:[%s3618_s26 + $0x1f0] sm:$0xff] }
  0x96   : > { %1017 = vmatpush.msrb.mxu2 %v634_v44  ;;  %1039 = vmatpush.msrb.mxu3 %v363_v53  ;;  %v516_v44 = vld [vmem:[%s3618_s26 + $0x5f0] sm:$0xff]  ;;  %v491_v53 = vld [vmem:[%s3618_s26 + $0x528] sm:$0xff] }
  0x97   : > { %998 = vmatpush.msrb.mxu1 %v498_v46  ;;  %978 = vmatpush.msrb.mxu0 %v370_v47  ;;  %v635_v46 = vld [vmem:[%s3618_s26 + $0x9a8] sm:$0xff]  ;;  %v380_v47 = vld [vmem:[%s3618_s26 + $0x1b0] sm:$0xff] }
  0x98   : > { %1018 = vmatpush.msrb.mxu2 %v626_v48  ;;  %1040 = vmatpush.msrb.mxu3 %v355_v58  ;;  %v508_v48 = vld [vmem:[%s3618_s26 + $0x5b0] sm:$0xff]  ;;  %v483_v58 = vld [vmem:[%s3618_s26 + $0x4e8] sm:$0xff] }
  0x99   : > { %999 = vmatpush.msrb.mxu1 %v490_v50  ;;  %979 = vmatpush.msrb.mxu0 %v362_v51  ;;  %v627_v50 = vld [vmem:[%s3618_s26 + $0x968] sm:$0xff]  ;;  %v372_v51 = vld [vmem:[%s3618_s26 + $0x170] sm:$0xff] }
  0x9a   : > { %1019 = vmatpush.msrb.mxu2 %v618_v52  ;;  %1041 = vmatpush.msrb.mxu3 %v347_v63  ;;  %v500_v52 = vld [vmem:[%s3618_s26 + $0x570] sm:$0xff]  ;;  %v475_v63 = vld [vmem:[%s3618_s26 + $0x4a8] sm:$0xff] }
  0x9b   : > { %1000 = vmatpush.msrb.mxu1 %v482_v54  ;;  %980 = vmatpush.msrb.mxu0 %v354_v55  ;;  %v619_v54 = vld [vmem:[%s3618_s26 + $0x928] sm:$0xff]  ;;  %v364_v55 = vld [vmem:[%s3618_s26 + $0x130] sm:$0xff] }
  0x9c   : > { %1020 = vmatpush.msrb.mxu2 %v610_v57  ;;  %1042 = vmatpush.msrb.mxu3 %v339_v4  ;;  %v492_v57 = vld [vmem:[%s3618_s26 + $0x530] sm:$0xff]  ;;  %v467_v4 = vld [vmem:[%s3618_s26 + $0x468] sm:$0xff] }
  0x9d   : > { %1001 = vmatpush.msrb.mxu1 %v474_v59  ;;  %981 = vmatpush.msrb.mxu0 %v346_v60  ;;  %v611_v59 = vld [vmem:[%s3618_s26 + $0x8e8] sm:$0xff]  ;;  %v356_v60 = vld [vmem:[%s3618_s26 + $0xf0] sm:$0xff] }
  0x9e   : > { %1021 = vmatpush.msrb.mxu2 %v602_v62  ;;  %964 = vmatmul.f32.vlgmr.msra.gmra.mxu3 %v3743_v56  ;;  %v484_v62 = vld [vmem:[%s3618_s26 + $0x4f0] sm:$0xff] }
  0x9f   : > { %944 = vmatmul.f32.vlgmr.msra.gmra.mxu2 %v3763_v2  ;;  %982 = vmatpush.msrb.mxu0 %v338_v0  ;;  %v603_v0 = vld [vmem:[%s3618_s26 + $0x8a8] sm:$0xff] }
  0xa0   : > { %1002 = vmatpush.msrb.mxu1 %v466_v1  ;;  %1022 = vmatpush.msrb.mxu2 %v594_v3  ;;  %v348_v1 = vld [vmem:[%s3618_s26 + $0xb0] sm:$0xff] }
  0xa1   : > { %983 = vmatpush.msrb.mxu0 %v330_v5  ;;  %1043 = vmatpush.msrb.mxu3 %v331_v8  ;;  %v476_v3 = vld [vmem:[%s3618_s26 + $0x4b0] sm:$0xff]  ;;  %v595_v5 = vld [vmem:[%s3618_s26 + $0x868] sm:$0xff] }
  0xa2   : > { %1003 = vmatpush.msrb.mxu1 %v458_v6  ;;  %1023 = vmatpush.msrb.mxu2 %v586_v7  ;;  %v340_v6 = vld [vmem:[%s3618_s26 + $0x70] sm:$0xff]  ;;  %v459_v8 = vld [vmem:[%s3618_s26 + $0x428] sm:$0xff] }
  0xa3   : > { %924 = vmatmul.f32.vlgmr.msra.gmra.mxu1 %v3752_v61  ;;  %1048 = vmatpush.msra.mxu0 %v579_v9  ;;  %v468_v7 = vld [vmem:[%s3618_s26 + $0x470] sm:$0xff]  ;;  %v587_v9 = vld [vmem:[%s3618_s26 + $0x828] sm:$0xff] }
  0xa4   : > { %1068 = vmatpush.msra.mxu1 %v707_v10  ;;  %1088 = vmatpush.msra.mxu2 %v452_v11  ;;  %v332_v10 = vld [vmem:[%s3618_s26 + $0x30] sm:$0xff] }
  0xa5   : > { %1108 = vmatpush.msra.mxu3 %v580_v12  ;;  %1049 = vmatpush.msra.mxu0 %v571_v13  ;;  %v460_v11 = vld [vmem:[%s3618_s26 + $0x430] sm:$0xff]  ;;  %v453_v13 = vld [vmem:[%s3618_s26 + $0x3f8] sm:$0xff] }
  0xa6   : > { %1069 = vmatpush.msra.mxu1 %v699_v14  ;;  %1089 = vmatpush.msra.mxu2 %v444_v15  ;;  %v708_v12 = vld [vmem:[%s3618_s26 + $0xbf0] sm:$0xff]  ;;  %v581_v14 = vld [vmem:[%s3618_s26 + $0x7f8] sm:$0xff] }
  0xa7   : > { %1109 = vmatpush.msra.mxu3 %v572_v16  ;;  %1050 = vmatpush.msra.mxu0 %v563_v17  ;;  %v709_v15 = vld [vmem:[%s3618_s26 + $0xbf8] sm:$0xff]  ;;  %v700_v16 = vld [vmem:[%s3618_s26 + $0xbb0] sm:$0xff] }
  0xa8   : > { %1070 = vmatpush.msra.mxu1 %v691_v18  ;;  %1090 = vmatpush.msra.mxu2 %v436_v19  ;;  %v445_v17 = vld [vmem:[%s3618_s26 + $0x3b8] sm:$0xff] }
  0xa9   : > { %1110 = vmatpush.msra.mxu3 %v564_v20  ;;  %1051 = vmatpush.msra.mxu0 %v555_v21  ;;  %v573_v18 = vld [vmem:[%s3618_s26 + $0x7b8] sm:$0xff]  ;;  %v692_v20 = vld [vmem:[%s3618_s26 + $0xb70] sm:$0xff] }
  0xaa   : > { %1071 = vmatpush.msra.mxu1 %v683_v22  ;;  %1091 = vmatpush.msra.mxu2 %v428_v23  ;;  %v701_v19 = vld [vmem:[%s3618_s26 + $0xbb8] sm:$0xff]  ;;  %v684_v23 = vld [vmem:[%s3618_s26 + $0xb30] sm:$0xff] }
  0xab   : > { %1111 = vmatpush.msra.mxu3 %v556_v24  ;;  %1052 = vmatpush.msra.mxu0 %v547_v25  ;;  %v437_v21 = vld [vmem:[%s3618_s26 + $0x378] sm:$0xff] }
  0xac   : > { %1072 = vmatpush.msra.mxu1 %v675_v26  ;;  %1092 = vmatpush.msra.mxu2 %v420_v27  ;;  %v565_v22 = vld [vmem:[%s3618_s26 + $0x778] sm:$0xff]  ;;  %v676_v27 = vld [vmem:[%s3618_s26 + $0xaf0] sm:$0xff] }
  0xad   : > { %1112 = vmatpush.msra.mxu3 %v548_v28  ;;  %1053 = vmatpush.msra.mxu0 %v539_v29  ;;  %v429_v24 = vld [vmem:[%s3618_s26 + $0x338] sm:$0xff] }
  0xae   : > { %1073 = vmatpush.msra.mxu1 %v667_v30  ;;  %1093 = vmatpush.msra.mxu2 %v412_v31  ;;  %v557_v25 = vld [vmem:[%s3618_s26 + $0x738] sm:$0xff]  ;;  %v668_v31 = vld [vmem:[%s3618_s26 + $0xab0] sm:$0xff] }
  0xaf   : > { %1113 = vmatpush.msra.mxu3 %v540_v32  ;;  %1054 = vmatpush.msra.mxu0 %v531_v33  ;;  %v685_v26 = vld [vmem:[%s3618_s26 + $0xb38] sm:$0xff] }
  0xb0   : > { %1074 = vmatpush.msra.mxu1 %v659_v34  ;;  %1094 = vmatpush.msra.mxu2 %v404_v35  ;;  %v421_v28 = vld [vmem:[%s3618_s26 + $0x2f8] sm:$0xff]  ;;  %v660_v35 = vld [vmem:[%s3618_s26 + $0xa70] sm:$0xff] }
  0xb1   : > { %1114 = vmatpush.msra.mxu3 %v532_v36  ;;  %1055 = vmatpush.msra.mxu0 %v523_v37  ;;  %v549_v29 = vld [vmem:[%s3618_s26 + $0x6f8] sm:$0xff] }
  0xb2   : > { %1075 = vmatpush.msra.mxu1 %v651_v38  ;;  %1095 = vmatpush.msra.mxu2 %v396_v39  ;;  %v677_v30 = vld [vmem:[%s3618_s26 + $0xaf8] sm:$0xff] }
  0xb3   : > { %1115 = vmatpush.msra.mxu3 %v524_v40  ;;  %1056 = vmatpush.msra.mxu0 %v515_v41  ;;  %v413_v32 = vld [vmem:[%s3618_s26 + $0x2b8] sm:$0xff]  ;;  %v652_v40 = vld [vmem:[%s3618_s26 + $0xa30] sm:$0xff] }
  0xb4   : > { %1076 = vmatpush.msra.mxu1 %v643_v42  ;;  %1096 = vmatpush.msra.mxu2 %v388_v43  ;;  %v541_v33 = vld [vmem:[%s3618_s26 + $0x6b8] sm:$0xff]  ;;  %v4009_v43 = vld [vmem:[%s309_s12] sm:$0xff] }
  0xb5   : > { %1116 = vmatpush.msra.mxu3 %v516_v44  ;;  %1057 = vmatpush.msra.mxu0 %v507_v45  ;;  %v669_v34 = vld [vmem:[%s3618_s26 + $0xab8] sm:$0xff]  ;;  %v644_v44 = vld [vmem:[%s3618_s26 + $0x9f0] sm:$0xff] }
  0xb6   : > { %1077 = vmatpush.msra.mxu1 %v635_v46  ;;  %1097 = vmatpush.msra.mxu2 %v380_v47  ;;  %v405_v36 = vld [vmem:[%s3618_s26 + $0x278] sm:$0xff] }
  0xb7   : > { %1117 = vmatpush.msra.mxu3 %v508_v48  ;;  %1058 = vmatpush.msra.mxu0 %v499_v49  ;;  %v533_v37 = vld [vmem:[%s3618_s26 + $0x678] sm:$0xff]  ;;  %v636_v48 = vld [vmem:[%s3618_s26 + $0x9b0] sm:$0xff] }
  0xb8   : > { %1078 = vmatpush.msra.mxu1 %v627_v50  ;;  %1098 = vmatpush.msra.mxu2 %v372_v51  ;;  %v661_v38 = vld [vmem:[%s3618_s26 + $0xa78] sm:$0xff]  ;;  %v712_v50 = vperm.slane %v4009_v43, 0 }
  0xb9   : > { %1118 = vmatpush.msra.mxu3 %v500_v52  ;;  %1059 = vmatpush.msra.mxu0 %v491_v53  ;;  %v397_v39 = vld [vmem:[%s3618_s26 + $0x238] sm:$0xff]  ;;  %v628_v52 = vld [vmem:[%s3618_s26 + $0x970] sm:$0xff] }
  0xba   : > { %1079 = vmatpush.msra.mxu1 %v619_v54  ;;  %1099 = vmatpush.msra.mxu2 %v364_v55  ;;  %v525_v41 = vld [vmem:[%s3618_s26 + $0x638] sm:$0xff] }
  0xbb   : > { %1119 = vmatpush.msra.mxu3 %v492_v57  ;;  %1060 = vmatpush.msra.mxu0 %v483_v58  ;;  %v653_v42 = vld [vmem:[%s3618_s26 + $0xa38] sm:$0xff]  ;;  %v620_v57 = vld [vmem:[%s3618_s26 + $0x930] sm:$0xff] }
  0xbc   : > { %1080 = vmatpush.msra.mxu1 %v611_v59  ;;  %1100 = vmatpush.msra.mxu2 %v356_v60  ;;  %v389_v45 = vld [vmem:[%s3618_s26 + $0x1f8] sm:$0xff] }
  0xbd   : > { %1120 = vmatpush.msra.mxu3 %v484_v62  ;;  %1061 = vmatpush.msra.mxu0 %v475_v63  ;;  %v517_v46 = vld [vmem:[%s3618_s26 + $0x5f8] sm:$0xff]  ;;  %v612_v63 = vld [vmem:[%s3618_s26 + $0x8f0] sm:$0xff] }
  0xbe   : > { %1081 = vmatpush.msra.mxu1 %v603_v0  ;;  %1101 = vmatpush.msra.mxu2 %v348_v1  ;;  %v645_v47 = vld [vmem:[%s3618_s26 + $0x9f8] sm:$0xff] }
  0xbf   : > { %1121 = vmatpush.msra.mxu3 %v476_v3  ;;  %1024 = vmatmul.f32.vlgmr.msrb.gmra.mxu2 %v3743_v56  ;;  %v381_v49 = vld [vmem:[%s3618_s26 + $0x1b8] sm:$0xff] }
  0xc0   : > { %1062 = vmatpush.msra.mxu0 %v467_v4  ;;  %1082 = vmatpush.msra.mxu1 %v595_v5  ;;  %v637_v51 = vld [vmem:[%s3618_s26 + $0x9b8] sm:$0xff] }
  0xc1   : > { %1102 = vmatpush.msra.mxu2 %v340_v6  ;;  %1122 = vmatpush.msra.mxu3 %v468_v7  ;;  %v373_v53 = vld [vmem:[%s3618_s26 + $0x178] sm:$0xff]  ;;  %v604_v7 = vld [vmem:[%s3618_s26 + $0x8b0] sm:$0xff] }
  0xc2   : > { %984 = vmatmul.f32.vlgmr.msrb.gmra.mxu0 %v3752_v61  ;;  %1083 = vmatpush.msra.mxu1 %v587_v9  ;;  %v629_v54 = vld [vmem:[%s3618_s26 + $0x978] sm:$0xff] }
  0xc3   : > { %1063 = vmatpush.msra.mxu0 %v459_v8  ;;  %1103 = vmatpush.msra.mxu2 %v332_v10  ;;  %v365_v58 = vld [vmem:[%s3618_s26 + $0x138] sm:$0xff] }
  0xc4   : > { %1123 = vmatpush.msra.mxu3 %v460_v11  ;;  %1004 = vmatmul.f32.vlgmr.msrb.gmra.mxu1 %v3763_v2  ;;  %v493_v60 = vld [vmem:[%s3618_s26 + $0x538] sm:$0xff] }
  0xc5   : > { %1044 = vmatmul.f32.vlgmr.msrb.gmra.mxu3 %v3752_v61  ;;  %1128 = vmatpush.msrb.mxu0 %v708_v12  ;;  %v693_v61 = vld [vmem:[%s3618_s26 + $0xb78] sm:$0xff]  ;;  %v596_v12 = vld [vmem:[%s3618_s26 + $0x870] sm:$0xff] }
  0xc6   : > { %1148 = vmatpush.msrb.mxu1 %v453_v13  ;;  %1168 = vmatpush.msrb.mxu2 %v581_v14  ;;  %v621_v62 = vld [vmem:[%s3618_s26 + $0x938] sm:$0xff] }
  0xc7   : > { %1188 = vmatpush.msrb.mxu3 %v709_v15  ;;  %1129 = vmatpush.msrb.mxu0 %v700_v16  ;;  %v357_v0 = vld [vmem:[%s3618_s26 + $0xf8] sm:$0xff]  ;;  %v588_v16 = vld [vmem:[%s3618_s26 + $0x830] sm:$0xff] }
  0xc8   : > { %1149 = vmatpush.msrb.mxu1 %v445_v17  ;;  %1169 = vmatpush.msrb.mxu2 %v573_v18  ;;  %v485_v3 = vld [vmem:[%s3618_s26 + $0x4f8] sm:$0xff] }
  0xc9   : > { %1189 = vmatpush.msrb.mxu3 %v701_v19  ;;  %1130 = vmatpush.msrb.mxu0 %v692_v20  ;;  %v613_v4 = vld [vmem:[%s3618_s26 + $0x8f8] sm:$0xff]  ;;  %v713_v20 = vperm.slane %v4009_v43, 1 }
  0xca   : > { %1150 = vmatpush.msrb.mxu1 %v437_v21  ;;  %1170 = vmatpush.msrb.mxu2 %v565_v22  ;;  %v349_v8 = vld [vmem:[%s3618_s26 + $0xb8] sm:$0xff]  ;;  %v4054_v21 = vld [vmem:[%s4048_s16 + $0x1e0] sm:$0xff]  ;;  %v4057_v22 = vld [vmem:[%s4048_s16 + $0x1e8] sm:$0xff] }
  0xcb   : > { %1190 = vmatpush.msrb.mxu3 %v693_v61  ;;  %1131 = vmatpush.msrb.mxu0 %v684_v23  ;;  %v477_v9 = vld [vmem:[%s3618_s26 + $0x4b8] sm:$0xff]  ;;  %v4060_v23 = vld [vmem:[%s4048_s16 + $0x1f0] sm:$0xff] }
  0xcc   : > { %1151 = vmatpush.msrb.mxu1 %v429_v24  ;;  %1171 = vmatpush.msrb.mxu2 %v557_v25  ;;  %v605_v10 = vld [vmem:[%s3618_s26 + $0x8b8] sm:$0xff]  ;;  %v4068_v25 = vld [vmem:[%s5298_s0] sm:$0xff] }
  0xcd   : > { %1191 = vmatpush.msrb.mxu3 %v685_v26  ;;  %1132 = vmatpush.msrb.mxu0 %v676_v27  ;;  %v341_v13 = vld [vmem:[%s3618_s26 + $0x78] sm:$0xff]  ;;  %v4074_v26 = vld [vmem:[%s5298_s0 + $0x8] sm:$0xff]  ;;  %v4078_v27 = vld [vmem:[%s4048_s16 + $0x1c0] sm:$0xff] }
  0xce   : > { %1152 = vmatpush.msrb.mxu1 %v421_v28  ;;  %1172 = vmatpush.msrb.mxu2 %v549_v29  ;;  %v469_v14 = vld [vmem:[%s3618_s26 + $0x478] sm:$0xff]  ;;  %v4081_v28 = vld [vmem:[%s4048_s16 + $0x1c8] sm:$0xff]  ;;  %v4086_v29 = vld [vmem:[%s4048_s16 + $0x1d0] sm:$0xff] }
  0xcf   : > { %1192 = vmatpush.msrb.mxu3 %v677_v30  ;;  %1133 = vmatpush.msrb.mxu0 %v668_v31  ;;  %v745_v55 = vpop.f32.mrf.mxu0  ;;  %v597_v15 = vld [vmem:[%s3618_s26 + $0x878] sm:$0xff] }
  0xd0   : > { %1153 = vmatpush.msrb.mxu1 %v413_v32  ;;  %1173 = vmatpush.msrb.mxu2 %v541_v33  ;;  %v746_v59 = vadd.f32 %v745_v55, %v712_v50  ;;  %v333_v17 = vld [vmem:[%s3618_s26 + $0x38] sm:$0xff]  ;;  %v4094_v32 = vld [vmem:[%s4048_s16 + $0x1a0] sm:$0xff]  ;;  %v4097_v33 = vld [vmem:[%s4048_s16 + $0x1a8] sm:$0xff] }
  0xd1   : > { %1193 = vmatpush.msrb.mxu3 %v669_v34  ;;  %1134 = vmatpush.msrb.mxu0 %v660_v35  ;;  %v785_v6 = vpop.f32.mrf.mxu2  ;;  %v461_v18 = vld [vmem:[%s3618_s26 + $0x438] sm:$0xff]  ;;  %v4102_v34 = vld [vmem:[%s4048_s16 + $0x1b0] sm:$0xff]  ;;  %v4145_v50 = vld [vmem:[%s4048_s16 + $0x148] sm:$0xff] }
  0xd2   : > { %1154 = vmatpush.msrb.mxu1 %v405_v36  ;;  %1174 = vmatpush.msrb.mxu2 %v533_v37  ;;  %v589_v19 = vld [vmem:[%s3618_s26 + $0x838] sm:$0xff]  ;;  %v4110_v36 = vld [vmem:[%s4048_s16 + $0x180] sm:$0xff]  ;;  %v4113_v37 = vld [vmem:[%s4048_s16 + $0x188] sm:$0xff] }
  0xd3   : > { %1194 = vmatpush.msrb.mxu3 %v661_v38  ;;  %1064 = vmatmul.f32.vlgmr.msra.gmra.mxu0 %v3763_v2  ;;  %v509_v2 = vld [vmem:[%s3618_s26 + $0x5b8] sm:$0xff]  ;;  %v4174_v55 = vld [vmem:[%s4048_s16 + $0x108] sm:$0xff] }
  0xd4   : > { %1155 = vmatpush.msrb.mxu1 %v397_v39  ;;  %1135 = vmatpush.msrb.mxu0 %v652_v40  ;;  %v4063_v24 = vld [vmem:[%s4048_s16 + $0x1f8] sm:$0xff]  ;;  %v4118_v39 = vld [vmem:[%s4048_s16 + $0x190] sm:$0xff] }
  0xd5   : > { %1175 = vmatpush.msrb.mxu2 %v525_v41  ;;  %1195 = vmatpush.msrb.mxu3 %v653_v42  ;;  %v4089_v30 = vld [vmem:[%s4048_s16 + $0x1d8] sm:$0xff]  ;;  %v4126_v42 = vld [vmem:[%s4048_s16 + $0x160] sm:$0xff] }
  0xd6   : > { %1084 = vmatmul.f32.vlgmr.msra.gmra.mxu1 %v3743_v56  ;;  %1136 = vmatpush.msrb.mxu0 %v644_v44  ;;  %v501_v56 = vld [vmem:[%s3618_s26 + $0x578] sm:$0xff]  ;;  %v4129_v44 = vld [vmem:[%s4048_s16 + $0x168] sm:$0xff] }
  0xd7   : > { %1156 = vmatpush.msrb.mxu1 %v389_v45  ;;  %1176 = vmatpush.msrb.mxu2 %v517_v46  ;;  %v4105_v35 = vld [vmem:[%s4048_s16 + $0x1b8] sm:$0xff]  ;;  %v4134_v46 = vld [vmem:[%s4048_s16 + $0x170] sm:$0xff] }
  0xd8   : > { %1196 = vmatpush.msrb.mxu3 %v645_v47  ;;  %1137 = vmatpush.msrb.mxu0 %v636_v48  ;;  %v4121_v40 = vld [vmem:[%s4048_s16 + $0x198] sm:$0xff] }
  0xd9   : > { %1157 = vmatpush.msrb.mxu1 %v381_v49  ;;  %1177 = vmatpush.msrb.mxu2 %v509_v2  ;;  %v805_v61 = vpop.f32.mrf.mxu3  ;;  %v4137_v47 = vld [vmem:[%s4048_s16 + $0x178] sm:$0xff]  ;;  %v4142_v49 = vld [vmem:[%s4048_s16 + $0x140] sm:$0xff]  ;;  %v4150_v2 = vld [vmem:[%s4048_s16 + $0x150] sm:$0xff] }
  0xda   : > { %1197 = vmatpush.msrb.mxu3 %v637_v51  ;;  %1138 = vmatpush.msrb.mxu0 %v628_v52  ;;  %v806_v31 = vadd.f32 %v805_v61, %v713_v20  ;;  %v4153_v51 = vld [vmem:[%s4048_s16 + $0x158] sm:$0xff]  ;;  %v4158_v52 = vld [vmem:[%s4048_s16 + $0x120] sm:$0xff]  ;;  %v4278_v20 = vld [vmem:[%s4048_s16 + $0x48] sm:$0xff] }
  0xdb   : > { %1158 = vmatpush.msrb.mxu1 %v373_v53  ;;  %1178 = vmatpush.msrb.mxu2 %v501_v56  ;;  %v4161_v53 = vld [vmem:[%s4048_s16 + $0x128] sm:$0xff]  ;;  %v4166_v56 = vld [vmem:[%s4048_s16 + $0x130] sm:$0xff] }
  0xdc   : > { %1198 = vmatpush.msrb.mxu3 %v629_v54  ;;  %1139 = vmatpush.msrb.mxu0 %v620_v57  ;;  %v4169_v54 = vld [vmem:[%s4048_s16 + $0x138] sm:$0xff]  ;;  %v4179_v57 = vld [vmem:[%s4048_s16 + $0x100] sm:$0xff]  ;;  %v4283_v61 = vld [vmem:[%s4048_s16 + $0x50] sm:$0xff] }
  0xdd   : > { %1159 = vmatpush.msrb.mxu1 %v365_v58  ;;  %1179 = vmatpush.msrb.mxu2 %v493_v60  ;;  %v4182_v58 = vld [vmem:[%s4048_s16 + $0x110] sm:$0xff]  ;;  %v4190_v60 = vld [vmem:[%s4048_s16 + $0xe8] sm:$0xff] }
  0xde   : > { %v765_v1 = vpop.f32.mrf.mxu1  ;;  %1199 = vmatpush.msrb.mxu3 %v621_v62  ;;  %1140 = vmatpush.msrb.mxu0 %v612_v63  ;;  %v3559_v62 = vld [vmem:[%s5298_s0 + $0x10] sm:$0xff]  ;;  %v4197_v63 = vld [vmem:[%s4048_s16 + $0xe0] sm:$0xff] }
  0xdf   : > { %v766_v5 = vadd.f32 %v765_v1, %v746_v59  ;;  %1160 = vmatpush.msrb.mxu1 %v357_v0  ;;  %1180 = vmatpush.msrb.mxu2 %v485_v3  ;;  %v4187_v59 = vld [vmem:[%s4048_s16 + $0x118] sm:$0xff]  ;;  %v4200_v0 = vld [vmem:[%s4048_s16 + $0xf0] sm:$0xff]  ;;  %v4208_v3 = vld [vmem:[%s4048_s16 + $0xc8] sm:$0xff] }
  0xe0   : > { %1200 = vmatpush.msrb.mxu3 %v613_v4  ;;  %1141 = vmatpush.msrb.mxu0 %v604_v7  ;;  %5322 = vst [vmem:[#allocation3_spill] sm:$0xff] %v4187_v59  ;;  %v4205_v1 = vld [vmem:[%s4048_s16 + $0xf8] sm:$0xff]  ;;  %v4213_v4 = vld [vmem:[%s4048_s16 + $0xc0] sm:$0xff] }
  0xe1   : > { %v786_v11 = vadd.f32 %v785_v6, %v766_v5  ;;  %1161 = vmatpush.msrb.mxu1 %v349_v8  ;;  %1181 = vmatpush.msrb.mxu2 %v477_v9  ;;  %5323 = vst [vmem:[#allocation4_spill] sm:$0xff] %v4205_v1  ;;  %v4216_v5 = vld [vmem:[%s4048_s16 + $0xd0] sm:$0xff]  ;;  %v4221_v6 = vld [vmem:[%s4048_s16 + $0xd8] sm:$0xff]  ;;  %v4226_v7 = vld [vmem:[%s4048_s16 + $0xa0] sm:$0xff] }
  0xe2   : > { %1201 = vmatpush.msrb.mxu3 %v605_v10  ;;  %1142 = vmatpush.msrb.mxu0 %v596_v12  ;;  %5324 = vst [vmem:[#allocation5_spill] sm:$0xff] %v4216_v5  ;;  %v4229_v8 = vld [vmem:[%s4048_s16 + $0xa8] sm:$0xff]  ;;  %v4234_v9 = vld [vmem:[%s4048_s16 + $0xb0] sm:$0xff]  ;;  %v4237_v10 = vld [vmem:[%s4048_s16 + $0xb8] sm:$0xff] }
  0xe3   : > { %1208 = vst [vmem:[#allocation2 + $0x30] sm:$0xff] %v786_v11  ;;  %1162 = vmatpush.msrb.mxu1 %v341_v13  ;;  %1182 = vmatpush.msrb.mxu2 %v469_v14  ;;  %v4242_v11 = vld [vmem:[%s4048_s16 + $0x80] sm:$0xff]  ;;  %v4247_v12 = vld [vmem:[%s4048_s16 + $0x88] sm:$0xff]  ;;  %v4250_v13 = vld [vmem:[%s4048_s16 + $0x90] sm:$0xff] }
  0xe4   : > { %1202 = vmatpush.msrb.mxu3 %v597_v15  ;;  %1143 = vmatpush.msrb.mxu0 %v588_v16  ;;  %v825_v38 = vpop.f32.mrf.mxu0  ;;  %5325 = vst [vmem:[#allocation6_spill] sm:$0xff] %v4221_v6  ;;  %v4255_v14 = vld [vmem:[%s4048_s16 + $0x98] sm:$0xff]  ;;  %v4259_v15 = vld [vmem:[%s4048_s16 + $0x60] sm:$0xff]  ;;  %v4262_v16 = vld [vmem:[%s4048_s16 + $0x68] sm:$0xff] }
  0xe5   : > { %1163 = vmatpush.msrb.mxu1 %v333_v17  ;;  %1183 = vmatpush.msrb.mxu2 %v461_v18  ;;  %v826_v41 = vadd.f32 %v825_v38, %v806_v31  ;;  %5326 = vst [vmem:[#allocation7_spill] sm:$0xff] %v4237_v10  ;;  %v4267_v17 = vld [vmem:[%s4048_s16 + $0x70] sm:$0xff]  ;;  %v4270_v18 = vld [vmem:[%s4048_s16 + $0x78] sm:$0xff]  ;;  %v714_v31 = vperm.slane %v4009_v43, 2  ;;  %v4295_v38 = vld [vmem:[%s4048_s16 + $0x28] sm:$0xff] }
  0xe6   : > { %1203 = vmatpush.msrb.mxu3 %v589_v19  ;;  %1104 = vmatmul.f32.vlgmr.msra.gmra.mxu2 %v4068_v25  ;;  %5327 = vst [vmem:[#allocation8_spill] sm:$0xff] %v4255_v14  ;;  %v4275_v19 = vld [vmem:[%s4048_s16 + $0x40] sm:$0xff] }
  0xe7   : > { %1124 = vmatmul.f32.vlgmr.msra.gmra.mxu3 %v4074_v26  ;;  %1284 = vmatpush.msra.mxu0 %v4054_v21  ;;  %5328 = vst [vmem:[#allocation9_spill] sm:$0xff] %v4270_v18 }
  0xe8   : > { %1304 = vmatpush.msra.mxu1 %v4057_v22  ;;  %1324 = vmatpush.msra.mxu2 %v4060_v23  ;;  %v845_v45 = vpop.f32.mrf.mxu1 }
  0xe9   : > { %1344 = vmatpush.msra.mxu3 %v4063_v24  ;;  %1285 = vmatpush.msra.mxu0 %v4078_v27  ;;  %v846_v48 = vadd.f32 %v845_v45, %v826_v41  ;;  %v4300_v41 = vld [vmem:[%s4048_s16 + $0x30] sm:$0xff]  ;;  %v4303_v45 = vld [vmem:[%s4048_s16 + $0x38] sm:$0xff] }
  0xea   : > { %1305 = vmatpush.msra.mxu1 %v4081_v28  ;;  %1325 = vmatpush.msra.mxu2 %v4086_v29 }
  0xeb   : > { %1345 = vmatpush.msra.mxu3 %v4089_v30  ;;  %1286 = vmatpush.msra.mxu0 %v4094_v32  ;;  %1209 = vst [vmem:[#allocation2] sm:$0xff] %v846_v48 }
  0xec   : > { %1306 = vmatpush.msra.mxu1 %v4097_v33  ;;  %1326 = vmatpush.msra.mxu2 %v4102_v34 }
  0xed   : > { %1346 = vmatpush.msra.mxu3 %v4105_v35  ;;  %1287 = vmatpush.msra.mxu0 %v4110_v36 }
  0xee   : > { %1307 = vmatpush.msra.mxu1 %v4113_v37  ;;  %1327 = vmatpush.msra.mxu2 %v4118_v39 }
  0xef   : > { %1347 = vmatpush.msra.mxu3 %v4121_v40  ;;  %1288 = vmatpush.msra.mxu0 %v4126_v42 }
  0xf0   : > { %1308 = vmatpush.msra.mxu1 %v4129_v44  ;;  %1328 = vmatpush.msra.mxu2 %v4134_v46 }
  0xf1   : > { %1348 = vmatpush.msra.mxu3 %v4137_v47  ;;  %1289 = vmatpush.msra.mxu0 %v4142_v49 }
  0xf2   : > { %1309 = vmatpush.msra.mxu1 %v4145_v50  ;;  %1329 = vmatpush.msra.mxu2 %v4150_v2 }
  0xf3   : > { %1349 = vmatpush.msra.mxu3 %v4153_v51  ;;  %1290 = vmatpush.msra.mxu0 %v4158_v52 }
  0xf4   : > { %1310 = vmatpush.msra.mxu1 %v4161_v53  ;;  %1330 = vmatpush.msra.mxu2 %v4166_v56 }
  0xf5   : > { %1350 = vmatpush.msra.mxu3 %v4169_v54  ;;  %1144 = vmatmul.f32.vlgmr.msrb.gmra.mxu0 %v3559_v62 }
  0xf6   : > { %1311 = vmatpush.msra.mxu1 %v4174_v55  ;;  %1291 = vmatpush.msra.mxu0 %v4179_v57 }
  0xf7   : > { %1331 = vmatpush.msra.mxu2 %v4182_v58  ;;  %1351 = vmatpush.msra.mxu3 %v4187_v59 }
  0xf8   : > { %1312 = vmatpush.msra.mxu1 %v4190_v60  ;;  %1292 = vmatpush.msra.mxu0 %v4197_v63 }
  0xf9   : > { %1332 = vmatpush.msra.mxu2 %v4200_v0  ;;  %1352 = vmatpush.msra.mxu3 %v4205_v1 }
  0xfa   : > { %1313 = vmatpush.msra.mxu1 %v4208_v3  ;;  %1293 = vmatpush.msra.mxu0 %v4213_v4 }
  0xfb   : > { %1333 = vmatpush.msra.mxu2 %v4216_v5  ;;  %1353 = vmatpush.msra.mxu3 %v4221_v6 }
  0xfc   : > { %1184 = vmatmul.f32.vlgmr.msrb.gmra.mxu2 %v4074_v26  ;;  %1294 = vmatpush.msra.mxu0 %v4226_v7  ;;  %v4286_v26 = vld [vmem:[%s4048_s16 + $0x58] sm:$0xff] }
  0xfd   : > { %1314 = vmatpush.msra.mxu1 %v4229_v8  ;;  %1334 = vmatpush.msra.mxu2 %v4234_v9  ;;  %5329 = vst [vmem:[#allocation10_spill] sm:$0xff] %v4286_v26 }
  0xfe   : > { %1354 = vmatpush.msra.mxu3 %v4237_v10  ;;  %1295 = vmatpush.msra.mxu0 %v4242_v11  ;;  %v4319_v10 = vld [vmem:[%s4048_s16 + $0x18] sm:$0xff] }
  0xff   : > { %1204 = vmatmul.f32.vlgmr.msrb.gmra.mxu3 %v3559_v62  ;;  %1315 = vmatpush.msra.mxu1 %v4247_v12  ;;  %v4308_v62 = vld [vmem:[%s4048_s16] sm:$0xff] }
 0x100   : > { %1335 = vmatpush.msra.mxu2 %v4250_v13  ;;  %1355 = vmatpush.msra.mxu3 %v4255_v14  ;;  %v4316_v14 = vld [vmem:[%s4048_s16 + $0x10] sm:$0xff]  ;;  %v885_v1 = vpop.f32.mrf.mxu3 }
 0x101   : > { %1164 = vmatmul.f32.vlgmr.msrb.gmra.mxu1 %v4068_v25  ;;  %1296 = vmatpush.msra.mxu0 %v4259_v15  ;;  %v4292_v25 = vld [vmem:[%s4048_s16 + $0x20] sm:$0xff] }
 0x102   : > { %1316 = vmatpush.msra.mxu1 %v4262_v16  ;;  %1336 = vmatpush.msra.mxu2 %v4267_v17 }
 0x103   : > { %1356 = vmatpush.msra.mxu3 %v4270_v18  ;;  %1297 = vmatpush.msra.mxu0 %v4275_v19  ;;  %v4311_v18 = vld [vmem:[%s4048_s16 + $0x8] sm:$0xff] }
 0x104   : > { %1317 = vmatpush.msra.mxu1 %v4278_v20  ;;  %1337 = vmatpush.msra.mxu2 %v4283_v61 }
 0x105   : > { %v865_v48 = vpop.f32.mrf.mxu2  ;;  %1357 = vmatpush.msra.mxu3 %v4286_v26  ;;  %1298 = vmatpush.msra.mxu0 %v4292_v25  ;;  %v5319_v26 = vmov 0.0  }
 0x106   : > { %1318 = vmatpush.msra.mxu1 %v4295_v38  ;;  %v866_v6 = vadd.f32 %v865_v48, %v714_v31  ;;  %1338 = vmatpush.msra.mxu2 %v4300_v41 }
 0x107   : > { %1358 = vmatpush.msra.mxu3 %v4303_v45  ;;  %1299 = vmatpush.msra.mxu0 %v4308_v62 }
 0x108   : > { %1319 = vmatpush.msra.mxu1 %v4311_v18  ;;  %1339 = vmatpush.msra.mxu2 %v4316_v14  ;;  %v886_v59 = vadd.f32 %v885_v1, %v866_v6 }
 0x109   : > { %1359 = vmatpush.msra.mxu3 %v4319_v10  ;;  %1300 = vmatmul.f32.vlgmr.msra.gmra.mxu0 %v5319_v26 }
 0x10a   : > { %1320 = vmatmul.f32.vlgmr.msra.gmra.mxu1 %v5319_v26  ;;  %1340 = vmatmul.f32.vlgmr.msra.gmra.mxu2 %v5319_v26 }
 0x10b   : > { %1360 = vmatmul.f32.vlgmr.msra.gmra.mxu3 %v5319_v26  ;;  %1498 = vmatpush.msrb.mxu1 %v4054_v21 }
 0x10c   : > { %1518 = vmatpush.msrb.mxu2 %v4057_v22  ;;  %1538 = vmatpush.msrb.mxu3 %v4060_v23 }
 0x10d   : > { %v905_v31 = vpop.f32.mrf.mxu0  ;;  %1499 = vmatpush.msrb.mxu1 %v4078_v27 }
 0x10e   : > { %v906_v48 = vadd.f32 %v905_v31, %v886_v59  ;;  %1519 = vmatpush.msrb.mxu2 %v4081_v28  ;;  %1539 = vmatpush.msrb.mxu3 %v4086_v29  ;;  %v715_v59 = vperm.slane %v4009_v43, 3 }
 0x10f   : > { %1500 = vmatpush.msrb.mxu1 %v4094_v32 }
 0x110   : > { %1210 = vst [vmem:[#allocation2 + $0x18] sm:$0xff] %v906_v48  ;;  %1520 = vmatpush.msrb.mxu2 %v4097_v33  ;;  %1540 = vmatpush.msrb.mxu3 %v4102_v34 }
 0x111   : > { %1501 = vmatpush.msrb.mxu1 %v4110_v36 }
 0x112   : > { %1521 = vmatpush.msrb.mxu2 %v4113_v37  ;;  %1541 = vmatpush.msrb.mxu3 %v4118_v39 }
 0x113   : > { %1502 = vmatpush.msrb.mxu1 %v4126_v42 }
 0x114   : > { %1522 = vmatpush.msrb.mxu2 %v4129_v44  ;;  %1542 = vmatpush.msrb.mxu3 %v4134_v46 }
 0x115   : > { %1503 = vmatpush.msrb.mxu1 %v4142_v49 }
 0x116   : > { %1523 = vmatpush.msrb.mxu2 %v4145_v50  ;;  %1543 = vmatpush.msrb.mxu3 %v4150_v2 }
 0x117   : > { %1504 = vmatpush.msrb.mxu1 %v4158_v52 }
 0x118   : > { %1524 = vmatpush.msrb.mxu2 %v4161_v53  ;;  %1544 = vmatpush.msrb.mxu3 %v4166_v56 }
 0x119   : > { %1505 = vmatpush.msrb.mxu1 %v4179_v57 }
 0x11a   : > { %1525 = vmatpush.msrb.mxu2 %v4174_v55  ;;  %1545 = vmatpush.msrb.mxu3 %v4182_v58 }
 0x11b   : > { %1506 = vmatpush.msrb.mxu1 %v4197_v63 }
 0x11c   : > { %1526 = vmatpush.msrb.mxu2 %v4190_v60  ;;  %1546 = vmatpush.msrb.mxu3 %v4200_v0 }
 0x11d   : > { %1507 = vmatpush.msrb.mxu1 %v4213_v4 }
 0x11e   : > { %1527 = vmatpush.msrb.mxu2 %v4208_v3  ;;  %1547 = vmatpush.msrb.mxu3 %v4216_v5 }
 0x11f   : > { %1508 = vmatpush.msrb.mxu1 %v4226_v7 }
 0x120   : > { %v925_v1 = vpop.f32.mrf.mxu1  ;;  %1528 = vmatpush.msrb.mxu2 %v4229_v8  ;;  %1548 = vmatpush.msrb.mxu3 %v4234_v9 }
 0x121   : > { %v926_v6 = vadd.f32 %v925_v1, %v715_v59  ;;  %1509 = vmatpush.msrb.mxu1 %v4242_v11  ;;  %v965_v26 = vpop.f32.mrf.mxu3  ;;  %v4503_v1 = vld [vmem:[%s4424_s7] sm:$0xff] }
 0x122   : > { %v945_v31 = vpop.f32.mrf.mxu2  ;;  %1529 = vmatpush.msrb.mxu2 %v4247_v12  ;;  %1549 = vmatpush.msrb.mxu3 %v4250_v13 }
 0x123   : > { %v946_v48 = vadd.f32 %v945_v31, %v926_v6  ;;  %1510 = vmatpush.msrb.mxu1 %v4259_v15  ;;  %v719_v31 = vperm.slane %v4009_v43, 7 }
 0x124   : > { %1530 = vmatpush.msrb.mxu2 %v4262_v16  ;;  %1550 = vmatpush.msrb.mxu3 %v4267_v17 }
 0x125   : > { %v966_v5 = vadd.f32 %v965_v26, %v946_v48  ;;  %1511 = vmatpush.msrb.mxu1 %v4275_v19  ;;  %v4488_v26 = vld [vmem:[%s4424_s7 + $0x18] sm:$0xff] }
 0x126   : > { %1531 = vmatpush.msrb.mxu2 %v4278_v20  ;;  %1551 = vmatpush.msrb.mxu3 %v4283_v61 }
 0x127   : > { %1211 = vst [vmem:[#allocation2 + $0x10] sm:$0xff] %v966_v5  ;;  %1512 = vmatpush.msrb.mxu1 %v4292_v25  ;;  %v4457_v5 = vld [vmem:[%s4424_s7 + $0x48] sm:$0xff] }
 0x128   : > { %1532 = vmatpush.msrb.mxu2 %v4295_v38  ;;  %1552 = vmatpush.msrb.mxu3 %v4300_v41 }
 0x129   : > { %1513 = vmatpush.msrb.mxu1 %v4308_v62 }
 0x12a   : > { %1533 = vmatpush.msrb.mxu2 %v4311_v18  ;;  %1553 = vmatpush.msrb.mxu3 %v4316_v14 }
 0x12c   : > { %1731 = vmatpush.msra.mxu2 %v4054_v21  ;;  %1751 = vmatpush.msra.mxu3 %v4057_v22  ;;  %v716_v21 = vperm.slane %v4009_v43, 4 }
 0x12e   : > { %1732 = vmatpush.msra.mxu2 %v4078_v27  ;;  %1752 = vmatpush.msra.mxu3 %v4081_v28 }
 0x130   : > { %1733 = vmatpush.msra.mxu2 %v4094_v32  ;;  %1753 = vmatpush.msra.mxu3 %v4097_v33 }
 0x132   : > { %1734 = vmatpush.msra.mxu2 %v4110_v36  ;;  %1754 = vmatpush.msra.mxu3 %v4113_v37  ;;  %v717_v37 = vperm.slane %v4009_v43, 5 }
 0x134   : > { %1735 = vmatpush.msra.mxu2 %v4126_v42  ;;  %1755 = vmatpush.msra.mxu3 %v4129_v44 }
 0x136   : > { %1736 = vmatpush.msra.mxu2 %v4142_v49  ;;  %1756 = vmatpush.msra.mxu3 %v4145_v50 }
 0x138   : > { %1737 = vmatpush.msra.mxu2 %v4158_v52  ;;  %1757 = vmatpush.msra.mxu3 %v4161_v53 }
 0x13a   : > { %1738 = vmatpush.msra.mxu2 %v4179_v57  ;;  %1758 = vmatpush.msra.mxu3 %v4174_v55  ;;  %v4427_v55 = vld [vmem:[%s4424_s7 + $0x78] sm:$0xff]  ;;  %v4431_v57 = vld [vmem:[%s4424_s7 + $0x70] sm:$0xff] }
 0x13b   : > { %1409 = vmatpush.msrb.mxu0 %v4427_v55  ;;  %1641 = vmatpush.msra.mxu1 %v4427_v55 }
 0x13c   : > { %1739 = vmatpush.msra.mxu2 %v4197_v63  ;;  %1759 = vmatpush.msra.mxu3 %v4190_v60  ;;  %v4435_v60 = vld [vmem:[%s4424_s7 + $0x68] sm:$0xff]  ;;  %v4440_v63 = vld [vmem:[%s4424_s7 + $0x60] sm:$0xff] }
 0x13d   : > { %1410 = vmatpush.msrb.mxu0 %v4431_v57  ;;  %1642 = vmatpush.msra.mxu1 %v4431_v57 }
 0x13e   : > { %1740 = vmatpush.msra.mxu2 %v4213_v4  ;;  %1760 = vmatpush.msra.mxu3 %v4208_v3  ;;  %v4445_v3 = vld [vmem:[%s4424_s7 + $0x58] sm:$0xff]  ;;  %v4452_v4 = vld [vmem:[%s4424_s7 + $0x50] sm:$0xff] }
 0x13f   : > { %v985_v22 = vpop.f32.mrf.mxu0  ;;  %1411 = vmatpush.msrb.mxu0 %v4435_v60  ;;  %1643 = vmatpush.msra.mxu1 %v4435_v60 }
 0x140   : > { %1741 = vmatpush.msra.mxu2 %v4226_v7  ;;  %v986_v27 = vadd.f32 %v985_v22, %v716_v21  ;;  %1761 = vmatpush.msra.mxu3 %v4229_v8  ;;  %v4462_v7 = vld [vmem:[%s4424_s7 + $0x40] sm:$0xff]  ;;  %v4467_v8 = vld [vmem:[%s4424_s7 + $0x38] sm:$0xff] }
 0x141   : > { %v1005_v28 = vpop.f32.mrf.mxu1  ;;  %1412 = vmatpush.msrb.mxu0 %v4440_v63  ;;  %1644 = vmatpush.msra.mxu1 %v4440_v63 }
 0x142   : > { %1742 = vmatpush.msra.mxu2 %v4242_v11  ;;  %1762 = vmatpush.msra.mxu3 %v4247_v12  ;;  %v1006_v32 = vadd.f32 %v1005_v28, %v986_v27  ;;  %v1025_v33 = vpop.f32.mrf.mxu2  ;;  %v4472_v11 = vld [vmem:[%s4424_s7 + $0x30] sm:$0xff]  ;;  %v718_v12 = vperm.slane %v4009_v43, 6 }
 0x143   : > { %1413 = vmatpush.msrb.mxu0 %v4445_v3  ;;  %1645 = vmatpush.msra.mxu1 %v4445_v3  ;;  %v1216_v43 = vld [vmem:[#allocation2 + $0x30] sm:$0x3] }
 0x144   : > { %1743 = vmatpush.msra.mxu2 %v4259_v15  ;;  %1763 = vmatpush.msra.mxu3 %v4262_v16  ;;  %v1026_v36 = vadd.f32 %v1025_v33, %v1006_v32  ;;  %v4478_v15 = vld [vmem:[%s4424_s7 + $0x28] sm:$0xff]  ;;  %v5330_v33 = vld [vmem:[#allocation3_spill] sm:$0xff] }
 0x145   : > { %1414 = vmatpush.msrb.mxu0 %v4452_v4  ;;  %1646 = vmatpush.msra.mxu1 %v4452_v4 }
 0x146   : > { %1744 = vmatpush.msra.mxu2 %v4275_v19  ;;  %1764 = vmatpush.msra.mxu3 %v4278_v20  ;;  %1212 = vst [vmem:[#allocation2 + $0x8] sm:$0xff] %v1026_v36  ;;  %v5331_v36 = vld [vmem:[#allocation4_spill] sm:$0xff] }
 0x147   : > { %1415 = vmatpush.msrb.mxu0 %v4457_v5  ;;  %1647 = vmatpush.msra.mxu1 %v4457_v5 }
 0x148   : > { %1745 = vmatpush.msra.mxu2 %v4292_v25  ;;  %1765 = vmatpush.msra.mxu3 %v4295_v38  ;;  %v1045_v42 = vpop.f32.mrf.mxu3  ;;  %v4493_v25 = vld [vmem:[%s4424_s7 + $0x10] sm:$0xff] }
 0x149   : > { %v1046_v44 = vadd.f32 %v1045_v42, %v717_v37  ;;  %1416 = vmatpush.msrb.mxu0 %v4462_v7  ;;  %1648 = vmatpush.msra.mxu1 %v4462_v7  ;;  %v1217_v42 = vld [vmem:[#allocation2] sm:$0x3] }
 0x14a   : > { %1746 = vmatpush.msra.mxu2 %v4308_v62  ;;  %1766 = vmatpush.msra.mxu3 %v4311_v18  ;;  %v4483_v18 = vld [vmem:[%s4424_s7 + $0x20] sm:$0xff]  ;;  %v4498_v62 = vld [vmem:[%s4424_s7 + $0x8] sm:$0xff] }
 0x14b   : > { %1417 = vmatpush.msrb.mxu0 %v4467_v8  ;;  %1649 = vmatpush.msra.mxu1 %v4467_v8 }
 0x14d   : > { %1418 = vmatpush.msrb.mxu0 %v4472_v11  ;;  %1650 = vmatpush.msra.mxu1 %v4472_v11 }
 0x14f   : > { %1419 = vmatpush.msrb.mxu0 %v4478_v15  ;;  %1651 = vmatpush.msra.mxu1 %v4478_v15 }
 0x150   : > { %v1065_v49 = vpop.f32.mrf.mxu0 }
 0x151   : > { %v1066_v50 = vadd.f32 %v1065_v49, %v1046_v44  ;;  %1420 = vmatpush.msrb.mxu0 %v4483_v18  ;;  %1652 = vmatpush.msra.mxu1 %v4483_v18  ;;  %v5332_v49 = vld [vmem:[#allocation6_spill] sm:$0xff] }
 0x153   : > { %v1085_v52 = vpop.f32.mrf.mxu1  ;;  %1421 = vmatpush.msrb.mxu0 %v4488_v26  ;;  %1653 = vmatpush.msra.mxu1 %v4488_v26 }
 0x154   : > { %v1086_v53 = vadd.f32 %v1085_v52, %v1066_v50 }
 0x155   : > { %1422 = vmatpush.msrb.mxu0 %v4493_v25  ;;  %1654 = vmatpush.msra.mxu1 %v4493_v25 }
 0x156   : > { %1213 = vst [vmem:[#allocation2 + $0x20] sm:$0xff] %v1086_v53  ;;  %v5333_v53 = vld [vmem:[#allocation7_spill] sm:$0xff] }
 0x157   : > { %1423 = vmatpush.msrb.mxu0 %v4498_v62  ;;  %1655 = vmatpush.msra.mxu1 %v4498_v62 }
 0x159   : > { %1424 = vmatpush.msrb.mxu0 %v4503_v1  ;;  %1656 = vmatpush.msra.mxu1 %v4503_v1 }
 0x15b   : > { %1558 = vmatpush.msra.mxu0 %v4063_v24 }
 0x15d   : > { %1559 = vmatpush.msra.mxu0 %v4089_v30 }
 0x15f   : > { %1560 = vmatpush.msra.mxu0 %v4105_v35 }
 0x161   : > { %1561 = vmatpush.msra.mxu0 %v4121_v40 }
 0x163   : > { %1562 = vmatpush.msra.mxu0 %v4137_v47 }
 0x165   : > { %1563 = vmatpush.msra.mxu0 %v4153_v51 }
 0x167   : > { %1564 = vmatpush.msra.mxu0 %v4169_v54 }
 0x169   : > { %v1105_v16 = vpop.f32.mrf.mxu2  ;;  %1565 = vmatpush.msra.mxu0 %v5330_v33 }
 0x16a   : > { %v1106_v19 = vadd.f32 %v1105_v16, %v718_v12  ;;  %v1125_v20 = vpop.f32.mrf.mxu3 }
 0x16b   : > { %1566 = vmatpush.msra.mxu0 %v5331_v36 }
 0x16c   : > { %v1126_v38 = vadd.f32 %v1125_v20, %v1106_v19  ;;  %v5334_v19 = vld [vmem:[#allocation8_spill] sm:$0xff] }
 0x16d   : > { %1567 = vmatpush.msra.mxu0 %v5332_v49 }
 0x16f   : > { %1568 = vmatpush.msra.mxu0 %v5333_v53 }
 0x171   : > { %1569 = vmatpush.msra.mxu0 %v5334_v19 }
 0x172   : > { %v1145_v59 = vpop.f32.mrf.mxu0 }
 0x173   : > { %v1146_v6 = vadd.f32 %v1145_v59, %v1126_v38  ;;  %v5335_v59 = vld [vmem:[#allocation9_spill] sm:$0xff] }
 0x174   : > { %1570 = vmatpush.msra.mxu0 %v5335_v59 }
 0x175   : > { %1214 = vst [vmem:[#allocation2 + $0x28] sm:$0xff] %v1146_v6  ;;  %v1219_v6 = vld [vmem:[#allocation2 + $0x10] sm:$0x3] }
 0x17e   : > { %v1165_v48 = vpop.f32.mrf.mxu1 }
 0x17f   : > { %v1166_v21 = vadd.f32 %v1165_v48, %v719_v31  ;;  %v1185_v22 = vpop.f32.mrf.mxu2 }
 0x181   : > { %v1186_v27 = vadd.f32 %v1185_v22, %v1166_v21  ;;  %v5336_v22 = vld [vmem:[#allocation10_spill] sm:$0xff] }
 0x182   : > { %v1205_v28 = vpop.f32.mrf.mxu3  ;;  %1571 = vmatpush.msra.mxu0 %v5336_v22 }
 0x183   : > { %v1206_v32 = vadd.f32 %v1205_v28, %v1186_v27  ;;  %v1218_v27 = vld [vmem:[#allocation2 + $0x18] sm:$0x3] }
 0x184   : > { %1572 = vmatpush.msra.mxu0 %v4303_v45 }
 0x185   : > { %1215 = vst [vmem:[#allocation2 + $0x38] sm:$0xff] %v1206_v32 }
 0x186   : > { %v1301_v37 = vpop.f32.mrf.mxu0  ;;  %1573 = vmatpush.msra.mxu0 %v4319_v10 }
 0x187   : > { %v1321_v44 = vpop.f32.mrf.mxu1  ;;  %v1364_v50 = vadd.f32 %v1301_v37, %v1216_v43 }
 0x188   : > { %v1365_v52 = vadd.f32 %v1321_v44, %v1217_v42 }
 0x189   : > { %v1368_v12 = vsub.f32 0.0, %v1364_v50 }
 0x18a   : > { %v1373_v16 = vsub.f32 0.0, %v1365_v52 }
 0x18b   : > { %v1369_v20 = vmul.f32 1.442695, %v1368_v12 }
 0x18c   : > { %v1374_v38 = vmul.f32 1.442695, %v1373_v16 }
 0x18d   : > { %3429 = vpow2.f32 %v1369_v20  ;;  %v1341_v48 = vpop.f32.mrf.mxu2 }
 0x18e   : > { %v1361_v31 = vpop.f32.mrf.mxu3  ;;  %3431 = vpow2.f32 %v1374_v38  ;;  %v1366_v32 = vadd.f32 %v1341_v48, %v1218_v27 }
 0x18f   : > { %v1367_v21 = vadd.f32 %v1361_v31, %v1219_v6 }
 0x191   : > { %v1379_v28 = vsub.f32 0.0, %v1367_v21 }
 0x193   : > { %v1380_v43 = vmul.f32 1.442695, %v1379_v28  ;;  %v3430_v37 = vpop.eup %3429 }
 0x194   : > { %v3432_v42 = vpop.eup %3431  ;;  %v1371_v44 = vadd.f32 1.0, %v3430_v37  ;;  %v1954_v37 = vld [vmem:[%s4048_s16 + $0x1b0] sm:$0xff] }
 0x195   : > { %3433 = vpow2.f32 %v1380_v43  ;;  %v1376_v50 = vadd.f32 1.0, %v3432_v42  ;;  %v1958_v43 = vld [vmem:[%s4048_s16 + $0x1d0] sm:$0xff] }
 0x196   : > { %3435 = vtanh.f32 %v1366_v32  ;;  %v1962_v32 = vld [vmem:[%s4048_s16 + $0x1f0] sm:$0xff] }
 0x197   : > { %3437 = vrcp.f32 %v1371_v44  ;;  %v1950_v42 = vld [vmem:[%s4048_s16 + $0x190] sm:$0xff]  ;;  %v1945_v44 = vld [vmem:[%s4048_s16 + $0x168] sm:$0xff] }
 0x198   : > { %3439 = vrcp.f32 %v1376_v50  ;;  %v1946_v50 = vld [vmem:[%s4048_s16 + $0x170] sm:$0xff] }
 0x19b   : > { %v3434_v52 = vpop.eup %3433 }
 0x19c   : > { %v3436_v12 = vpop.eup %3435  ;;  %v1382_v6 = vadd.f32 1.0, %v3434_v52  ;;  %v1941_v52 = vld [vmem:[%s4048_s16 + $0x148] sm:$0xff] }
 0x19d   : > { %v3438_v16 = vpop.eup %3437 }
 0x19e   : > { %v3440_v20 = vpop.eup %3439  ;;  %v1385_v38 = vmul.f32 %v3438_v16, %v3436_v12  ;;  %3441 = vrcp.f32 %v1382_v6  ;;  %v1942_v12 = vld [vmem:[%s4048_s16 + $0x150] sm:$0xff]  ;;  %v1937_v16 = vld [vmem:[%s4048_s16 + $0x128] sm:$0xff] }
 0x19f   : > { %v1384_v31 = vmul.f32 0.0, %v3440_v20  ;;  %v1938_v20 = vld [vmem:[%s4048_s16 + $0x130] sm:$0xff] }
 0x1a0   : > { %v1934_v6 = vld [vmem:[%s4048_s16 + $0x110] sm:$0xff] }
 0x1a1   : > { %v4524_v21 = vadd.f32 %v1385_v38, %v1384_v31  ;;  %v1933_v38 = vld [vmem:[%s4048_s16 + $0x108] sm:$0xff] }
 0x1a2   : > { %v1929_v31 = vld [vmem:[%s4048_s16 + $0xe8] sm:$0xff] }
 0x1a3   : > { %3443 = vtanh.f32 %v4524_v21 }
 0x1a4   : > { %v3442_v48 = vpop.eup %3441 }
 0x1a9   : > { %v3444_v27 = vpop.eup %3443 }
 0x1aa   : > { %v1388_v28 = vmul.f32 %v3444_v27, %v3442_v48  ;;  %v1925_v48 = vld [vmem:[%s4048_s16 + $0xc8] sm:$0xff]  ;;  %v1926_v27 = vld [vmem:[%s4048_s16 + $0xd0] sm:$0xff] }
 0x1ac   : > { %1425 = vmatmul.f32.vlgmr.msrb.gmra.mxu0 %v1388_v28  ;;  %1514 = vmatmul.f32.vlgmr.msrb.gmra.mxu1 %v1388_v28 }
 0x1ad   : > { %1534 = vmatmul.f32.vlgmr.msrb.gmra.mxu2 %v1388_v28  ;;  %1554 = vmatmul.f32.vlgmr.msrb.gmra.mxu3 %v1388_v28 }
 0x1ae   : > { %1771 = vmatpush.msrb.mxu0 %v4060_v23  ;;  %1791 = vmatpush.msrb.mxu1 %v4063_v24  ;;  %v5337_v23 = vld [vmem:[#allocation5_spill] sm:$0xff]  ;;  %v3425_v24 = vld [vmem:[%s4393_s27] ss:$0 sm:$0xff] }
 0x1af   : > { %1874 = vmatpush.msrb.mxu2 %v4427_v55 }
 0x1b0   : > { %1772 = vmatpush.msrb.mxu0 %v4086_v29  ;;  %1792 = vmatpush.msrb.mxu1 %v4089_v30 }
 0x1b1   : > { %1875 = vmatpush.msrb.mxu2 %v4431_v57 }
 0x1b2   : > { %1773 = vmatpush.msrb.mxu0 %v4102_v34  ;;  %1793 = vmatpush.msrb.mxu1 %v4105_v35 }
 0x1b3   : > { %1876 = vmatpush.msrb.mxu2 %v4435_v60  ;;  %v1432_v60 = vld [vmem:[#allocation2 + $0x18] sm:$0xc] }
 0x1b4   : > { %1574 = vmatmul.f32.vlgmr.msra.gmra.mxu0 %v1388_v28  ;;  %1794 = vmatpush.msrb.mxu1 %v4121_v40  ;;  %v1921_v28 = vld [vmem:[%s4048_s16 + $0xa8] sm:$0xff] }
 0x1b5   : > { %1774 = vmatpush.msrb.mxu0 %v4118_v39  ;;  %1877 = vmatpush.msrb.mxu2 %v4440_v63  ;;  %v1430_v39 = vld [vmem:[#allocation2 + $0x30] sm:$0xc] }
 0x1b6   : > { %1795 = vmatpush.msrb.mxu1 %v4137_v47 }
 0x1b7   : > { %1775 = vmatpush.msrb.mxu0 %v4134_v46  ;;  %1878 = vmatpush.msrb.mxu2 %v4445_v3 }
 0x1b8   : > { %1796 = vmatpush.msrb.mxu1 %v4153_v51 }
 0x1b9   : > { %1776 = vmatpush.msrb.mxu0 %v4150_v2  ;;  %1879 = vmatpush.msrb.mxu2 %v4452_v4 }
 0x1ba   : > { %1797 = vmatpush.msrb.mxu1 %v4169_v54  ;;  %v1431_v54 = vld [vmem:[#allocation2] sm:$0xc] }
 0x1bb   : > { %1777 = vmatpush.msrb.mxu0 %v4166_v56  ;;  %1880 = vmatpush.msrb.mxu2 %v4457_v5  ;;  %v1961_v5 = vld [vmem:[%s4048_s16 + $0x1e8] sm:$0xff] }
 0x1bc   : > { %1798 = vmatpush.msrb.mxu1 %v5330_v33 }
 0x1bd   : > { %1778 = vmatpush.msrb.mxu0 %v4182_v58  ;;  %1881 = vmatpush.msrb.mxu2 %v4462_v7  ;;  %v1957_v7 = vld [vmem:[%s4048_s16 + $0x1c8] sm:$0xff] }
 0x1be   : > { %1799 = vmatpush.msrb.mxu1 %v5331_v36 }
 0x1bf   : > { %1779 = vmatpush.msrb.mxu0 %v4200_v0  ;;  %1882 = vmatpush.msrb.mxu2 %v4467_v8  ;;  %v1953_v8 = vld [vmem:[%s4048_s16 + $0x1a8] sm:$0xff] }
 0x1c0   : > { %1800 = vmatpush.msrb.mxu1 %v5332_v49 }
 0x1c1   : > { %1780 = vmatpush.msrb.mxu0 %v5337_v23  ;;  %1883 = vmatpush.msrb.mxu2 %v4472_v11  ;;  %v1949_v11 = vld [vmem:[%s4048_s16 + $0x188] sm:$0xff]  ;;  %v1922_v23 = vld [vmem:[%s4048_s16 + $0xb0] sm:$0xff] }
 0x1c2   : > { %1801 = vmatpush.msrb.mxu1 %v5333_v53 }
 0x1c3   : > { %1781 = vmatpush.msrb.mxu0 %v4234_v9  ;;  %1884 = vmatpush.msrb.mxu2 %v4478_v15  ;;  %v1433_v9 = vld [vmem:[#allocation2 + $0x10] sm:$0xc] }
 0x1c4   : > { %1802 = vmatpush.msrb.mxu1 %v5334_v19 }
 0x1c5   : > { %1782 = vmatpush.msrb.mxu0 %v4250_v13  ;;  %1885 = vmatpush.msrb.mxu2 %v4483_v18 }
 0x1c6   : > { %1803 = vmatpush.msrb.mxu1 %v5335_v59 }
 0x1c7   : > { %1783 = vmatpush.msrb.mxu0 %v4267_v17  ;;  %1886 = vmatpush.msrb.mxu2 %v4488_v26 }
 0x1c8   : > { %1804 = vmatpush.msrb.mxu1 %v5336_v22 }
 0x1c9   : > { %1784 = vmatpush.msrb.mxu0 %v4283_v61  ;;  %1887 = vmatpush.msrb.mxu2 %v4493_v25  ;;  %v1611_v25 = vrot.slane %v4524_v21, 6  ;;  %v1930_v21 = vld [vmem:[%s4048_s16 + $0xf0] sm:$0xff] }
 0x1ca   : > { %1805 = vmatpush.msrb.mxu1 %v4303_v45 }
 0x1cb   : > { %1785 = vmatpush.msrb.mxu0 %v4300_v41  ;;  %1888 = vmatpush.msrb.mxu2 %v4498_v62 }
 0x1cc   : > { %1806 = vmatpush.msrb.mxu1 %v4319_v10 }
 0x1cd   : > { %1786 = vmatpush.msrb.mxu0 %v4316_v14  ;;  %1889 = vmatpush.msrb.mxu2 %v4503_v1 }
 0x1cf   : > { %1984 = vmatpush.msra.mxu0 %v1961_v5  ;;  %v3426_v5 = vld [vmem:[%s4393_s27] ss:$0 sm:$0xff] }
 0x1d1   : > { %1985 = vmatpush.msra.mxu0 %v1957_v7  ;;  %v4655_v7 = vld [vmem:[%s4048_s16 + $0x3a8] sm:$0xff] }
 0x1d3   : > { %1986 = vmatpush.msra.mxu0 %v1953_v8  ;;  %v1932_v8 = vld [vmem:[%s4048_s16 + $0x100] sm:$0xff] }
 0x1d5   : > { %1987 = vmatpush.msra.mxu0 %v1949_v11  ;;  %v1935_v11 = vld [vmem:[%s4048_s16 + $0x118] sm:$0xff] }
 0x1d7   : > { %1988 = vmatpush.msra.mxu0 %v1945_v44  ;;  %v1916_v44 = vld [vmem:[%s4048_s16 + $0x80] sm:$0xff] }
 0x1d9   : > { %1989 = vmatpush.msra.mxu0 %v1941_v52  ;;  %v4703_v52 = vld [vmem:[%s4048_s16 + $0x300] sm:$0xff] }
 0x1db   : > { %1990 = vmatpush.msra.mxu0 %v1937_v16  ;;  %v1912_v16 = vld [vmem:[%s4048_s16 + $0x60] sm:$0xff] }
 0x1dd   : > { %1991 = vmatpush.msra.mxu0 %v1933_v38  ;;  %v1915_v38 = vld [vmem:[%s4048_s16 + $0x78] sm:$0xff] }
 0x1df   : > { %1992 = vmatpush.msra.mxu0 %v1929_v31  ;;  %v4714_v31 = vld [vmem:[%s4048_s16 + $0x2e8] sm:$0xff] }
 0x1e1   : > { %1993 = vmatpush.msra.mxu0 %v1925_v48 }
 0x1e3   : > { %1994 = vmatpush.msra.mxu0 %v1921_v28  ;;  %v1911_v28 = vld [vmem:[%s4048_s16 + $0x58] sm:$0xff] }
 0x229   : > { %v1426_v29 = vpop.f32.mrf.mxu0  ;;  %v1515_v30 = vpop.f32.mrf.mxu1 }
 0x22a   : > { %v1427_v34 = vadd.f32 %v3425_v24, %v1426_v29  ;;  %v1582_v35 = vrot.slane %v1515_v30, 6  ;;  %v1917_v24 = vld [vmem:[%s4048_s16 + $0x88] sm:$0xff]  ;;  %v1918_v29 = vld [vmem:[%s4048_s16 + $0x90] sm:$0xff]  ;;  %v1960_v30 = vld [vmem:[%s4048_s16 + $0x1e0] sm:$0xff] }
 0x22b   : > { %1995 = vmatpush.msra.mxu0 %v1917_v24  ;;  %1964 = vmatpush.msrb.mxu3 %v1960_v30  ;;  %v4721_v30 = vld [vmem:[%s4048_s16 + $0x2c0] sm:$0xff] }
 0x22c   : > { %1429 = vst [vmem:[%s4581_s11] sm:$0x3] %v1427_v34  ;;  %v1590_v40 = vadd.f32 %v1582_v35, %v1430_v39  ;;  %v1963_v34 = vld [vmem:[%s4048_s16 + $0x1f8] sm:$0xff]  ;;  %v1913_v35 = vld [vmem:[%s4048_s16 + $0x68] sm:$0xff]  ;;  %v1914_v39 = vld [vmem:[%s4048_s16 + $0x70] sm:$0xff] }
 0x22d   : > { %1996 = vmatpush.msra.mxu0 %v1913_v35 }
 0x22e   : > { %v1594_v46 = vsub.f32 0.0, %v1590_v40  ;;  %v1956_v40 = vld [vmem:[%s4048_s16 + $0x1c0] sm:$0xff] }
 0x22f   : > { %1965 = vmatpush.msrb.mxu3 %v1956_v40 }
 0x230   : > { %v1595_v47 = vmul.f32 1.442695, %v1594_v46  ;;  %v1535_v2 = vpop.f32.mrf.mxu2  ;;  %v1555_v14 = vpop.f32.mrf.mxu3  ;;  %v1959_v46 = vld [vmem:[%s4048_s16 + $0x1d8] sm:$0xff] }
 0x231   : > { %v1583_v51 = vrot.slane %v1535_v2, 6  ;;  %v1575_v56 = vpop.f32.mrf.mxu0  ;;  %v1584_v45 = vrot.slane %v1555_v14, 6  ;;  %v1910_v2 = vld [vmem:[%s4048_s16 + $0x50] sm:$0xff]  ;;  %v1944_v14 = vld [vmem:[%s4048_s16 + $0x160] sm:$0xff] }
 0x232   : > { %v1585_v58 = vrot.slane %v1575_v56, 6  ;;  %3445 = vpow2.f32 %v1595_v47  ;;  %v1909_v47 = vld [vmem:[%s4048_s16 + $0x48] sm:$0xff]  ;;  %v1955_v56 = vld [vmem:[%s4048_s16 + $0x1b8] sm:$0xff] }
 0x233   : > { %v1591_v0 = vadd.f32 %v1583_v51, %v1431_v54  ;;  %v1592_v63 = vadd.f32 %v1584_v45, %v1432_v60  ;;  %1997 = vmatpush.msra.mxu0 %v1909_v47  ;;  %v1952_v51 = vld [vmem:[%s4048_s16 + $0x1a0] sm:$0xff]  ;;  %v1905_v54 = vld [vmem:[%s4048_s16 + $0x28] sm:$0xff]  ;;  %v1907_v47 = vld [vmem:[%s4048_s16 + $0x38] sm:$0xff] }
 0x234   : > { %v1593_v10 = vadd.f32 %v1585_v58, %v1433_v9  ;;  %1966 = vmatpush.msrb.mxu3 %v1952_v51  ;;  %v1906_v58 = vld [vmem:[%s4048_s16 + $0x30] sm:$0xff]  ;;  %v1951_v9 = vld [vmem:[%s4048_s16 + $0x198] sm:$0xff]  ;;  %v1940_v45 = vld [vmem:[%s4048_s16 + $0x140] sm:$0xff] }
 0x235   : > { %v1599_v13 = vsub.f32 0.0, %v1591_v0  ;;  %1998 = vmatpush.msra.mxu0 %v1905_v54  ;;  %v1948_v0 = vld [vmem:[%s4048_s16 + $0x180] sm:$0xff]  ;;  %v4644_v60 = vld [vmem:[%s4048_s16 + $0x3c8] sm:$0xff]  ;;  %v1666_v51 = vld [vmem:[#allocation2 + $0x10] sm:$0x30] }
 0x236   : > { %v1605_v61 = vsub.f32 0.0, %v1593_v10  ;;  %1967 = vmatpush.msrb.mxu3 %v1948_v0  ;;  %v1901_v10 = vld [vmem:[%s4048_s16 + $0x8] sm:$0xff] }
 0x237   : > { %v1600_v17 = vmul.f32 1.442695, %v1599_v13  ;;  %v1902_v13 = vld [vmem:[%s4048_s16 + $0x10] sm:$0xff]  ;;  %1999 = vmatpush.msra.mxu0 %v1901_v10  ;;  %v4734_v54 = vld [vmem:[%s4048_s16 + $0x2a8] sm:$0xff]  ;;  %v1903_v10 = vld [vmem:[%s4048_s16 + $0x18] sm:$0xff] }
 0x238   : > { %v3446_v41 = vpop.eup %3445  ;;  %v1606_v55 = vmul.f32 1.442695, %v1605_v61  ;;  %v4631_v61 = vld [vmem:[%s4048_s16 + $0x3e0] sm:$0xff]  ;;  %1968 = vmatpush.msrb.mxu3 %v1944_v14 }
 0x239   : > { %3447 = vpow2.f32 %v1600_v17  ;;  %v1597_v57 = vadd.f32 1.0, %v3446_v41  ;;  %v1947_v17 = vld [vmem:[%s4048_s16 + $0x178] sm:$0xff]  ;;  %v4634_v41 = vld [vmem:[%s4048_s16 + $0x3e8] sm:$0xff] }
 0x23a   : > { %3449 = vpow2.f32 %v1606_v55  ;;  %v1943_v55 = vld [vmem:[%s4048_s16 + $0x158] sm:$0xff]  ;;  %1969 = vmatpush.msrb.mxu3 %v1940_v45  ;;  %v4744_v45 = vld [vmem:[%s4048_s16 + $0x288] sm:$0xff] }
 0x23b   : > { %3451 = vrcp.f32 %v1597_v57  ;;  %v4641_v57 = vld [vmem:[%s4048_s16 + $0x3c0] sm:$0xff] }
 0x23c   : > { %3453 = vtanh.f32 %v1592_v63  ;;  %v1936_v63 = vld [vmem:[%s4048_s16 + $0x120] sm:$0xff] }
 0x23d   : > { %1970 = vmatpush.msrb.mxu3 %v1936_v63 }
 0x23f   : > { %v3448_v3 = vpop.eup %3447  ;;  %1971 = vmatpush.msrb.mxu3 %v1932_v8  ;;  %v4751_v8 = vld [vmem:[%s4048_s16 + $0x260] sm:$0xff] }
 0x240   : > { %v1602_v4 = vadd.f32 1.0, %v3448_v3  ;;  %v3450_v15 = vpop.eup %3449  ;;  %v1939_v3 = vld [vmem:[%s4048_s16 + $0x138] sm:$0xff] }
 0x241   : > { %v3452_v18 = vpop.eup %3451  ;;  %v1608_v1 = vadd.f32 1.0, %v3450_v15  ;;  %v4662_v15 = vld [vmem:[%s4048_s16 + $0x380] sm:$0xff] }
 0x242   : > { %3455 = vrcp.f32 %v1602_v4  ;;  %v3454_v26 = vpop.eup %3453  ;;  %v4651_v4 = vld [vmem:[%s4048_s16 + $0x3a0] sm:$0xff] }
 0x243   : > { %v1614_v36 = vmul.f32 %v3454_v26, %v3452_v18  ;;  %3457 = vrcp.f32 %v1608_v1  ;;  %v4665_v18 = vld [vmem:[%s4048_s16 + $0x388] sm:$0xff]  ;;  %v1928_v26 = vld [vmem:[%s4048_s16 + $0xe0] sm:$0xff] }
 0x244   : > { %1972 = vmatpush.msrb.mxu3 %v1928_v26  ;;  %v1665_v26 = vld [vmem:[#allocation2 + $0x18] sm:$0x30] }
 0x248   : > { %v3456_v62 = vpop.eup %3455 }
 0x249   : > { %v1613_v33 = vmul.f32 %v3456_v62, %v1611_v25  ;;  %v3458_v53 = vpop.eup %3457  ;;  %v1931_v25 = vld [vmem:[%s4048_s16 + $0xf8] sm:$0xff]  ;;  %v4672_v62 = vld [vmem:[%s4048_s16 + $0x360] sm:$0xff] }
 0x24b   : > { %v4589_v49 = vadd.f32 %v1614_v36, %v1613_v33  ;;  %v4675_v33 = vld [vmem:[%s4048_s16 + $0x368] sm:$0xff] }
 0x24d   : > { %3459 = vtanh.f32 %v4589_v49 }
 0x253   : > { %v3460_v19 = vpop.eup %3459 }
 0x254   : > { %v1617_v59 = vmul.f32 %v3460_v19, %v3458_v53  ;;  %v1924_v53 = vld [vmem:[%s4048_s16 + $0xc0] sm:$0xff]  ;;  %v1927_v19 = vld [vmem:[%s4048_s16 + $0xd8] sm:$0xff] }
 0x255   : > { %1973 = vmatpush.msrb.mxu3 %v1924_v53  ;;  %v4762_v53 = vld [vmem:[%s4048_s16 + $0x248] sm:$0xff] }
 0x256   : > { %v1639_v22 = vrot.slane %v1617_v59, 2  ;;  %v4682_v59 = vld [vmem:[%s4048_s16 + $0x340] sm:$0xff] }
 0x258   : > { %1657 = vmatmul.f32.vlgmr.msra.gmra.mxu1 %v1639_v22  ;;  %1747 = vmatmul.f32.vlgmr.msra.gmra.mxu2 %v1639_v22 }
 0x259   : > { %1767 = vmatmul.f32.vlgmr.msra.gmra.mxu3 %v1639_v22  ;;  %1787 = vmatmul.f32.vlgmr.msrb.gmra.mxu0 %v1639_v22 }
 0x25a   : > { %2004 = vmatpush.msra.mxu1 %v1962_v32  ;;  %2024 = vmatpush.msra.mxu2 %v1963_v34  ;;  %v1920_v32 = vld [vmem:[%s4048_s16 + $0xa0] sm:$0xff]  ;;  %v4724_v34 = vld [vmem:[%s4048_s16 + $0x2c8] sm:$0xff] }
 0x25b   : > { %2198 = vmatpush.msrb.mxu0 %v4631_v61  ;;  %1974 = vmatpush.msrb.mxu3 %v1920_v32  ;;  %v4767_v32 = vld [vmem:[%s4048_s16 + $0x220] sm:$0xff] }
 0x25c   : > { %2005 = vmatpush.msra.mxu1 %v1958_v43  ;;  %2025 = vmatpush.msra.mxu2 %v1959_v46  ;;  %v1923_v43 = vld [vmem:[%s4048_s16 + $0xb8] sm:$0xff]  ;;  %v1904_v46 = vld [vmem:[%s4048_s16 + $0x20] sm:$0xff] }
 0x25d   : > { %2199 = vmatpush.msrb.mxu0 %v4641_v57  ;;  %1975 = vmatpush.msrb.mxu3 %v1916_v44 }
 0x25e   : > { %2006 = vmatpush.msra.mxu1 %v1954_v37  ;;  %2026 = vmatpush.msra.mxu2 %v1955_v56  ;;  %v4693_v37 = vld [vmem:[%s4048_s16 + $0x320] sm:$0xff] }
 0x25f   : > { %2200 = vmatpush.msrb.mxu0 %v4651_v4  ;;  %1976 = vmatpush.msrb.mxu3 %v1912_v16  ;;  %v4731_v56 = vld [vmem:[%s4048_s16 + $0x2a0] sm:$0xff] }
 0x260   : > { %1807 = vmatmul.f32.vlgmr.msrb.gmra.mxu1 %v1639_v22  ;;  %2027 = vmatpush.msra.mxu2 %v1951_v9  ;;  %v4685_v22 = vld [vmem:[%s4048_s16 + $0x348] sm:$0xff]  ;;  %v1900_v9 = vld [vmem:[%s4048_s16] sm:$0xff] }
 0x261   : > { %2007 = vmatpush.msra.mxu1 %v1950_v42  ;;  %2201 = vmatpush.msrb.mxu0 %v4662_v15  ;;  %v4696_v42 = vld [vmem:[%s4048_s16 + $0x328] sm:$0xff] }
 0x262   : > { %2028 = vmatpush.msra.mxu2 %v1947_v17  ;;  %v4741_v17 = vld [vmem:[%s4048_s16 + $0x280] sm:$0xff] }
 0x263   : > { %2008 = vmatpush.msra.mxu1 %v1946_v50  ;;  %2202 = vmatpush.msrb.mxu0 %v4672_v62  ;;  %v1919_v50 = vld [vmem:[%s4048_s16 + $0x98] sm:$0xff] }
 0x264   : > { %2029 = vmatpush.msra.mxu2 %v1943_v55 }
 0x265   : > { %2009 = vmatpush.msra.mxu1 %v1942_v12  ;;  %2203 = vmatpush.msrb.mxu0 %v4682_v59  ;;  %v4706_v12 = vld [vmem:[%s4048_s16 + $0x308] sm:$0xff] }
 0x266   : > { %2030 = vmatpush.msra.mxu2 %v1939_v3 }
 0x267   : > { %2010 = vmatpush.msra.mxu1 %v1938_v20  ;;  %2204 = vmatpush.msrb.mxu0 %v4693_v37 }
 0x268   : > { %2031 = vmatpush.msra.mxu2 %v1935_v11  ;;  %v4754_v11 = vld [vmem:[%s4048_s16 + $0x268] sm:$0xff] }
 0x269   : > { %2011 = vmatpush.msra.mxu1 %v1934_v6  ;;  %v4711_v6 = vld [vmem:[%s4048_s16 + $0x2e0] sm:$0xff]  ;;  %2205 = vmatpush.msrb.mxu0 %v4703_v52 }
 0x26a   : > { %2032 = vmatpush.msra.mxu2 %v1931_v25 }
 0x26b   : > { %2012 = vmatpush.msra.mxu1 %v1930_v21  ;;  %2206 = vmatpush.msrb.mxu0 %v4711_v6 }
 0x26c   : > { %2033 = vmatpush.msra.mxu2 %v1927_v19 }
 0x26d   : > { %2013 = vmatpush.msra.mxu1 %v1926_v27  ;;  %v1908_v27 = vld [vmem:[%s4048_s16 + $0x40] sm:$0xff]  ;;  %2207 = vmatpush.msrb.mxu0 %v4721_v30 }
 0x26e   : > { %2034 = vmatpush.msra.mxu2 %v1923_v43  ;;  %1977 = vmatpush.msrb.mxu3 %v1908_v27  ;;  %v4770_v43 = vld [vmem:[%s4048_s16 + $0x228] sm:$0xff] }
 0x26f   : > { %2014 = vmatpush.msra.mxu1 %v1922_v23  ;;  %v1663_v23 = vld [vmem:[#allocation2 + $0x30] sm:$0x30]  ;;  %2208 = vmatpush.msrb.mxu0 %v4731_v56 }
 0x270   : > { %2035 = vmatpush.msra.mxu2 %v1919_v50  ;;  %1978 = vmatpush.msrb.mxu3 %v1904_v46 }
 0x271   : > { %2015 = vmatpush.msra.mxu1 %v1918_v29  ;;  %2209 = vmatpush.msrb.mxu0 %v4741_v17 }
 0x272   : > { %2036 = vmatpush.msra.mxu2 %v1915_v38  ;;  %1979 = vmatpush.msrb.mxu3 %v1900_v9  ;;  %v4778_v38 = vld [vmem:[%s4048_s16 + $0x208] sm:$0xff]  ;;  %v4796_v9 = vld [vmem:[%s4048_s16 + $0x3b0] sm:$0xff] }
 0x273   : > { %2016 = vmatpush.msra.mxu1 %v1914_v39  ;;  %v1664_v39 = vld [vmem:[#allocation2] sm:$0x30]  ;;  %2210 = vmatpush.msrb.mxu0 %v4751_v8 }
 0x274   : > { %2037 = vmatpush.msra.mxu2 %v1911_v28  ;;  %v1844_v28 = vrot.slane %v4589_v49, 6  ;;  %v4787_v49 = vld [vmem:[%s4048_s16 + $0x3f0] sm:$0xff] }
 0x275   : > { %2017 = vmatpush.msra.mxu1 %v1910_v2 }
 0x276   : > { %2038 = vmatpush.msra.mxu2 %v1907_v47 }
 0x277   : > { %2018 = vmatpush.msra.mxu1 %v1906_v58 }
 0x278   : > { %2039 = vmatpush.msra.mxu2 %v1903_v10  ;;  %v2097_v10 = vld [vmem:[%s4424_s7 + $0x68] sm:$0xff] }
 0x279   : > { %2019 = vmatpush.msra.mxu1 %v1902_v13 }
 0x27b   : > { %2218 = vmatpush.msrb.mxu1 %v4634_v41 }
 0x27d   : > { %2219 = vmatpush.msrb.mxu1 %v4644_v60 }
 0x27f   : > { %2220 = vmatpush.msrb.mxu1 %v4655_v7 }
 0x281   : > { %2221 = vmatpush.msrb.mxu1 %v4665_v18 }
 0x283   : > { %2222 = vmatpush.msrb.mxu1 %v4675_v33 }
 0x285   : > { %2223 = vmatpush.msrb.mxu1 %v4685_v22 }
 0x287   : > { %2224 = vmatpush.msrb.mxu1 %v4696_v42 }
 0x289   : > { %2225 = vmatpush.msrb.mxu1 %v4706_v12 }
 0x28b   : > { %2226 = vmatpush.msrb.mxu1 %v4714_v31 }
 0x28d   : > { %2227 = vmatpush.msrb.mxu1 %v4724_v34 }
 0x28f   : > { %2228 = vmatpush.msrb.mxu1 %v4734_v54 }
 0x291   : > { %2229 = vmatpush.msrb.mxu1 %v4744_v45 }
 0x293   : > { %2230 = vmatpush.msrb.mxu1 %v4754_v11 }
 0x295   : > { %2231 = vmatpush.msrb.mxu1 %v4762_v53 }
 0x297   : > { %2232 = vmatpush.msrb.mxu1 %v4770_v43 }
 0x299   : > { %2233 = vmatpush.msrb.mxu1 %v4778_v38 }
 0x2d5   : > { %v1658_v1 = vpop.f32.mrf.mxu1 }
 0x2d6   : > { %v1659_v36 = vadd.f32 %v3426_v5, %v1658_v1  ;;  %v1788_v13 = vpop.f32.mrf.mxu0 }
 0x2d7   : > { %v1817_v5 = vrot.slane %v1788_v13, 4  ;;  %v4802_v13 = vld [vmem:[%s4048_s16 + $0x390] sm:$0xff] }
 0x2d8   : > { %3145 = vst [vmem:[%s4581_s11 + $0x2] sm:$0x3] %v1659_v36  ;;  %v4759_v36 = vld [vmem:[%s4048_s16 + $0x240] sm:$0xff] }
 0x2d9   : > { %v1825_v1 = vadd.f32 %v1817_v5, %v1665_v26  ;;  %2211 = vmatpush.msrb.mxu0 %v4759_v36  ;;  %v4834_v5 = vld [vmem:[%s4048_s16 + $0x2d0] sm:$0xff]  ;;  %v4918_v26 = vld [vmem:[%s4048_s16 + $0x378] sm:$0xff] }
 0x2db   : > { %v1748_v20 = vpop.f32.mrf.mxu2  ;;  %2212 = vmatpush.msrb.mxu0 %v4767_v32 }
 0x2dc   : > { %v1815_v21 = vrot.slane %v1748_v20, 4  ;;  %v1768_v48 = vpop.f32.mrf.mxu3  ;;  %v4775_v20 = vld [vmem:[%s4048_s16 + $0x200] sm:$0xff] }
 0x2dd   : > { %v1816_v24 = vrot.slane %v1768_v48, 4  ;;  %v1808_v29 = vpop.f32.mrf.mxu1  ;;  %2213 = vmatpush.msrb.mxu0 %v4775_v20 }
 0x2de   : > { %v1823_v35 = vadd.f32 %v1815_v21, %v1663_v23  ;;  %v1818_v40 = vrot.slane %v1808_v29, 4 }
 0x2df   : > { %v1824_v2 = vadd.f32 %v1816_v24, %v1664_v39 }
 0x2e0   : > { %v1827_v58 = vsub.f32 0.0, %v1823_v35  ;;  %v1826_v0 = vadd.f32 %v1818_v40, %v1666_v51  ;;  %v4790_v51 = vld [vmem:[%s4048_s16 + $0x3d0] sm:$0xff] }
 0x2e1   : > { %v1832_v14 = vsub.f32 0.0, %v1824_v2 }
 0x2e2   : > { %v1828_v55 = vmul.f32 1.442695, %v1827_v58  ;;  %v1838_v3 = vsub.f32 0.0, %v1826_v0  ;;  %v2099_v58 = vld [vmem:[%s4424_s7 + $0x78] sm:$0xff]  ;;  %v2098_v0 = vld [vmem:[%s4424_s7 + $0x70] sm:$0xff] }
 0x2e3   : > { %v1833_v63 = vmul.f32 1.442695, %v1832_v14  ;;  %2107 = vmatpush.msra.mxu3 %v2099_v58  ;;  %v2096_v14 = vld [vmem:[%s4424_s7 + $0x60] sm:$0xff] }
 0x2e4   : > { %3461 = vpow2.f32 %v1828_v55  ;;  %v1839_v25 = vmul.f32 1.442695, %v1838_v3  ;;  %v4808_v55 = vld [vmem:[%s4048_s16 + $0x370] sm:$0xff] }
 0x2e5   : > { %3463 = vpow2.f32 %v1833_v63  ;;  %2108 = vmatpush.msra.mxu3 %v2098_v0  ;;  %v4814_v63 = vld [vmem:[%s4048_s16 + $0x350] sm:$0xff] }
 0x2e6   : > { %3465 = vpow2.f32 %v1839_v25  ;;  %v4829_v3 = vld [vmem:[%s4048_s16 + $0x2f0] sm:$0xff] }
 0x2e7   : > { %3467 = vtanh.f32 %v1825_v1  ;;  %2109 = vmatpush.msra.mxu3 %v2097_v10  ;;  %v1897_v1 = vld [vmem:[#allocation2] sm:$0xc0]  ;;  %v1899_v10 = vld [vmem:[#allocation2 + $0x10] sm:$0xc0] }
 0x2e9   : > { %2110 = vmatpush.msra.mxu3 %v2096_v14  ;;  %v4952_v14 = vld [vmem:[%s4048_s16 + $0x278] sm:$0xff] }
 0x2ea   : > { %v3462_v19 = vpop.eup %3461 }
 0x2eb   : > { %v3464_v44 = vpop.eup %3463  ;;  %v1830_v50 = vadd.f32 1.0, %v3462_v19 }
 0x2ec   : > { %v1835_v16 = vadd.f32 1.0, %v3464_v44  ;;  %v3466_v21 = vpop.eup %3465 }
 0x2ed   : > { %3469 = vrcp.f32 %v1830_v50  ;;  %v3468_v48 = vpop.eup %3467  ;;  %v1841_v29 = vadd.f32 1.0, %v3466_v21 }
 0x2ee   : > { %3471 = vrcp.f32 %v1835_v16 }
 0x2ef   : > { %3473 = vrcp.f32 %v1841_v29 }
 0x2f3   : > { %v3470_v27 = vpop.eup %3469 }
 0x2f4   : > { %v3472_v23 = vpop.eup %3471  ;;  %v1847_v24 = vmul.f32 %v3470_v27, %v3468_v48  ;;  %v1896_v48 = vld [vmem:[#allocation2 + $0x30] sm:$0xc0] }
 0x2f5   : > { %v1846_v35 = vmul.f32 %v3472_v23, %v1844_v28  ;;  %v3474_v40 = vpop.eup %3473  ;;  %v4936_v28 = vld [vmem:[%s4048_s16 + $0x2f8] sm:$0xff] }
 0x2f7   : > { %v4783_v39 = vadd.f32 %v1847_v24, %v1846_v35  ;;  %v4940_v24 = vld [vmem:[%s4048_s16 + $0x2d8] sm:$0xff] }
 0x2f9   : > { %3475 = vtanh.f32 %v4783_v39 }
 0x2ff   : > { %v3476_v46 = vpop.eup %3475 }
 0x300   : > { %v1850_v47 = vmul.f32 %v3476_v46, %v3474_v40  ;;  %v4944_v40 = vld [vmem:[%s4048_s16 + $0x2b8] sm:$0xff] }
 0x302   : > { %v1872_v2 = vrot.slane %v1850_v47, 4 }
 0x304   : > { %1890 = vmatmul.f32.vlgmr.msrb.gmra.mxu2 %v1872_v2  ;;  %1980 = vmatmul.f32.vlgmr.msrb.gmra.mxu3 %v1872_v2 }
 0x305   : > { %2000 = vmatmul.f32.vlgmr.msra.gmra.mxu0 %v1872_v2  ;;  %2020 = vmatmul.f32.vlgmr.msra.gmra.mxu1 %v1872_v2 }
 0x306   : > { %2238 = vmatpush.msrb.mxu2 %v4787_v49  ;;  %2425 = vmatpush.msra.mxu1 %v4631_v61  ;;  %v5338_v61 = vmov 0.0  }
 0x308   : > { %2239 = vmatpush.msrb.mxu2 %v4790_v51  ;;  %2426 = vmatpush.msra.mxu1 %v4641_v57  ;;  %v4819_v57 = vld [vmem:[%s4048_s16 + $0x330] sm:$0xff] }
 0x30a   : > { %2240 = vmatpush.msrb.mxu2 %v4796_v9  ;;  %2427 = vmatpush.msra.mxu1 %v4651_v4  ;;  %v4824_v4 = vld [vmem:[%s4048_s16 + $0x310] sm:$0xff] }
 0x30c   : > { %2241 = vmatpush.msrb.mxu2 %v4802_v13  ;;  %2428 = vmatpush.msra.mxu1 %v4662_v15  ;;  %v4839_v15 = vld [vmem:[%s4048_s16 + $0x2b0] sm:$0xff] }
 0x30d   : > { %2040 = vmatmul.f32.vlgmr.msra.gmra.mxu2 %v1872_v2  ;;  %2214 = vmatmul.f32.vlgmr.msrb.gmra.mxu0 %v5338_v61  ;;  %v4948_v2 = vld [vmem:[%s4048_s16 + $0x298] sm:$0xff] }
 0x30e   : > { %2234 = vmatmul.f32.vlgmr.msrb.gmra.mxu1 %v5338_v61  ;;  %2242 = vmatpush.msrb.mxu2 %v4808_v55 }
 0x30f   : > { %2429 = vmatpush.msra.mxu1 %v4672_v62  ;;  %v4844_v62 = vld [vmem:[%s4048_s16 + $0x290] sm:$0xff] }
 0x310   : > { %2243 = vmatpush.msrb.mxu2 %v4814_v63 }
 0x311   : > { %2430 = vmatpush.msra.mxu1 %v4682_v59  ;;  %v4849_v59 = vld [vmem:[%s4048_s16 + $0x270] sm:$0xff] }
 0x312   : > { %2244 = vmatpush.msrb.mxu2 %v4819_v57 }
 0x313   : > { %2431 = vmatpush.msra.mxu1 %v4693_v37  ;;  %v4854_v37 = vld [vmem:[%s4048_s16 + $0x250] sm:$0xff] }
 0x314   : > { %2245 = vmatpush.msrb.mxu2 %v4824_v4 }
 0x315   : > { %2432 = vmatpush.msra.mxu1 %v4703_v52  ;;  %v4859_v52 = vld [vmem:[%s4048_s16 + $0x230] sm:$0xff] }
 0x316   : > { %2246 = vmatpush.msrb.mxu2 %v4829_v3 }
 0x317   : > { %2433 = vmatpush.msra.mxu1 %v4711_v6  ;;  %v4864_v6 = vld [vmem:[%s4048_s16 + $0x210] sm:$0xff] }
 0x318   : > { %2247 = vmatpush.msrb.mxu2 %v4834_v5 }
 0x319   : > { %2434 = vmatpush.msra.mxu1 %v4721_v30  ;;  %v2086_v30 = vld [vmem:[%s4424_s7 + $0x10] sm:$0xff] }
 0x31a   : > { %2248 = vmatpush.msrb.mxu2 %v4839_v15 }
 0x31b   : > { %2435 = vmatpush.msra.mxu1 %v4731_v56  ;;  %v2084_v56 = vld [vmem:[%s4424_s7] sm:$0xff] }
 0x31c   : > { %2249 = vmatpush.msrb.mxu2 %v4844_v62 }
 0x31d   : > { %2436 = vmatpush.msra.mxu1 %v4741_v17  ;;  %v4906_v17 = vld [vmem:[%s4048_s16 + $0x3d8] sm:$0xff] }
 0x31e   : > { %2250 = vmatpush.msrb.mxu2 %v4849_v59 }
 0x31f   : > { %2437 = vmatpush.msra.mxu1 %v4751_v8  ;;  %v4914_v8 = vld [vmem:[%s4048_s16 + $0x398] sm:$0xff] }
 0x320   : > { %2251 = vmatpush.msrb.mxu2 %v4854_v37 }
 0x321   : > { %2438 = vmatpush.msra.mxu1 %v4759_v36  ;;  %v3427_v36 = vld [vmem:[%s4393_s27] ss:$0 sm:$0xff] }
 0x322   : > { %2252 = vmatpush.msrb.mxu2 %v4859_v52 }
 0x323   : > { %2439 = vmatpush.msra.mxu1 %v4767_v32  ;;  %v4927_v32 = vld [vmem:[%s4048_s16 + $0x338] sm:$0xff] }
 0x324   : > { %2253 = vmatpush.msrb.mxu2 %v4864_v6 }
 0x325   : > { %2254 = vmatmul.f32.vlgmr.msrb.gmra.mxu2 %v5338_v61  ;;  %2440 = vmatpush.msra.mxu1 %v4775_v20 }
 0x326   : > { %2445 = vmatpush.msra.mxu2 %v4634_v41  ;;  %v2095_v41 = vld [vmem:[%s4424_s7 + $0x58] sm:$0xff] }
 0x327   : > { %2111 = vmatpush.msra.mxu3 %v2095_v41 }
 0x328   : > { %2446 = vmatpush.msra.mxu2 %v4644_v60  ;;  %v2094_v60 = vld [vmem:[%s4424_s7 + $0x50] sm:$0xff] }
 0x329   : > { %2112 = vmatpush.msra.mxu3 %v2094_v60  ;;  %v1898_v60 = vld [vmem:[#allocation2 + $0x18] sm:$0xc0] }
 0x32a   : > { %2447 = vmatpush.msra.mxu2 %v4655_v7  ;;  %v2093_v7 = vld [vmem:[%s4424_s7 + $0x48] sm:$0xff] }
 0x32b   : > { %2113 = vmatpush.msra.mxu3 %v2093_v7 }
 0x32c   : > { %2448 = vmatpush.msra.mxu2 %v4665_v18  ;;  %v2092_v18 = vld [vmem:[%s4424_s7 + $0x40] sm:$0xff] }
 0x32d   : > { %2114 = vmatpush.msra.mxu3 %v2092_v18 }
 0x32e   : > { %2449 = vmatpush.msra.mxu2 %v4675_v33  ;;  %v2091_v33 = vld [vmem:[%s4424_s7 + $0x38] sm:$0xff] }
 0x32f   : > { %2115 = vmatpush.msra.mxu3 %v2091_v33  ;;  %v4956_v33 = vld [vmem:[%s4048_s16 + $0x258] sm:$0xff] }
 0x330   : > { %2450 = vmatpush.msra.mxu2 %v4685_v22  ;;  %v2090_v22 = vld [vmem:[%s4424_s7 + $0x30] sm:$0xff] }
 0x331   : > { %2116 = vmatpush.msra.mxu3 %v2090_v22 }
 0x332   : > { %2451 = vmatpush.msra.mxu2 %v4696_v42  ;;  %v2089_v42 = vld [vmem:[%s4424_s7 + $0x28] sm:$0xff] }
 0x333   : > { %2117 = vmatpush.msra.mxu3 %v2089_v42 }
 0x334   : > { %2452 = vmatpush.msra.mxu2 %v4706_v12  ;;  %v2088_v12 = vld [vmem:[%s4424_s7 + $0x20] sm:$0xff] }
 0x335   : > { %2118 = vmatpush.msra.mxu3 %v2088_v12  ;;  %v4960_v12 = vld [vmem:[%s4048_s16 + $0x238] sm:$0xff] }
 0x336   : > { %2453 = vmatpush.msra.mxu2 %v4714_v31  ;;  %v2087_v31 = vld [vmem:[%s4424_s7 + $0x18] sm:$0xff] }
 0x337   : > { %2119 = vmatpush.msra.mxu3 %v2087_v31 }
 0x338   : > { %2454 = vmatpush.msra.mxu2 %v4724_v34  ;;  %v2085_v34 = vld [vmem:[%s4424_s7 + $0x8] sm:$0xff] }
 0x339   : > { %2120 = vmatpush.msra.mxu3 %v2086_v30 }
 0x33a   : > { %2455 = vmatpush.msra.mxu2 %v4734_v54  ;;  %v4902_v54 = vld [vmem:[%s4048_s16 + $0x3f8] sm:$0xff] }
 0x33b   : > { %2121 = vmatpush.msra.mxu3 %v2085_v34  ;;  %v4964_v34 = vld [vmem:[%s4048_s16 + $0x218] sm:$0xff] }
 0x33c   : > { %2456 = vmatpush.msra.mxu2 %v4744_v45  ;;  %v4910_v45 = vld [vmem:[%s4048_s16 + $0x3b8] sm:$0xff] }
 0x33d   : > { %2122 = vmatpush.msra.mxu3 %v2084_v56  ;;  %v4967_v56 = vld [vmem:[%s4424_s7 + $0xf8] sm:$0xff] }
 0x33e   : > { %2457 = vmatpush.msra.mxu2 %v4754_v11  ;;  %2334 = vmatpush.msra.mxu0 %v4967_v56 }
 0x33f   : > { %2258 = vmatpush.msrb.mxu3 %v4902_v54  ;;  %2564 = vmatpush.msrb.mxu1 %v4967_v56 }
 0x340   : > { %2458 = vmatpush.msra.mxu2 %v4762_v53  ;;  %v4923_v53 = vld [vmem:[%s4048_s16 + $0x358] sm:$0xff] }
 0x341   : > { %2259 = vmatpush.msrb.mxu3 %v4906_v17 }
 0x342   : > { %2459 = vmatpush.msra.mxu2 %v4770_v43 }
 0x343   : > { %2260 = vmatpush.msrb.mxu3 %v4910_v45 }
 0x344   : > { %2460 = vmatpush.msra.mxu2 %v4778_v38  ;;  %v4931_v38 = vld [vmem:[%s4048_s16 + $0x318] sm:$0xff] }
 0x345   : > { %2261 = vmatpush.msrb.mxu3 %v4914_v8 }
 0x347   : > { %2262 = vmatpush.msrb.mxu3 %v4918_v26 }
 0x349   : > { %2263 = vmatpush.msrb.mxu3 %v4923_v53 }
 0x34b   : > { %2264 = vmatpush.msrb.mxu3 %v4927_v32 }
 0x34d   : > { %2265 = vmatpush.msrb.mxu3 %v4931_v38 }
 0x34f   : > { %2266 = vmatpush.msrb.mxu3 %v4936_v28 }
 0x351   : > { %2267 = vmatpush.msrb.mxu3 %v4940_v24 }
 0x353   : > { %2268 = vmatpush.msrb.mxu3 %v4944_v40 }
 0x355   : > { %2269 = vmatpush.msrb.mxu3 %v4948_v2 }
 0x357   : > { %2270 = vmatpush.msrb.mxu3 %v4952_v14 }
 0x359   : > { %2271 = vmatpush.msrb.mxu3 %v4956_v33 }
 0x35b   : > { %2272 = vmatpush.msrb.mxu3 %v4960_v12 }
 0x35d   : > { %2273 = vmatpush.msrb.mxu3 %v4964_v34 }
 0x382   : > { %v2001_v11 = vpop.f32.mrf.mxu0  ;;  %v2021_v29 = vpop.f32.mrf.mxu1 }
 0x383   : > { %v2049_v25 = vrot.slane %v2001_v11, 2  ;;  %v2050_v46 = vrot.slane %v2021_v29, 2  ;;  %v4970_v11 = vld [vmem:[%s4424_s7 + $0xf0] sm:$0xff]  ;;  %v5001_v29 = vld [vmem:[%s4424_s7 + $0xc0] sm:$0xff] }
 0x384   : > { %2335 = vmatpush.msra.mxu0 %v4970_v11  ;;  %2565 = vmatpush.msrb.mxu1 %v4970_v11 }
 0x385   : > { %v2057_v19 = vadd.f32 %v2049_v25, %v1897_v1  ;;  %v2058_v18 = vadd.f32 %v2050_v46, %v1898_v60  ;;  %v4975_v25 = vld [vmem:[%s4424_s7 + $0xe8] sm:$0xff]  ;;  %v4980_v1 = vld [vmem:[%s4424_s7 + $0xe0] sm:$0xff]  ;;  %v5044_v60 = vld [vmem:[%s4424_s7 + $0x98] sm:$0xff] }
 0x386   : > { %2336 = vmatpush.msra.mxu0 %v4975_v25  ;;  %2566 = vmatpush.msrb.mxu1 %v4975_v25 }
 0x387   : > { %v2065_v43 = vsub.f32 0.0, %v2057_v19  ;;  %v1891_v44 = vpop.f32.mrf.mxu2  ;;  %v1981_v50 = vpop.f32.mrf.mxu3 }
 0x388   : > { %v1892_v16 = vadd.f32 %v3427_v36, %v1891_v44  ;;  %v2048_v20 = vrot.slane %v1981_v50, 2  ;;  %v4986_v44 = vld [vmem:[%s4424_s7 + $0xd8] sm:$0xff]  ;;  %2337 = vmatpush.msra.mxu0 %v4980_v1  ;;  %2567 = vmatpush.msrb.mxu1 %v4980_v1 }
 0x389   : > { %v2066_v21 = vmul.f32 1.442695, %v2065_v43  ;;  %v2077_v43 = vrot.slane %v4783_v39, 6 }
 0x38a   : > { %3146 = vst [vmem:[%s4581_s11 + $0x4] sm:$0x3] %v1892_v16  ;;  %v2056_v27 = vadd.f32 %v2048_v20, %v1896_v48  ;;  %v4991_v48 = vld [vmem:[%s4424_s7 + $0xd0] sm:$0xff]  ;;  %2338 = vmatpush.msra.mxu0 %v4986_v44  ;;  %2568 = vmatpush.msrb.mxu1 %v4986_v44 }
 0x38b   : > { %3477 = vpow2.f32 %v2066_v21 }
 0x38c   : > { %v2060_v23 = vsub.f32 0.0, %v2056_v27  ;;  %2339 = vmatpush.msra.mxu0 %v4991_v48  ;;  %2569 = vmatpush.msrb.mxu1 %v4991_v48 }
 0x38e   : > { %v2061_v35 = vmul.f32 1.442695, %v2060_v23  ;;  %v4996_v23 = vld [vmem:[%s4424_s7 + $0xc8] sm:$0xff] }
 0x38f   : > { %2340 = vmatpush.msra.mxu0 %v4996_v23  ;;  %2570 = vmatpush.msrb.mxu1 %v4996_v23 }
 0x390   : > { %3479 = vpow2.f32 %v2061_v35  ;;  %v2041_v47 = vpop.f32.mrf.mxu2  ;;  %v5006_v35 = vld [vmem:[%s4424_s7 + $0xb8] sm:$0xff] }
 0x391   : > { %v3478_v58 = vpop.eup %3477  ;;  %v2051_v0 = vrot.slane %v2041_v47, 2  ;;  %2341 = vmatpush.msra.mxu0 %v5001_v29  ;;  %2571 = vmatpush.msrb.mxu1 %v5001_v29 }
 0x392   : > { %v2068_v41 = vadd.f32 1.0, %v3478_v58 }
 0x393   : > { %v2059_v7 = vadd.f32 %v2051_v0, %v1899_v10  ;;  %2342 = vmatpush.msra.mxu0 %v5006_v35  ;;  %2572 = vmatpush.msrb.mxu1 %v5006_v35  ;;  %v5034_v10 = vld [vmem:[%s4424_s7 + $0xa8] sm:$0xff] }
 0x394   : > { %3481 = vrcp.f32 %v2068_v41  ;;  %v5039_v41 = vld [vmem:[%s4424_s7 + $0xa0] sm:$0xff] }
 0x395   : > { %v2071_v22 = vsub.f32 0.0, %v2059_v7  ;;  %3483 = vtanh.f32 %v2058_v18  ;;  %v2215_v7 = vpop.f32.mrf.mxu0  ;;  %v2235_v18 = vpop.f32.mrf.mxu1 }
 0x396   : > { %v3480_v42 = vpop.eup %3479 }
 0x397   : > { %v2063_v31 = vadd.f32 1.0, %v3480_v42  ;;  %v2072_v30 = vmul.f32 1.442695, %v2071_v22  ;;  %v5051_v22 = vld [vmem:[%s4424_s7 + $0x90] sm:$0xff]  ;;  %v2282_v42 = vrot.slane %v2215_v7, 2 }
 0x399   : > { %3485 = vrcp.f32 %v2063_v31  ;;  %v2283_v31 = vrot.slane %v2235_v18, 2 }
 0x39a   : > { %3487 = vpow2.f32 %v2072_v30  ;;  %v3482_v36 = vpop.eup %3481  ;;  %v5056_v30 = vld [vmem:[%s4424_s7 + $0x88] sm:$0xff] }
 0x39b   : > { %v3484_v19 = vpop.eup %3483  ;;  %v2079_v20 = vmul.f32 %v3482_v36, %v2077_v43  ;;  %v2129_v36 = vld [vmem:[#allocation2 + $0x8] sm:$0xc0] }
 0x39c   : > { %v2290_v43 = vadd.f32 %v2282_v42, %v2129_v36 }
 0x39f   : > { %v3486_v50 = vpop.eup %3485 }
 0x3a0   : > { %v3488_v16 = vpop.eup %3487  ;;  %v2080_v21 = vmul.f32 %v3486_v50, %v3484_v19  ;;  %v5061_v19 = vld [vmem:[%s4424_s7 + $0x80] sm:$0xff] }
 0x3a1   : > { %v2074_v27 = vadd.f32 1.0, %v3488_v16  ;;  %v2130_v50 = vld [vmem:[#allocation2 + $0x20] sm:$0xc0] }
 0x3a2   : > { %v2081_v39 = vadd.f32 %v2080_v21, %v2079_v20  ;;  %v2291_v16 = vadd.f32 %v2283_v31, %v2130_v50  ;;  %v2294_v20 = vsub.f32 0.0, %v2290_v43  ;;  %v2131_v31 = vld [vmem:[#allocation2 + $0x28] sm:$0xc0] }
 0x3a3   : > { %3489 = vrcp.f32 %v2074_v27 }
 0x3a4   : > { %3491 = vtanh.f32 %v2081_v39  ;;  %v2299_v21 = vsub.f32 0.0, %v2291_v16  ;;  %v2295_v27 = vmul.f32 1.442695, %v2294_v20 }
 0x3a6   : > { %v2300_v39 = vmul.f32 1.442695, %v2299_v21  ;;  %3493 = vpow2.f32 %v2295_v27  ;;  %v2132_v21 = vld [vmem:[#allocation2 + $0x38] sm:$0xc0] }
 0x3a8   : > { %3495 = vpow2.f32 %v2300_v39 }
 0x3a9   : > { %v3490_v46 = vpop.eup %3489 }
 0x3aa   : > { %v3492_v47 = vpop.eup %3491 }
 0x3ab   : > { %v2083_v58 = vmul.f32 %v3492_v47, %v3490_v46  ;;  %v2255_v46 = vpop.f32.mrf.mxu2  ;;  %v3428_v47 = vld [vmem:[%s4393_s27] ss:$0 sm:$0xff] }
 0x3ac   : > { %v3494_v18 = vpop.eup %3493 }
 0x3ad   : > { %v2105_v0 = vrot.slane %v2083_v58, 6  ;;  %v2284_v58 = vrot.slane %v2255_v46, 2  ;;  %v2297_v43 = vadd.f32 1.0, %v3494_v18 }
 0x3ae   : > { %v3496_v42 = vpop.eup %3495 }
 0x3af   : > { %2123 = vmatmul.f32.vlgmr.msra.gmra.mxu3 %v2105_v0  ;;  %v2292_v36 = vadd.f32 %v2284_v58, %v2131_v31  ;;  %v2302_v50 = vadd.f32 1.0, %v3496_v42 }
 0x3b0   : > { %2465 = vmatpush.msra.mxu3 %v4787_v49 }
 0x3b1   : > { %3497 = vtanh.f32 %v2292_v36 }
 0x3b2   : > { %2466 = vmatpush.msra.mxu3 %v4790_v51  ;;  %3499 = vrcp.f32 %v2297_v43 }
 0x3b3   : > { %3501 = vrcp.f32 %v2302_v50 }
 0x3b4   : > { %2467 = vmatpush.msra.mxu3 %v4796_v9 }
 0x3b6   : > { %2468 = vmatpush.msra.mxu3 %v4802_v13 }
 0x3b7   : > { %2274 = vmatmul.f32.vlgmr.msrb.gmra.mxu3 %v5338_v61  ;;  %v5031_v61 = vld [vmem:[%s4424_s7 + $0xb0] sm:$0xff]  ;;  %v3498_v46 = vpop.eup %3497 }
 0x3b8   : > { %2469 = vmatpush.msra.mxu3 %v4808_v55  ;;  %2343 = vmatpush.msra.mxu0 %v5031_v61 }
 0x3b9   : > { %2573 = vmatpush.msrb.mxu1 %v5031_v61 }
 0x3ba   : > { %2470 = vmatpush.msra.mxu3 %v4814_v63  ;;  %2344 = vmatpush.msra.mxu0 %v5034_v10 }
 0x3bb   : > { %2574 = vmatpush.msrb.mxu1 %v5034_v10 }
 0x3bc   : > { %2471 = vmatpush.msra.mxu3 %v4819_v57  ;;  %2345 = vmatpush.msra.mxu0 %v5039_v41 }
 0x3bd   : > { %2575 = vmatpush.msrb.mxu1 %v5039_v41 }
 0x3be   : > { %2472 = vmatpush.msra.mxu3 %v4824_v4  ;;  %2346 = vmatpush.msra.mxu0 %v5044_v60 }
 0x3bf   : > { %2576 = vmatpush.msrb.mxu1 %v5044_v60 }
 0x3c0   : > { %2473 = vmatpush.msra.mxu3 %v4829_v3  ;;  %2347 = vmatpush.msra.mxu0 %v5051_v22 }
 0x3c1   : > { %2577 = vmatpush.msrb.mxu1 %v5051_v22 }
 0x3c2   : > { %2474 = vmatpush.msra.mxu3 %v4834_v5  ;;  %2348 = vmatpush.msra.mxu0 %v5056_v30 }
 0x3c3   : > { %2578 = vmatpush.msrb.mxu1 %v5056_v30 }
 0x3c4   : > { %2475 = vmatpush.msra.mxu3 %v4839_v15  ;;  %2349 = vmatpush.msra.mxu0 %v5061_v19 }
 0x3c5   : > { %2579 = vmatpush.msrb.mxu1 %v5061_v19 }
 0x3c6   : > { %2476 = vmatpush.msra.mxu3 %v4844_v62  ;;  %2485 = vmatpush.msrb.mxu0 %v4902_v54 }
 0x3c8   : > { %2477 = vmatpush.msra.mxu3 %v4849_v59  ;;  %2486 = vmatpush.msrb.mxu0 %v4906_v17 }
 0x3ca   : > { %2478 = vmatpush.msra.mxu3 %v4854_v37  ;;  %2487 = vmatpush.msrb.mxu0 %v4910_v45 }
 0x3cc   : > { %2479 = vmatpush.msra.mxu3 %v4859_v52  ;;  %2488 = vmatpush.msrb.mxu0 %v4914_v8 }
 0x3ce   : > { %2480 = vmatpush.msra.mxu3 %v4864_v6  ;;  %2489 = vmatpush.msrb.mxu0 %v4918_v26 }
 0x3d0   : > { %2490 = vmatpush.msrb.mxu0 %v4923_v53 }
 0x3d2   : > { %2491 = vmatpush.msrb.mxu0 %v4927_v32 }
 0x3d4   : > { %2492 = vmatpush.msrb.mxu0 %v4931_v38 }
 0x3d6   : > { %2493 = vmatpush.msrb.mxu0 %v4936_v28 }
 0x3d8   : > { %2494 = vmatpush.msrb.mxu0 %v4940_v24 }
 0x3da   : > { %2495 = vmatpush.msrb.mxu0 %v4944_v40 }
 0x3dc   : > { %2496 = vmatpush.msrb.mxu0 %v4948_v2 }
 0x3de   : > { %2497 = vmatpush.msrb.mxu0 %v4952_v14 }
 0x3e0   : > { %2498 = vmatpush.msrb.mxu0 %v4956_v33 }
 0x3e2   : > { %2499 = vmatpush.msrb.mxu0 %v4960_v12 }
 0x3e4   : > { %2500 = vmatpush.msrb.mxu0 %v4964_v34 }
 0x432   : > { %v2124_v0 = vpop.f32.mrf.mxu3 }
 0x433   : > { %v2125_v7 = vadd.f32 %v3428_v47, %v2124_v0  ;;  %v3500_v47 = vpop.eup %3499 }
 0x434   : > { %v3502_v0 = vpop.eup %3501 }
 0x435   : > { %3147 = vst [vmem:[%s4581_s11 + $0x6] sm:$0x3] %v2125_v7  ;;  %v2311_v7 = vmul.f32 %v3500_v47, %v3498_v46  ;;  %v2310_v18 = vmul.f32 0.0, %v3502_v0  ;;  %v3293_v46 = vld [vmem:[%s4048_s16 + $0x268] sm:$0xff]  ;;  %v2358_v0 = vld [vmem:[#allocation2 + $0x20] sm:$0x30] }
 0x437   : > { %v5083_v42 = vadd.f32 %v2311_v7, %v2310_v18  ;;  %v5185_v18 = vld [vmem:[%s4048_s16 + $0x240] sm:$0xff] }
 0x43a   : > { %v2275_v16 = vpop.f32.mrf.mxu3 }
 0x43b   : > { %v2285_v20 = vrot.slane %v2275_v16, 2 }
 0x43d   : > { %v2293_v27 = vadd.f32 %v2285_v20, %v2132_v21 }
 0x43f   : > { %v2305_v39 = vsub.f32 0.0, %v2293_v27 }
 0x441   : > { %v2306_v58 = vmul.f32 1.442695, %v2305_v39  ;;  %v5180_v39 = vld [vmem:[%s4048_s16 + $0x260] sm:$0xff] }
 0x443   : > { %3503 = vpow2.f32 %v2306_v58 }
 0x444   : > { %3505 = vtanh.f32 %v5083_v42 }
 0x449   : > { %v3504_v31 = vpop.eup %3503 }
 0x44a   : > { %v2308_v36 = vadd.f32 1.0, %v3504_v31  ;;  %v3506_v43 = vpop.eup %3505  ;;  %v3289_v31 = vld [vmem:[%s4048_s16 + $0x248] sm:$0xff] }
 0x44c   : > { %3507 = vrcp.f32 %v2308_v36 }
 0x452   : > { %v3508_v50 = vpop.eup %3507 }
 0x453   : > { %v2314_v16 = vmul.f32 %v3508_v50, %v3506_v43  ;;  %v2360_v43 = vld [vmem:[#allocation2 + $0x38] sm:$0x30] }
 0x455   : > { %v2332_v20 = vrot.slane %v2314_v16, 6  ;;  %v5190_v16 = vld [vmem:[%s4048_s16 + $0x220] sm:$0xff] }
 0x457   : > { %2350 = vmatmul.f32.vlgmr.msra.gmra.mxu0 %v2332_v20  ;;  %2441 = vmatmul.f32.vlgmr.msra.gmra.mxu1 %v2332_v20 }
 0x458   : > { %2461 = vmatmul.f32.vlgmr.msra.gmra.mxu2 %v2332_v20  ;;  %2481 = vmatmul.f32.vlgmr.msra.gmra.mxu3 %v2332_v20 }
 0x459   : > { %2695 = vmatpush.msra.mxu0 %v4787_v49  ;;  %2715 = vmatpush.msra.mxu1 %v4902_v54  ;;  %v5119_v49 = vld [vmem:[%s4048_s16 + $0x3e0] sm:$0xff] }
 0x45a   : > { %2655 = vmatpush.msrb.mxu2 %v5119_v49 }
 0x45b   : > { %2696 = vmatpush.msra.mxu0 %v4790_v51  ;;  %2716 = vmatpush.msra.mxu1 %v4906_v17  ;;  %v3341_v51 = vld [vmem:[%s4048_s16 + $0x3e8] sm:$0xff]  ;;  %v3212_v17 = vld [vmem:[%s4581_s11 + $0x6] sm:$0x3] }
 0x45c   : > { %2675 = vmatpush.msrb.mxu3 %v3341_v51 }
 0x45d   : > { %2697 = vmatpush.msra.mxu0 %v4796_v9  ;;  %2717 = vmatpush.msra.mxu1 %v4910_v45  ;;  %v5124_v9 = vld [vmem:[%s4048_s16 + $0x3c0] sm:$0xff] }
 0x45e   : > { %2656 = vmatpush.msrb.mxu2 %v5124_v9 }
 0x45f   : > { %2501 = vmatmul.f32.vlgmr.msrb.gmra.mxu0 %v2332_v20  ;;  %2718 = vmatpush.msra.mxu1 %v4914_v8  ;;  %v3285_v20 = vld [vmem:[%s4048_s16 + $0x228] sm:$0xff] }
 0x460   : > { %2698 = vmatpush.msra.mxu0 %v4802_v13  ;;  %v3337_v13 = vld [vmem:[%s4048_s16 + $0x3c8] sm:$0xff] }
 0x461   : > { %2719 = vmatpush.msra.mxu1 %v4918_v26  ;;  %2676 = vmatpush.msrb.mxu3 %v3337_v13 }
 0x462   : > { %2699 = vmatpush.msra.mxu0 %v4808_v55  ;;  %v5129_v55 = vld [vmem:[%s4048_s16 + $0x3a0] sm:$0xff] }
 0x463   : > { %2720 = vmatpush.msra.mxu1 %v4923_v53  ;;  %2657 = vmatpush.msrb.mxu2 %v5129_v55  ;;  %v5160_v53 = vld [vmem:[%s4048_s16 + $0x2e0] sm:$0xff] }
 0x464   : > { %2700 = vmatpush.msra.mxu0 %v4814_v63  ;;  %v3333_v63 = vld [vmem:[%s4048_s16 + $0x3a8] sm:$0xff] }
 0x465   : > { %2721 = vmatpush.msra.mxu1 %v4927_v32  ;;  %2677 = vmatpush.msrb.mxu3 %v3333_v63  ;;  %v3309_v32 = vld [vmem:[%s4048_s16 + $0x2e8] sm:$0xff] }
 0x466   : > { %2701 = vmatpush.msra.mxu0 %v4819_v57  ;;  %v5134_v57 = vld [vmem:[%s4048_s16 + $0x380] sm:$0xff] }
 0x467   : > { %2722 = vmatpush.msra.mxu1 %v4931_v38  ;;  %2658 = vmatpush.msrb.mxu2 %v5134_v57  ;;  %v2357_v38 = vld [vmem:[#allocation2 + $0x8] sm:$0x30] }
 0x468   : > { %2702 = vmatpush.msra.mxu0 %v4824_v4  ;;  %v3329_v4 = vld [vmem:[%s4048_s16 + $0x388] sm:$0xff] }
 0x469   : > { %2723 = vmatpush.msra.mxu1 %v4936_v28  ;;  %2678 = vmatpush.msrb.mxu3 %v3329_v4 }
 0x46a   : > { %2703 = vmatpush.msra.mxu0 %v4829_v3  ;;  %v5139_v3 = vld [vmem:[%s4048_s16 + $0x360] sm:$0xff] }
 0x46b   : > { %2724 = vmatpush.msra.mxu1 %v4940_v24  ;;  %2659 = vmatpush.msrb.mxu2 %v5139_v3  ;;  %v5166_v24 = vld [vmem:[%s4048_s16 + $0x2c0] sm:$0xff] }
 0x46c   : > { %2704 = vmatpush.msra.mxu0 %v4834_v5  ;;  %v3325_v5 = vld [vmem:[%s4048_s16 + $0x368] sm:$0xff] }
 0x46d   : > { %2725 = vmatpush.msra.mxu1 %v4944_v40  ;;  %2679 = vmatpush.msrb.mxu3 %v3325_v5  ;;  %v3305_v40 = vld [vmem:[%s4048_s16 + $0x2c8] sm:$0xff] }
 0x46e   : > { %2705 = vmatpush.msra.mxu0 %v4839_v15  ;;  %v5144_v15 = vld [vmem:[%s4048_s16 + $0x340] sm:$0xff] }
 0x46f   : > { %2726 = vmatpush.msra.mxu1 %v4948_v2  ;;  %2660 = vmatpush.msrb.mxu2 %v5144_v15  ;;  %v5171_v2 = vld [vmem:[%s4048_s16 + $0x2a0] sm:$0xff] }
 0x470   : > { %2706 = vmatpush.msra.mxu0 %v4844_v62  ;;  %v3321_v62 = vld [vmem:[%s4048_s16 + $0x348] sm:$0xff] }
 0x471   : > { %2727 = vmatpush.msra.mxu1 %v4952_v14  ;;  %2680 = vmatpush.msrb.mxu3 %v3321_v62  ;;  %v3301_v14 = vld [vmem:[%s4048_s16 + $0x2a8] sm:$0xff] }
 0x472   : > { %2707 = vmatpush.msra.mxu0 %v4849_v59  ;;  %v5149_v59 = vld [vmem:[%s4048_s16 + $0x320] sm:$0xff] }
 0x473   : > { %2728 = vmatpush.msra.mxu1 %v4956_v33  ;;  %2661 = vmatpush.msrb.mxu2 %v5149_v59 }
 0x474   : > { %2708 = vmatpush.msra.mxu0 %v4854_v37  ;;  %v3317_v37 = vld [vmem:[%s4048_s16 + $0x328] sm:$0xff] }
 0x475   : > { %2729 = vmatpush.msra.mxu1 %v4960_v12  ;;  %2681 = vmatpush.msrb.mxu3 %v3317_v37  ;;  %v5175_v12 = vld [vmem:[%s4048_s16 + $0x280] sm:$0xff] }
 0x476   : > { %2709 = vmatpush.msra.mxu0 %v4859_v52  ;;  %v5154_v52 = vld [vmem:[%s4048_s16 + $0x300] sm:$0xff] }
 0x477   : > { %2730 = vmatpush.msra.mxu1 %v4964_v34  ;;  %2662 = vmatpush.msrb.mxu2 %v5154_v52  ;;  %v3297_v34 = vld [vmem:[%s4048_s16 + $0x288] sm:$0xff] }
 0x478   : > { %2710 = vmatpush.msra.mxu0 %v4864_v6  ;;  %v3313_v6 = vld [vmem:[%s4048_s16 + $0x308] sm:$0xff] }
 0x479   : > { %2682 = vmatpush.msrb.mxu3 %v3313_v6  ;;  %2663 = vmatpush.msrb.mxu2 %v5160_v53 }
 0x47a   : > { %2905 = vmatpush.msrb.mxu0 %v3341_v51 }
 0x47b   : > { %2683 = vmatpush.msrb.mxu3 %v3309_v32  ;;  %2664 = vmatpush.msrb.mxu2 %v5166_v24 }
 0x47c   : > { %2906 = vmatpush.msrb.mxu0 %v3337_v13 }
 0x47d   : > { %2684 = vmatpush.msrb.mxu3 %v3305_v40  ;;  %2665 = vmatpush.msrb.mxu2 %v5171_v2 }
 0x47e   : > { %2907 = vmatpush.msrb.mxu0 %v3333_v63  ;;  %v5195_v63 = vld [vmem:[%s4048_s16 + $0x200] sm:$0xff] }
 0x47f   : > { %2685 = vmatpush.msrb.mxu3 %v3301_v14  ;;  %2666 = vmatpush.msrb.mxu2 %v5175_v12 }
 0x480   : > { %2908 = vmatpush.msrb.mxu0 %v3329_v4  ;;  %v3281_v4 = vld [vmem:[%s4048_s16 + $0x208] sm:$0xff] }
 0x481   : > { %2686 = vmatpush.msrb.mxu3 %v3297_v34  ;;  %2667 = vmatpush.msrb.mxu2 %v5180_v39 }
 0x482   : > { %2909 = vmatpush.msrb.mxu0 %v3325_v5 }
 0x483   : > { %2687 = vmatpush.msrb.mxu3 %v3293_v46  ;;  %2668 = vmatpush.msrb.mxu2 %v5185_v18 }
 0x484   : > { %2910 = vmatpush.msrb.mxu0 %v3321_v62 }
 0x485   : > { %2688 = vmatpush.msrb.mxu3 %v3289_v31  ;;  %2669 = vmatpush.msrb.mxu2 %v5190_v16 }
 0x486   : > { %2911 = vmatpush.msrb.mxu0 %v3317_v37 }
 0x487   : > { %2689 = vmatpush.msrb.mxu3 %v3285_v20  ;;  %2670 = vmatpush.msrb.mxu2 %v5195_v63 }
 0x488   : > { %2912 = vmatpush.msrb.mxu0 %v3313_v6 }
 0x489   : > { %2690 = vmatpush.msrb.mxu3 %v3281_v4  ;;  %2794 = vmatpush.msra.mxu2 %v4967_v56 }
 0x48a   : > { %2913 = vmatpush.msrb.mxu0 %v3309_v32 }
 0x48b   : > { %2885 = vmatpush.msra.mxu3 %v5119_v49  ;;  %2795 = vmatpush.msra.mxu2 %v4970_v11 }
 0x48c   : > { %2914 = vmatpush.msrb.mxu0 %v3305_v40 }
 0x48d   : > { %2886 = vmatpush.msra.mxu3 %v5124_v9  ;;  %2796 = vmatpush.msra.mxu2 %v4975_v25 }
 0x48e   : > { %2915 = vmatpush.msrb.mxu0 %v3301_v14  ;;  %v3389_v14 = vld [vmem:[%s4048_s16 + $0x358] sm:$0xff] }
 0x48f   : > { %2887 = vmatpush.msra.mxu3 %v5129_v55  ;;  %2797 = vmatpush.msra.mxu2 %v4980_v1  ;;  %v2538_v1 = vrot.slane %v5083_v42, 2  ;;  %v3409_v42 = vld [vmem:[%s4048_s16 + $0x3f8] sm:$0xff] }
 0x490   : > { %2916 = vmatpush.msrb.mxu0 %v3297_v34  ;;  %v3364_v34 = vld [vmem:[%s4048_s16 + $0x290] sm:$0xff] }
 0x491   : > { %2888 = vmatpush.msra.mxu3 %v5134_v57  ;;  %2798 = vmatpush.msra.mxu2 %v4986_v44  ;;  %v3405_v57 = vld [vmem:[%s4048_s16 + $0x3d8] sm:$0xff] }
 0x492   : > { %2917 = vmatpush.msrb.mxu0 %v3293_v46  ;;  %v3377_v46 = vld [vmem:[%s4048_s16 + $0x2f8] sm:$0xff] }
 0x493   : > { %2889 = vmatpush.msra.mxu3 %v5139_v3  ;;  %2799 = vmatpush.msra.mxu2 %v4991_v48  ;;  %v3384_v3 = vld [vmem:[%s4048_s16 + $0x330] sm:$0xff] }
 0x494   : > { %2918 = vmatpush.msrb.mxu0 %v3289_v31  ;;  %v3356_v31 = vld [vmem:[%s4048_s16 + $0x250] sm:$0xff] }
 0x495   : > { %2890 = vmatpush.msra.mxu3 %v5144_v15  ;;  %2800 = vmatpush.msra.mxu2 %v4996_v23  ;;  %v3401_v15 = vld [vmem:[%s4048_s16 + $0x3b8] sm:$0xff] }
 0x496   : > { %2919 = vmatpush.msrb.mxu0 %v3285_v20 }
 0x497   : > { %2891 = vmatpush.msra.mxu3 %v5149_v59  ;;  %2801 = vmatpush.msra.mxu2 %v5001_v29  ;;  %v3380_v59 = vld [vmem:[%s4048_s16 + $0x310] sm:$0xff] }
 0x498   : > { %2920 = vmatpush.msrb.mxu0 %v3281_v4 }
 0x499   : > { %2892 = vmatpush.msra.mxu3 %v5154_v52  ;;  %2802 = vmatpush.msra.mxu2 %v5006_v35  ;;  %v3397_v52 = vld [vmem:[%s4048_s16 + $0x398] sm:$0xff] }
 0x49b   : > { %2893 = vmatpush.msra.mxu3 %v5160_v53  ;;  %2803 = vmatpush.msra.mxu2 %v5031_v61 }
 0x49d   : > { %2894 = vmatpush.msra.mxu3 %v5166_v24  ;;  %2804 = vmatpush.msra.mxu2 %v5034_v10  ;;  %v3408_v10 = vld [vmem:[%s4048_s16 + $0x3f0] sm:$0xff]  ;;  %v3393_v24 = vld [vmem:[%s4048_s16 + $0x378] sm:$0xff] }
 0x49f   : > { %2895 = vmatpush.msra.mxu3 %v5171_v2  ;;  %2805 = vmatpush.msra.mxu2 %v5039_v41  ;;  %v3404_v41 = vld [vmem:[%s4048_s16 + $0x3d0] sm:$0xff] }
 0x4a0   : > { %v3372_v2 = vld [vmem:[%s4048_s16 + $0x2d0] sm:$0xff] }
 0x4a1   : > { %2896 = vmatpush.msra.mxu3 %v5175_v12  ;;  %2806 = vmatpush.msra.mxu2 %v5044_v60  ;;  %v3400_v60 = vld [vmem:[%s4048_s16 + $0x3b0] sm:$0xff]  ;;  %v3385_v12 = vld [vmem:[%s4048_s16 + $0x338] sm:$0xff] }
 0x4a3   : > { %2897 = vmatpush.msra.mxu3 %v5180_v39  ;;  %2807 = vmatpush.msra.mxu2 %v5051_v22  ;;  %v3396_v22 = vld [vmem:[%s4048_s16 + $0x390] sm:$0xff] }
 0x4a4   : > { %v3360_v39 = vld [vmem:[%s4048_s16 + $0x270] sm:$0xff] }
 0x4a5   : > { %2898 = vmatpush.msra.mxu3 %v5185_v18  ;;  %2808 = vmatpush.msra.mxu2 %v5056_v30  ;;  %v3392_v30 = vld [vmem:[%s4048_s16 + $0x370] sm:$0xff] }
 0x4a7   : > { %2899 = vmatpush.msra.mxu3 %v5190_v16  ;;  %2809 = vmatpush.msra.mxu2 %v5061_v19  ;;  %v3388_v19 = vld [vmem:[%s4048_s16 + $0x350] sm:$0xff] }
 0x4a9   : > { %2900 = vmatpush.msra.mxu3 %v5195_v63  ;;  %v3369_v63 = vld [vmem:[%s4048_s16 + $0x2b8] sm:$0xff] }
 0x4d4   : > { %v2351_v54 = vpop.f32.mrf.mxu0  ;;  %v2442_v45 = vpop.f32.mrf.mxu1 }
 0x4d5   : > { %v2355_v8 = vadd.f32 %v3212_v17, %v2351_v54  ;;  %v2509_v26 = vrot.slane %v2442_v45, 4  ;;  %v2359_v45 = vld [vmem:[#allocation2 + $0x28] sm:$0x30] }
 0x4d7   : > { %3213 = vst [vmem:[%s4581_s11 + $0x6] sm:$0x3] %v2355_v8  ;;  %v2517_v28 = vadd.f32 %v2509_v26, %v2357_v38  ;;  %v3278_v38 = vld [vmem:[%s4581_s11 + $0x4] sm:$0x3] }
 0x4d9   : > { %v2521_v33 = vsub.f32 0.0, %v2517_v28  ;;  %v3376_v28 = vld [vmem:[%s4048_s16 + $0x2f0] sm:$0xff] }
 0x4db   : > { %v2522_v21 = vmul.f32 1.442695, %v2521_v33  ;;  %v2462_v27 = vpop.f32.mrf.mxu2  ;;  %v2482_v13 = vpop.f32.mrf.mxu3  ;;  %v3368_v33 = vld [vmem:[%s4048_s16 + $0x2b0] sm:$0xff] }
 0x4dc   : > { %v2510_v47 = vrot.slane %v2462_v27, 4  ;;  %v2502_v58 = vpop.f32.mrf.mxu0  ;;  %v2511_v6 = vrot.slane %v2482_v13, 4  ;;  %v3352_v13 = vld [vmem:[%s4048_s16 + $0x230] sm:$0xff] }
 0x4dd   : > { %v2512_v7 = vrot.slane %v2502_v58, 4  ;;  %3509 = vpow2.f32 %v2522_v21  ;;  %v3381_v21 = vld [vmem:[%s4048_s16 + $0x318] sm:$0xff] }
 0x4de   : > { %v2518_v36 = vadd.f32 %v2510_v47, %v2358_v0  ;;  %v2519_v8 = vadd.f32 %v2511_v6, %v2359_v45  ;;  %v2587_v0 = vld [vmem:[#allocation2 + $0x8] sm:$0xc]  ;;  %v3348_v6 = vld [vmem:[%s4048_s16 + $0x210] sm:$0xff] }
 0x4df   : > { %v2520_v50 = vadd.f32 %v2512_v7, %v2360_v43 }
 0x4e0   : > { %v2526_v51 = vsub.f32 0.0, %v2518_v36  ;;  %v3373_v36 = vld [vmem:[%s4048_s16 + $0x2d8] sm:$0xff] }
 0x4e1   : > { %v2532_v62 = vsub.f32 0.0, %v2520_v50  ;;  %v2588_v50 = vld [vmem:[#allocation2 + $0x20] sm:$0xc] }
 0x4e2   : > { %v2527_v5 = vmul.f32 1.442695, %v2526_v51  ;;  %v2590_v51 = vld [vmem:[#allocation2 + $0x38] sm:$0xc] }
 0x4e3   : > { %v3510_v37 = vpop.eup %3509  ;;  %v2533_v54 = vmul.f32 1.442695, %v2532_v62 }
 0x4e4   : > { %3511 = vpow2.f32 %v2527_v5  ;;  %v2524_v17 = vadd.f32 1.0, %v3510_v37 }
 0x4e5   : > { %3513 = vpow2.f32 %v2533_v54  ;;  %v3365_v54 = vld [vmem:[%s4048_s16 + $0x298] sm:$0xff] }
 0x4e6   : > { %3515 = vrcp.f32 %v2524_v17 }
 0x4e7   : > { %3517 = vtanh.f32 %v2519_v8 }
 0x4ea   : > { %v3512_v26 = vpop.eup %3511 }
 0x4eb   : > { %v2529_v32 = vadd.f32 1.0, %v3512_v26  ;;  %v3514_v56 = vpop.eup %3513 }
 0x4ec   : > { %v3516_v11 = vpop.eup %3515  ;;  %v2535_v9 = vadd.f32 1.0, %v3514_v56  ;;  %v3357_v56 = vld [vmem:[%s4048_s16 + $0x258] sm:$0xff] }
 0x4ed   : > { %3519 = vrcp.f32 %v2529_v32  ;;  %v3518_v25 = vpop.eup %3517  ;;  %v3361_v32 = vld [vmem:[%s4048_s16 + $0x278] sm:$0xff] }
 0x4ee   : > { %v2541_v55 = vmul.f32 %v3518_v25, %v3516_v11  ;;  %3521 = vrcp.f32 %v2535_v9  ;;  %v2589_v11 = vld [vmem:[#allocation2 + $0x28] sm:$0xc]  ;;  %v3349_v9 = vld [vmem:[%s4048_s16 + $0x218] sm:$0xff] }
 0x4f3   : > { %v3520_v49 = vpop.eup %3519 }
 0x4f4   : > { %v2540_v44 = vmul.f32 %v3520_v49, %v2538_v1  ;;  %v3522_v23 = vpop.eup %3521  ;;  %v3353_v1 = vld [vmem:[%s4048_s16 + $0x238] sm:$0xff] }
 0x4f6   : > { %v5219_v48 = vadd.f32 %v2541_v55, %v2540_v44 }
 0x4f8   : > { %3523 = vtanh.f32 %v5219_v48 }
 0x4fe   : > { %v3524_v29 = vpop.eup %3523 }
 0x4ff   : > { %v2544_v35 = vmul.f32 %v3524_v29, %v3522_v23 }
 0x501   : > { %v2562_v61 = vrot.slane %v2544_v35, 4 }
 0x503   : > { %2580 = vmatmul.f32.vlgmr.msrb.gmra.mxu1 %v2562_v61  ;;  %2671 = vmatmul.f32.vlgmr.msrb.gmra.mxu2 %v2562_v61 }
 0x504   : > { %2691 = vmatmul.f32.vlgmr.msrb.gmra.mxu3 %v2562_v61  ;;  %2711 = vmatmul.f32.vlgmr.msra.gmra.mxu0 %v2562_v61 }
 0x505   : > { %2925 = vmatpush.msrb.mxu1 %v3408_v10  ;;  %2945 = vmatpush.msrb.mxu2 %v3409_v42 }
 0x507   : > { %2926 = vmatpush.msrb.mxu1 %v3404_v41  ;;  %2946 = vmatpush.msrb.mxu2 %v3405_v57  ;;  %v2768_v41 = vrot.slane %v5219_v48, 2  ;;  %v3008_v48 = vld [vmem:[%s4424_s7 + $0xf8] sm:$0xff] }
 0x508   : > { %3009 = vmatpush.msrb.mxu3 %v3008_v48 }
 0x509   : > { %2927 = vmatpush.msrb.mxu1 %v3400_v60  ;;  %2947 = vmatpush.msrb.mxu2 %v3401_v15 }
 0x50b   : > { %2731 = vmatmul.f32.vlgmr.msra.gmra.mxu1 %v2562_v61  ;;  %2948 = vmatpush.msrb.mxu2 %v3397_v52  ;;  %v3007_v52 = vld [vmem:[%s4424_s7 + $0xf0] sm:$0xff] }
 0x50c   : > { %2928 = vmatpush.msrb.mxu1 %v3396_v22  ;;  %3010 = vmatpush.msrb.mxu3 %v3007_v52 }
 0x50d   : > { %2949 = vmatpush.msrb.mxu2 %v3393_v24  ;;  %v3003_v24 = vld [vmem:[%s4424_s7 + $0xd0] sm:$0xff] }
 0x50e   : > { %2929 = vmatpush.msrb.mxu1 %v3392_v30 }
 0x50f   : > { %2950 = vmatpush.msrb.mxu2 %v3389_v14  ;;  %v3000_v14 = vld [vmem:[%s4424_s7 + $0xb8] sm:$0xff] }
 0x510   : > { %2930 = vmatpush.msrb.mxu1 %v3388_v19 }
 0x511   : > { %2951 = vmatpush.msrb.mxu2 %v3385_v12  ;;  %v2998_v12 = vld [vmem:[%s4424_s7 + $0xa8] sm:$0xff] }
 0x512   : > { %2931 = vmatpush.msrb.mxu1 %v3384_v3 }
 0x513   : > { %2952 = vmatpush.msrb.mxu2 %v3381_v21 }
 0x514   : > { %2932 = vmatpush.msrb.mxu1 %v3380_v59 }
 0x515   : > { %2953 = vmatpush.msrb.mxu2 %v3377_v46 }
 0x516   : > { %2933 = vmatpush.msrb.mxu1 %v3376_v28  ;;  %v3004_v28 = vld [vmem:[%s4424_s7 + $0xd8] sm:$0xff] }
 0x517   : > { %2954 = vmatpush.msrb.mxu2 %v3373_v36  ;;  %v2817_v36 = vld [vmem:[#allocation2 + $0x8] sm:$0x3] }
 0x518   : > { %2934 = vmatpush.msrb.mxu1 %v3372_v2  ;;  %v3001_v2 = vld [vmem:[%s4424_s7 + $0xc0] sm:$0xff] }
 0x519   : > { %2955 = vmatpush.msrb.mxu2 %v3369_v63 }
 0x51a   : > { %2935 = vmatpush.msrb.mxu1 %v3368_v33  ;;  %v2999_v33 = vld [vmem:[%s4424_s7 + $0xb0] sm:$0xff] }
 0x51b   : > { %2956 = vmatpush.msrb.mxu2 %v3365_v54 }
 0x51c   : > { %2936 = vmatpush.msrb.mxu1 %v3364_v34  ;;  %v2818_v34 = vld [vmem:[#allocation2 + $0x20] sm:$0x3] }
 0x51d   : > { %2957 = vmatpush.msrb.mxu2 %v3361_v32 }
 0x51e   : > { %2937 = vmatpush.msrb.mxu1 %v3360_v39  ;;  %v2996_v39 = vld [vmem:[%s4424_s7 + $0x98] sm:$0xff] }
 0x51f   : > { %2958 = vmatpush.msrb.mxu2 %v3357_v56 }
 0x520   : > { %2938 = vmatpush.msrb.mxu1 %v3356_v31  ;;  %v3344_v31 = vld [vmem:[%s4581_s11 + $0x2] sm:$0x3] }
 0x521   : > { %2959 = vmatpush.msrb.mxu2 %v3353_v1 }
 0x522   : > { %2939 = vmatpush.msrb.mxu1 %v3352_v13 }
 0x523   : > { %2960 = vmatpush.msrb.mxu2 %v3349_v9 }
 0x524   : > { %2940 = vmatpush.msrb.mxu1 %v3348_v6 }
 0x580   : > { %v2581_v53 = vpop.f32.mrf.mxu1 }
 0x581   : > { %v2585_v40 = vadd.f32 %v3278_v38, %v2581_v53  ;;  %v2712_v62 = vpop.f32.mrf.mxu0  ;;  %v3006_v53 = vld [vmem:[%s4424_s7 + $0xe8] sm:$0xff]  ;;  %v3005_v38 = vld [vmem:[%s4424_s7 + $0xe0] sm:$0xff] }
 0x582   : > { %v2741_v26 = vrot.slane %v2712_v62, 6  ;;  %3011 = vmatpush.msrb.mxu3 %v3006_v53  ;;  %v2820_v62 = vld [vmem:[#allocation2 + $0x38] sm:$0x3] }
 0x583   : > { %3279 = vst [vmem:[%s4581_s11 + $0x4] sm:$0x3] %v2585_v40  ;;  %v3002_v40 = vld [vmem:[%s4424_s7 + $0xc8] sm:$0xff] }
 0x584   : > { %v2749_v49 = vadd.f32 %v2741_v26, %v2589_v11  ;;  %3012 = vmatpush.msrb.mxu3 %v3005_v38 }
 0x586   : > { %v2672_v27 = vpop.f32.mrf.mxu2  ;;  %3013 = vmatpush.msrb.mxu3 %v3004_v28 }
 0x587   : > { %v2739_v47 = vrot.slane %v2672_v27, 6  ;;  %v2692_v58 = vpop.f32.mrf.mxu3  ;;  %v2997_v27 = vld [vmem:[%s4424_s7 + $0xa0] sm:$0xff] }
 0x588   : > { %v2740_v7 = vrot.slane %v2692_v58, 6  ;;  %v2732_v18 = vpop.f32.mrf.mxu1  ;;  %3014 = vmatpush.msrb.mxu3 %v3003_v24 }
 0x589   : > { %v2747_v43 = vadd.f32 %v2739_v47, %v2587_v0  ;;  %v2742_v16 = vrot.slane %v2732_v18, 6  ;;  %v2995_v47 = vld [vmem:[%s4424_s7 + $0x90] sm:$0xff]  ;;  %v2994_v0 = vld [vmem:[%s4424_s7 + $0x88] sm:$0xff] }
 0x58a   : > { %v2748_v20 = vadd.f32 %v2740_v7, %v2588_v50  ;;  %3015 = vmatpush.msrb.mxu3 %v3002_v40 }
 0x58b   : > { %v2751_v4 = vsub.f32 0.0, %v2747_v43  ;;  %v2750_v5 = vadd.f32 %v2742_v16, %v2590_v51 }
 0x58c   : > { %v2756_v37 = vsub.f32 0.0, %v2748_v20  ;;  %3016 = vmatpush.msrb.mxu3 %v3001_v2  ;;  %v2993_v20 = vld [vmem:[%s4424_s7 + $0x80] sm:$0xff] }
 0x58d   : > { %v2752_v17 = vmul.f32 1.442695, %v2751_v4  ;;  %v2762_v8 = vsub.f32 0.0, %v2750_v5  ;;  %v2819_v5 = vld [vmem:[#allocation2 + $0x28] sm:$0x3] }
 0x58e   : > { %v2757_v45 = vmul.f32 1.442695, %v2756_v37  ;;  %3017 = vmatpush.msrb.mxu3 %v3000_v14 }
 0x58f   : > { %3525 = vpow2.f32 %v2752_v17  ;;  %v2763_v25 = vmul.f32 1.442695, %v2762_v8 }
 0x590   : > { %3527 = vpow2.f32 %v2757_v45  ;;  %3018 = vmatpush.msrb.mxu3 %v2999_v33 }
 0x591   : > { %3529 = vpow2.f32 %v2763_v25 }
 0x592   : > { %3531 = vtanh.f32 %v2749_v49  ;;  %3019 = vmatpush.msrb.mxu3 %v2998_v12 }
 0x594   : > { %3020 = vmatpush.msrb.mxu3 %v2997_v27 }
 0x595   : > { %v3526_v44 = vpop.eup %3525 }
 0x596   : > { %v3528_v55 = vpop.eup %3527  ;;  %v2754_v23 = vadd.f32 1.0, %v3526_v44  ;;  %3021 = vmatpush.msrb.mxu3 %v2996_v39 }
 0x597   : > { %v2759_v29 = vadd.f32 1.0, %v3528_v55  ;;  %v3530_v35 = vpop.eup %3529 }
 0x598   : > { %3533 = vrcp.f32 %v2754_v23  ;;  %v3532_v61 = vpop.eup %3531  ;;  %v2765_v30 = vadd.f32 1.0, %v3530_v35  ;;  %3022 = vmatpush.msrb.mxu3 %v2995_v47 }
 0x599   : > { %3535 = vrcp.f32 %v2759_v29 }
 0x59a   : > { %3537 = vrcp.f32 %v2765_v30  ;;  %3023 = vmatpush.msrb.mxu3 %v2994_v0 }
 0x59c   : > { %3024 = vmatpush.msrb.mxu3 %v2993_v20 }
 0x59e   : > { %v3534_v10 = vpop.eup %3533 }
 0x59f   : > { %v3536_v60 = vpop.eup %3535  ;;  %v2771_v22 = vmul.f32 %v3534_v10, %v3532_v61 }
 0x5a0   : > { %v2770_v42 = vmul.f32 %v3536_v60, %v2768_v41  ;;  %v3538_v57 = vpop.eup %3537  ;;  %v3029_v41 = vld [vmem:[%s4581_s11] sm:$0x3] }
 0x5a2   : > { %v5271_v19 = vadd.f32 %v2771_v22, %v2770_v42 }
 0x5a4   : > { %3539 = vtanh.f32 %v5271_v19  ;;  %v2986_v1 = vrot.slane %v5271_v19, 2 }
 0x5aa   : > { %v3540_v3 = vpop.eup %3539 }
 0x5ab   : > { %v2774_v15 = vmul.f32 %v3540_v3, %v3538_v57 }
 0x5ad   : > { %v2792_v59 = vrot.slane %v2774_v15, 2 }
 0x5af   : > { %2810 = vmatmul.f32.vlgmr.msra.gmra.mxu2 %v2792_v59  ;;  %2901 = vmatmul.f32.vlgmr.msra.gmra.mxu3 %v2792_v59 }
 0x5b0   : > { %2921 = vmatmul.f32.vlgmr.msrb.gmra.mxu0 %v2792_v59  ;;  %2941 = vmatmul.f32.vlgmr.msrb.gmra.mxu1 %v2792_v59 }
 0x5b7   : > { %2961 = vmatmul.f32.vlgmr.msrb.gmra.mxu2 %v2792_v59 }
 0x62d   : > { %v2922_v21 = vpop.f32.mrf.mxu0  ;;  %v2942_v63 = vpop.f32.mrf.mxu1 }
 0x62e   : > { %v2966_v46 = vadd.f32 %v2922_v21, %v2818_v34  ;;  %v2967_v6 = vadd.f32 %v2942_v63, %v2819_v5 }
 0x630   : > { %v2974_v58 = vsub.f32 0.0, %v2966_v46 }
 0x632   : > { %v2975_v7 = vmul.f32 1.442695, %v2974_v58  ;;  %v2811_v18 = vpop.f32.mrf.mxu2  ;;  %v2902_v43 = vpop.f32.mrf.mxu3 }
 0x633   : > { %v2815_v50 = vadd.f32 %v3344_v31, %v2811_v18  ;;  %v2965_v16 = vadd.f32 %v2902_v43, %v2817_v36 }
 0x634   : > { %3541 = vpow2.f32 %v2975_v7 }
 0x635   : > { %3345 = vst [vmem:[%s4581_s11 + $0x2] sm:$0x3] %v2815_v50  ;;  %v2969_v51 = vsub.f32 0.0, %v2965_v16 }
 0x637   : > { %v2970_v13 = vmul.f32 1.442695, %v2969_v51 }
 0x639   : > { %3543 = vpow2.f32 %v2970_v13 }
 0x63a   : > { %v3542_v4 = vpop.eup %3541  ;;  %v2962_v37 = vpop.f32.mrf.mxu2  ;;  %3545 = vtanh.f32 %v2967_v6 }
 0x63b   : > { %v2968_v54 = vadd.f32 %v2962_v37, %v2820_v62  ;;  %v2977_v17 = vadd.f32 1.0, %v3542_v4 }
 0x63d   : > { %v2980_v45 = vsub.f32 0.0, %v2968_v54  ;;  %3547 = vrcp.f32 %v2977_v17 }
 0x63f   : > { %v3544_v8 = vpop.eup %3543  ;;  %v2981_v26 = vmul.f32 1.442695, %v2980_v45 }
 0x640   : > { %v2972_v32 = vadd.f32 1.0, %v3544_v8  ;;  %v3546_v56 = vpop.eup %3545 }
 0x641   : > { %3549 = vpow2.f32 %v2981_v26 }
 0x642   : > { %3551 = vrcp.f32 %v2972_v32 }
 0x643   : > { %v3548_v11 = vpop.eup %3547 }
 0x644   : > { %v2988_v44 = vmul.f32 %v3548_v11, %v2986_v1 }
 0x647   : > { %v3550_v25 = vpop.eup %3549 }
 0x648   : > { %v3552_v49 = vpop.eup %3551  ;;  %v2983_v9 = vadd.f32 1.0, %v3550_v25 }
 0x649   : > { %v2989_v55 = vmul.f32 %v3552_v49, %v3546_v56 }
 0x64a   : > { %3553 = vrcp.f32 %v2983_v9 }
 0x64b   : > { %v2990_v23 = vadd.f32 %v2989_v55, %v2988_v44 }
 0x64d   : > { %3555 = vtanh.f32 %v2990_v23 }
 0x650   : > { %v3554_v29 = vpop.eup %3553 }
 0x653   : > { %v3556_v35 = vpop.eup %3555 }
 0x654   : > { %v2992_v61 = vmul.f32 %v3556_v35, %v3554_v29 }
 0x656   : > { %3025 = vmatmul.f32.vlgmr.msrb.gmra.mxu3 %v2992_v61 }
 0x6d9   : > { %v3026_v10 = vpop.f32.mrf.mxu3 }
 0x6da   : > { %v3030_v60 = vadd.f32 %v3029_v41, %v3026_v10 }
 0x6dc   : > { %3031 = vst [vmem:[%s4581_s11] sm:$0x3] %v3030_v60 }
 0x6dd PF: > { %s16_s21 = sadd.s32 1, %s3566_s21  }
 0x6de   : > { %p13_p4 = scmp.ge.s32.totalorder %s16_s21, 4  }
 0x6e0   :  { %15 = sbr.rel (!%p13_p4) target bundleno = 1 (0x1), region = 90 }

</bundles_post_ra>
